<compile_context>
chip_gen: v5e
topology: v5e:2x2
jax: 0.10.0
libtpu: 0.0.40
codegen_flags: <defaults>
</compile_context>

<pallas_src>
import jax
import jax.numpy as jnp
from jax.experimental import pallas as pl
from jax.experimental.pallas import tpu as pltpu


# ------------------------------ fused kernel ------------------------------- #

def smcn_fused_kernel(vis_ref, q_ref, len_ref, mask_ref, sel_ref,
                      w1_ref, b1_ref, w2_ref, b2_ref,
                      w_ih_ref, w_hh_ref, b_lstm_ref, w_l_ref, b_l_ref,
                      out_ref, gx_ref):
    f32 = jnp.float32
    BN, B = sel_ref.shape                 # snippets-per-branch rows, batch
    H = w_hh_ref.shape[0]                 # lang_hidden
    T = q_ref.shape[0] // B               # max_length (time steps)
    n_branch = vis_ref.shape[0] // BN     # 3 (pos / neg_intra / neg_inter)

    # ---- visual tower: one matmul over all branches & snippets (3*B*N rows) ----
    h1 = jnp.dot(vis_ref[...], w1_ref[...], preferred_element_type=f32) + b1_ref[...]
    h1 = jnp.maximum(h1, 0.0)
    # TODO(synk): training-mode nn.Dropout(p=0.3) not implemented; eval semantics.
    v_emb = jnp.dot(h1, w2_ref[...], preferred_element_type=f32) + b2_ref[...]   # (3*BN, E)

    # ---- LSTM: input projection + bias hoisted out of the serial recurrence ----
    gx_ref[...] = (jnp.dot(q_ref[...], w_ih_ref[...], preferred_element_type=f32)
                   + b_lstm_ref[...])                                             # (T*B, 4H)

    w_hh = w_hh_ref[...]
    lengths = len_ref[...]                                                        # (B, 1) int32
    h = jnp.zeros((B, H), f32)
    c = jnp.zeros((B, H), f32)
    last = jnp.zeros((B, H), f32)
    # Static T -> fully unrolled recurrence; only h @ W_hh remains on the
    # serial critical path. Gate slices are lane-aligned (H = 128).
    for t in range(T):
        gates = gx_ref[t * B:(t + 1) * B, :] + jnp.dot(h, w_hh,
                                                       preferred_element_type=f32)
        i = jax.nn.sigmoid(gates[:, 0 * H:1 * H])
        f = jax.nn.sigmoid(gates[:, 1 * H:2 * H])
        g = jnp.tanh(gates[:, 2 * H:3 * H])
        o = jax.nn.sigmoid(gates[:, 3 * H:4 * H])
        c = f * c + i * g
        h = o * jnp.tanh(c)
        # pack_padded_sequence + output[range(B), length-1]: keep h where t == len-1.
        # (lengths must be >= 1, as pack_padded_sequence requires.)
        last = jnp.where(lengths == (t + 1), h, last)

    # lang_encoder: Linear(lang_hidden, embedding_size)
    l_emb = jnp.dot(last, w_l_ref[...], preferred_element_type=f32) + b_l_ref[...]  # (B, E)

    # ---- fused compare + masked snippet pooling (epilogue, no extra launches) ----
    # replicate l_emb to one row per snippet via the 0/1 selection matrix
    sel = sel_ref[...]                                                              # (BN, B)
    l_rep = jnp.dot(sel, l_emb, preferred_element_type=f32)                         # (BN, E)

    rows = []
    for k in range(n_branch):
        vk = v_emb[k * BN:(k + 1) * BN, :]               # (BN, E)
        mk = mask_ref[k * BN:(k + 1) * BN, :]            # (BN, 1)
        d = vk - l_rep
        dist = jnp.sum(d * d, axis=-1, keepdims=True)    # (BN, 1) squared-L2 per snippet
        num = jnp.sum((dist * mk) * sel, axis=0, keepdims=True)   # (1, B)
        den = jnp.sum(mk * sel, axis=0, keepdims=True)            # (1, B) = K per batch
        rows.append(num / den)
    res = jnp.concatenate(rows, axis=0)                  # (n_branch, B)

    out_ref[...] = jnp.zeros_like(out_ref)
    out_ref[0:n_branch, 0:B] = res                       # single partial store


# ------------------------------- wrapper ----------------------------------- #

def _unpack_visual(arg):
    """SMCN._unpack_visual: dict with exactly 2 entries -> (features, mask)."""
    if arg is None:
        return None, None
    if isinstance(arg, dict):
        assert len(arg) == 2
        feat, mask = tuple(arg.values())
        return feat, mask
    return arg


def smcn_forward(params, padded_query, query_length, visual_pos,
                 visual_neg_intra=None, visual_neg_inter=None):
    feat_p, mask_p = _unpack_visual(visual_pos)
    feat_i, mask_i = _unpack_visual(visual_neg_intra)
    feat_e, mask_e = _unpack_visual(visual_neg_inter)

    B, N, Dv = feat_p.shape
    BN = B * N

    def _branch(feat, mask):
        if feat is None:   # dummy branch so the fused kernel always sees 3 slabs
            return jnp.zeros_like(feat_p), jnp.ones((B, N), jnp.float32)
        return feat, mask.astype(jnp.float32)

    branches = [(feat_p, mask_p.astype(jnp.float32)),
                _branch(feat_i, mask_i),
                _branch(feat_e, mask_e)]

    vis = jnp.concatenate([f.reshape(BN, Dv) for f, _ in branches], axis=0)       # (3*BN, Dv)
    mask_flat = jnp.concatenate([m.reshape(BN, 1) for _, m in branches], axis=0)  # (3*BN, 1)

    # selection matrix: snippet row r belongs to batch r // N
    sel = (jnp.arange(BN)[:, None] // N == jnp.arange(B)[None, :]).astype(jnp.float32)

    # time-major 2-D query so the in-kernel input projection is ONE matmul
    Bq, T, L = padded_query.shape
    assert Bq == B
    q2 = jnp.transpose(padded_query, (1, 0, 2)).reshape(T * B, L)
    lengths = query_length.astype(jnp.int32).reshape(B, 1)

    H4 = params["w_ih"].shape[1]
    n_rows = 8                               # >= 3 branches, sublane aligned
    n_cols = ((B + 127) // 128) * 128        # lane-dense output slab

    out = pl.pallas_call(
        smcn_fused_kernel,
        out_shape=jax.ShapeDtypeStruct((n_rows, n_cols), jnp.float32),
        scratch_shapes=[pltpu.VMEM((T * B, H4), jnp.float32)],   # hoisted gate slab
    )(vis, q2, lengths, mask_flat, sel,
      params["w1"], params["b1"], params["w2"], params["b2"],
      params["w_ih"], params["w_hh"], params["b_lstm"],
      params["w_l"], params["b_l"])

    res = out[:3, :B]
    c_pos = res[0]
    c_neg_intra = res[1] if feat_i is not None else None
    c_neg_inter = res[2] if feat_e is not None else None
    return c_pos, c_neg_intra, c_neg_inter


# ----------------------------- pure-JAX reference --------------------------- #

def smcn_reference(params, padded_query, query_length, feats, masks):
    hp = jax.lax.Precision.HIGHEST
    dense = lambda x, w, b: jnp.dot(x, w, precision=hp) + b

    v_embs = []
    for f in feats:
        Bf, Nf, Dv = f.shape
        h1 = jnp.maximum(dense(f.reshape(Bf * Nf, Dv), params["w1"], params["b1"]), 0.0)
        v = dense(h1, params["w2"], params["b2"])
        v_embs.append(v.reshape(Bf, Nf, -1))

    B, T, L = padded_query.shape
    H = params["w_hh"].shape[0]
    h = jnp.zeros((B, H), jnp.float32)
    c = jnp.zeros((B, H), jnp.float32)
    last = jnp.zeros((B, H), jnp.float32)
    for t in range(T):
        gates = (dense(padded_query[:, t, :], params["w_ih"], params["b_lstm"])
                 + jnp.dot(h, params["w_hh"], precision=hp))
        i = jax.nn.sigmoid(gates[:, 0 * H:1 * H])
        fg = jax.nn.sigmoid(gates[:, 1 * H:2 * H])
        g = jnp.tanh(gates[:, 2 * H:3 * H])
        o = jax.nn.sigmoid(gates[:, 3 * H:4 * H])
        c = fg * c + i * g
        h = o * jnp.tanh(c)
        last = jnp.where((query_length == (t + 1))[:, None], h, last)
    l_emb = dense(last, params["w_l"], params["b_l"])

    outs = []
    for v, m in zip(v_embs, masks):
        dist = jnp.sum((v - l_emb[:, None, :]) ** 2, axis=-1)
        outs.append(jnp.sum(dist * m, axis=-1) / jnp.sum(m, axis=-1))
    return tuple(outs)


# ----------------------------- setup / main --------------------------------- #

def init_params(key, visual_size, lang_size, embedding_size,
                visual_hidden, lang_hidden):
    # Mirrors MCN.init_parameters(): weights ~ U(-0.08, 0.08), biases = 0.
    ks = jax.random.split(key, 5)
    u = lambda k, shape: jax.random.uniform(k, shape, jnp.float32, -0.08, 0.08)
    H4 = 4 * lang_hidden
    return {
        "w1": u(ks[0], (visual_size, visual_hidden)),
        "b1": jnp.zeros((1, visual_hidden), jnp.float32),
        "w2": u(ks[1], (visual_hidden, embedding_size)),
        "b2": jnp.zeros((1, embedding_size), jnp.float32),
        "w_ih": u(ks[2], (lang_size, H4)),            # transposed (in, 4H)
        "w_hh": u(ks[3], (lang_hidden, H4)),          # transposed (H, 4H)
        "b_lstm": jnp.zeros((1, H4), jnp.float32),    # b_ih + b_hh, both zero
        "w_l": u(ks[4], (lang_hidden, embedding_size)),
        "b_l": jnp.zeros((1, embedding_size), jnp.float32),
    }


if __name__ == "__main__":
    # small, TPU-aligned shapes (lane dims = 128, stacked snippet rows = 24)
    B, N, T = 2, 4, 8
    visual_size = 128
    lang_size = 128
    embedding_size = 128
    visual_hidden = 128
    lang_hidden = 128

    key = jax.random.PRNGKey(0)
    k_p, k_q, k_vp, k_vi, k_ve = jax.random.split(key, 5)

    params = init_params(k_p, visual_size, lang_size, embedding_size,
                         visual_hidden, lang_hidden)

    padded_query = jax.random.normal(k_q, (B, T, lang_size), jnp.float32)
    query_length = jnp.array([8, 5], dtype=jnp.int32)   # sorted desc, lengths >= 1

    feat_pos = jax.random.normal(k_vp, (B, N, visual_size), jnp.float32)
    feat_ni = jax.random.normal(k_vi, (B, N, visual_size), jnp.float32)
    feat_ne = jax.random.normal(k_ve, (B, N, visual_size), jnp.float32)
    mask_pos = jnp.array([[1, 1, 1, 1], [1, 1, 1, 0]], jnp.float32)
    mask_ni = jnp.array([[1, 1, 0, 0], [1, 1, 1, 1]], jnp.float32)
    mask_ne = jnp.ones((B, N), jnp.float32)

    visual_pos = {"features": feat_pos, "mask": mask_pos}
    visual_neg_intra = {"features": feat_ni, "mask": mask_ni}
    visual_neg_inter = {"features": feat_ne, "mask": mask_ne}

    c_pos, c_ni, c_ne = smcn_forward(params, padded_query, query_length,
                                     visual_pos, visual_neg_intra, visual_neg_inter)
    jax.block_until_ready((c_pos, c_ni, c_ne))
    assert c_pos.shape == (B,) and c_ni.shape == (B,) and c_ne.shape == (B,)

    # sanity-check against a pure-JAX reference (eval-mode semantics)
    r_pos, r_ni, r_ne = smcn_reference(params, padded_query, query_length,
                                       [feat_pos, feat_ni, feat_ne],
                                       [mask_pos, mask_ni, mask_ne])
    for name, got, want in [("pos", c_pos, r_pos),
                            ("neg_intra", c_ni, r_ni),
                            ("neg_inter", c_ne, r_ne)]:
        err = float(jnp.max(jnp.abs(got - want)))
        assert err < 2e-2, f"{name}: max abs err {err}"

    print("KERNEL_OK")
</pallas_src>

<mosaic_0001>
module attributes {stable_mosaic.version = 11 : i64} {
  func.func @smcn_fused_kernel(%arg0: memref<24x128xf32, #tpu.memory_space<vmem>>, %arg1: memref<16x128xf32, #tpu.memory_space<vmem>>, %arg2: memref<2x1xi32, #tpu.memory_space<vmem>>, %arg3: memref<24x1xf32, #tpu.memory_space<vmem>>, %arg4: memref<8x2xf32, #tpu.memory_space<vmem>>, %arg5: memref<128x128xf32, #tpu.memory_space<vmem>>, %arg6: memref<1x128xf32, #tpu.memory_space<vmem>>, %arg7: memref<128x128xf32, #tpu.memory_space<vmem>>, %arg8: memref<1x128xf32, #tpu.memory_space<vmem>>, %arg9: memref<128x512xf32, #tpu.memory_space<vmem>>, %arg10: memref<128x512xf32, #tpu.memory_space<vmem>>, %arg11: memref<1x512xf32, #tpu.memory_space<vmem>>, %arg12: memref<128x128xf32, #tpu.memory_space<vmem>>, %arg13: memref<1x128xf32, #tpu.memory_space<vmem>>, %arg14: memref<8x128xf32, #tpu.memory_space<vmem>>, %arg15: memref<16x512xf32, #tpu.memory_space<vmem>>) attributes {dimension_semantics = [], scalar_prefetch = 0 : i64, scratch_operands = 1 : i64, tpu.core_type = #tpu.core_type<tc>} {
    %c0 = arith.constant 0 : index
    %c0_0 = arith.constant 0 : index
    %0 = vector.load %arg0[%c0, %c0_0] : memref<24x128xf32, #tpu.memory_space<vmem>>, vector<24x128xf32>
    %c0_1 = arith.constant 0 : index
    %c0_2 = arith.constant 0 : index
    %1 = vector.load %arg5[%c0_1, %c0_2] : memref<128x128xf32, #tpu.memory_space<vmem>>, vector<128x128xf32>
    %cst = arith.constant dense<0.000000e+00> : vector<24x128xf32>
    %2 = tpu.matmul %0, %1, %cst {dimension_numbers = #tpu.dot_dimension_numbers<[1], [0], [0], [1], [0, 0, 1, 1], [], []>} : vector<24x128xf32>, vector<128x128xf32>, vector<24x128xf32> -> vector<24x128xf32>
    %c0_3 = arith.constant 0 : index
    %c0_4 = arith.constant 0 : index
    %3 = vector.load %arg6[%c0_3, %c0_4] : memref<1x128xf32, #tpu.memory_space<vmem>>, vector<1x128xf32>
    %4 = vector.broadcast %3 : vector<1x128xf32> to vector<24x128xf32>
    %5 = arith.addf %2, %4 : vector<24x128xf32>
    %cst_5 = arith.constant 0.000000e+00 : f32
    %6 = vector.broadcast %cst_5 : f32 to vector<24x128xf32>
    %7 = arith.maximumf %5, %6 : vector<24x128xf32>
    %c0_6 = arith.constant 0 : index
    %c0_7 = arith.constant 0 : index
    %8 = vector.load %arg7[%c0_6, %c0_7] : memref<128x128xf32, #tpu.memory_space<vmem>>, vector<128x128xf32>
    %cst_8 = arith.constant dense<0.000000e+00> : vector<24x128xf32>
    %9 = tpu.matmul %7, %8, %cst_8 {dimension_numbers = #tpu.dot_dimension_numbers<[1], [0], [0], [1], [0, 0, 1, 1], [], []>} : vector<24x128xf32>, vector<128x128xf32>, vector<24x128xf32> -> vector<24x128xf32>
    %c0_9 = arith.constant 0 : index
    %c0_10 = arith.constant 0 : index
    %10 = vector.load %arg8[%c0_9, %c0_10] : memref<1x128xf32, #tpu.memory_space<vmem>>, vector<1x128xf32>
    %11 = vector.broadcast %10 : vector<1x128xf32> to vector<24x128xf32>
    %12 = arith.addf %9, %11 : vector<24x128xf32>
    %c0_11 = arith.constant 0 : index
    %c0_12 = arith.constant 0 : index
    %13 = vector.load %arg1[%c0_11, %c0_12] : memref<16x128xf32, #tpu.memory_space<vmem>>, vector<16x128xf32>
    %c0_13 = arith.constant 0 : index
    %c0_14 = arith.constant 0 : index
    %14 = vector.load %arg9[%c0_13, %c0_14] : memref<128x512xf32, #tpu.memory_space<vmem>>, vector<128x512xf32>
    %cst_15 = arith.constant dense<0.000000e+00> : vector<16x512xf32>
    %15 = tpu.matmul %13, %14, %cst_15 {dimension_numbers = #tpu.dot_dimension_numbers<[1], [0], [0], [1], [0, 0, 1, 1], [], []>} : vector<16x128xf32>, vector<128x512xf32>, vector<16x512xf32> -> vector<16x512xf32>
    %c0_16 = arith.constant 0 : index
    %c0_17 = arith.constant 0 : index
    %16 = vector.load %arg11[%c0_16, %c0_17] : memref<1x512xf32, #tpu.memory_space<vmem>>, vector<1x512xf32>
    %17 = vector.broadcast %16 : vector<1x512xf32> to vector<16x512xf32>
    %18 = arith.addf %15, %17 : vector<16x512xf32>
    %c0_18 = arith.constant 0 : index
    %c0_19 = arith.constant 0 : index
    %19 = vector.load %arg15[%c0_18, %c0_19] : memref<16x512xf32, #tpu.memory_space<vmem>>, vector<16x512xf32>
    tpu.vector_store %arg15[%c0_18, %c0_19], %18 {strides = array<i32>} : memref<16x512xf32, #tpu.memory_space<vmem>>, vector<16x512xf32>,
    %c0_20 = arith.constant 0 : index
    %c0_21 = arith.constant 0 : index
    %20 = vector.load %arg10[%c0_20, %c0_21] : memref<128x512xf32, #tpu.memory_space<vmem>>, vector<128x512xf32>
    %c0_22 = arith.constant 0 : index
    %c0_23 = arith.constant 0 : index
    %21 = vector.load %arg2[%c0_22, %c0_23] : memref<2x1xi32, #tpu.memory_space<vmem>>, vector<2x1xi32>
    %cst_24 = arith.constant 0.000000e+00 : f32
    %22 = vector.broadcast %cst_24 : f32 to vector<2x128xf32>
    %cst_25 = arith.constant 0.000000e+00 : f32
    %23 = vector.broadcast %cst_25 : f32 to vector<2x128xf32>
    %cst_26 = arith.constant 0.000000e+00 : f32
    %24 = vector.broadcast %cst_26 : f32 to vector<2x128xf32>
    %c0_27 = arith.constant 0 : index
    %c0_28 = arith.constant 0 : index
    %25 = vector.load %arg15[%c0_27, %c0_28] : memref<16x512xf32, #tpu.memory_space<vmem>>, vector<2x512xf32>
    %cst_29 = arith.constant dense<0.000000e+00> : vector<2x512xf32>
    %26 = tpu.matmul %22, %20, %cst_29 {dimension_numbers = #tpu.dot_dimension_numbers<[1], [0], [0], [1], [0, 0, 1, 1], [], []>} : vector<2x128xf32>, vector<128x512xf32>, vector<2x512xf32> -> vector<2x512xf32>
    %27 = arith.addf %25, %26 : vector<2x512xf32>
    %28 = vector.extract_strided_slice %27 {offsets = [0, 0], sizes = [2, 128], strides = [1, 1]} : vector<2x512xf32> to vector<2x128xf32>
    %29 = arith.negf %28 : vector<2x128xf32>
    %30 = math.exp %29 : vector<2x128xf32>
    %cst_30 = arith.constant 1.000000e+00 : f32
    %31 = vector.broadcast %cst_30 : f32 to vector<2x128xf32>
    %32 = arith.addf %31, %30 : vector<2x128xf32>
    %33 = arith.divf %31, %32 : vector<2x128xf32>
    %34 = vector.extract_strided_slice %27 {offsets = [0, 128], sizes = [2, 128], strides = [1, 1]} : vector<2x512xf32> to vector<2x128xf32>
    %35 = arith.negf %34 : vector<2x128xf32>
    %36 = math.exp %35 : vector<2x128xf32>
    %cst_31 = arith.constant 1.000000e+00 : f32
    %37 = vector.broadcast %cst_31 : f32 to vector<2x128xf32>
    %38 = arith.addf %37, %36 : vector<2x128xf32>
    %39 = arith.divf %37, %38 : vector<2x128xf32>
    %40 = vector.extract_strided_slice %27 {offsets = [0, 256], sizes = [2, 128], strides = [1, 1]} : vector<2x512xf32> to vector<2x128xf32>
    %41 = math.tanh %40 : vector<2x128xf32>
    %42 = vector.extract_strided_slice %27 {offsets = [0, 384], sizes = [2, 128], strides = [1, 1]} : vector<2x512xf32> to vector<2x128xf32>
    %43 = arith.negf %42 : vector<2x128xf32>
    %44 = math.exp %43 : vector<2x128xf32>
    %cst_32 = arith.constant 1.000000e+00 : f32
    %45 = vector.broadcast %cst_32 : f32 to vector<2x128xf32>
    %46 = arith.addf %45, %44 : vector<2x128xf32>
    %47 = arith.divf %45, %46 : vector<2x128xf32>
    %48 = arith.mulf %39, %23 : vector<2x128xf32>
    %49 = arith.mulf %33, %41 : vector<2x128xf32>
    %50 = arith.addf %48, %49 : vector<2x128xf32>
    %51 = math.tanh %50 : vector<2x128xf32>
    %52 = arith.mulf %47, %51 : vector<2x128xf32>
    %c1_i32 = arith.constant 1 : i32
    %53 = vector.broadcast %c1_i32 : i32 to vector<2x1xi32>
    %54 = arith.cmpi eq, %21, %53 : vector<2x1xi32>
    %55 = vector.shape_cast %54 : vector<2x1xi1> to vector<2x1xi1>
    %56 = vector.broadcast %55 : vector<2x1xi1> to vector<2x128xi1>
    %57 = arith.select %56, %52, %24 : vector<2x128xi1>, vector<2x128xf32>
    %c2 = arith.constant 2 : index
    %c0_33 = arith.constant 0 : index
    %58 = vector.load %arg15[%c2, %c0_33] : memref<16x512xf32, #tpu.memory_space<vmem>>, vector<2x512xf32>
    %cst_34 = arith.constant dense<0.000000e+00> : vector<2x512xf32>
    %59 = tpu.matmul %52, %20, %cst_34 {dimension_numbers = #tpu.dot_dimension_numbers<[1], [0], [0], [1], [0, 0, 1, 1], [], []>} : vector<2x128xf32>, vector<128x512xf32>, vector<2x512xf32> -> vector<2x512xf32>
    %60 = arith.addf %58, %59 : vector<2x512xf32>
    %61 = vector.extract_strided_slice %60 {offsets = [0, 0], sizes = [2, 128], strides = [1, 1]} : vector<2x512xf32> to vector<2x128xf32>
    %62 = arith.negf %61 : vector<2x128xf32>
    %63 = math.exp %62 : vector<2x128xf32>
    %cst_35 = arith.constant 1.000000e+00 : f32
    %64 = vector.broadcast %cst_35 : f32 to vector<2x128xf32>
    %65 = arith.addf %64, %63 : vector<2x128xf32>
    %66 = arith.divf %64, %65 : vector<2x128xf32>
    %67 = vector.extract_strided_slice %60 {offsets = [0, 128], sizes = [2, 128], strides = [1, 1]} : vector<2x512xf32> to vector<2x128xf32>
    %68 = arith.negf %67 : vector<2x128xf32>
    %69 = math.exp %68 : vector<2x128xf32>
    %cst_36 = arith.constant 1.000000e+00 : f32
    %70 = vector.broadcast %cst_36 : f32 to vector<2x128xf32>
    %71 = arith.addf %70, %69 : vector<2x128xf32>
    %72 = arith.divf %70, %71 : vector<2x128xf32>
    %73 = vector.extract_strided_slice %60 {offsets = [0, 256], sizes = [2, 128], strides = [1, 1]} : vector<2x512xf32> to vector<2x128xf32>
    %74 = math.tanh %73 : vector<2x128xf32>
    %75 = vector.extract_strided_slice %60 {offsets = [0, 384], sizes = [2, 128], strides = [1, 1]} : vector<2x512xf32> to vector<2x128xf32>
    %76 = arith.negf %75 : vector<2x128xf32>
    %77 = math.exp %76 : vector<2x128xf32>
    %cst_37 = arith.constant 1.000000e+00 : f32
    %78 = vector.broadcast %cst_37 : f32 to vector<2x128xf32>
    %79 = arith.addf %78, %77 : vector<2x128xf32>
    %80 = arith.divf %78, %79 : vector<2x128xf32>
    %81 = arith.mulf %72, %50 : vector<2x128xf32>
    %82 = arith.mulf %66, %74 : vector<2x128xf32>
    %83 = arith.addf %81, %82 : vector<2x128xf32>
    %84 = math.tanh %83 : vector<2x128xf32>
    %85 = arith.mulf %80, %84 : vector<2x128xf32>
    %c2_i32 = arith.constant 2 : i32
    %86 = vector.broadcast %c2_i32 : i32 to vector<2x1xi32>
    %87 = arith.cmpi eq, %21, %86 : vector<2x1xi32>
    %88 = vector.shape_cast %87 : vector<2x1xi1> to vector<2x1xi1>
    %89 = vector.broadcast %88 : vector<2x1xi1> to vector<2x128xi1>
    %90 = arith.select %89, %85, %57 : vector<2x128xi1>, vector<2x128xf32>
    %c4 = arith.constant 4 : index
    %c0_38 = arith.constant 0 : index
    %91 = vector.load %arg15[%c4, %c0_38] : memref<16x512xf32, #tpu.memory_space<vmem>>, vector<2x512xf32>
    %cst_39 = arith.constant dense<0.000000e+00> : vector<2x512xf32>
    %92 = tpu.matmul %85, %20, %cst_39 {dimension_numbers = #tpu.dot_dimension_numbers<[1], [0], [0], [1], [0, 0, 1, 1], [], []>} : vector<2x128xf32>, vector<128x512xf32>, vector<2x512xf32> -> vector<2x512xf32>
    %93 = arith.addf %91, %92 : vector<2x512xf32>
    %94 = vector.extract_strided_slice %93 {offsets = [0, 0], sizes = [2, 128], strides = [1, 1]} : vector<2x512xf32> to vector<2x128xf32>
    %95 = arith.negf %94 : vector<2x128xf32>
    %96 = math.exp %95 : vector<2x128xf32>
    %cst_40 = arith.constant 1.000000e+00 : f32
    %97 = vector.broadcast %cst_40 : f32 to vector<2x128xf32>
    %98 = arith.addf %97, %96 : vector<2x128xf32>
    %99 = arith.divf %97, %98 : vector<2x128xf32>
    %100 = vector.extract_strided_slice %93 {offsets = [0, 128], sizes = [2, 128], strides = [1, 1]} : vector<2x512xf32> to vector<2x128xf32>
    %101 = arith.negf %100 : vector<2x128xf32>
    %102 = math.exp %101 : vector<2x128xf32>
    %cst_41 = arith.constant 1.000000e+00 : f32
    %103 = vector.broadcast %cst_41 : f32 to vector<2x128xf32>
    %104 = arith.addf %103, %102 : vector<2x128xf32>
    %105 = arith.divf %103, %104 : vector<2x128xf32>
    %106 = vector.extract_strided_slice %93 {offsets = [0, 256], sizes = [2, 128], strides = [1, 1]} : vector<2x512xf32> to vector<2x128xf32>
    %107 = math.tanh %106 : vector<2x128xf32>
    %108 = vector.extract_strided_slice %93 {offsets = [0, 384], sizes = [2, 128], strides = [1, 1]} : vector<2x512xf32> to vector<2x128xf32>
    %109 = arith.negf %108 : vector<2x128xf32>
    %110 = math.exp %109 : vector<2x128xf32>
    %cst_42 = arith.constant 1.000000e+00 : f32
    %111 = vector.broadcast %cst_42 : f32 to vector<2x128xf32>
    %112 = arith.addf %111, %110 : vector<2x128xf32>
    %113 = arith.divf %111, %112 : vector<2x128xf32>
    %114 = arith.mulf %105, %83 : vector<2x128xf32>
    %115 = arith.mulf %99, %107 : vector<2x128xf32>
    %116 = arith.addf %114, %115 : vector<2x128xf32>
    %117 = math.tanh %116 : vector<2x128xf32>
    %118 = arith.mulf %113, %117 : vector<2x128xf32>
    %c3_i32 = arith.constant 3 : i32
    %119 = vector.broadcast %c3_i32 : i32 to vector<2x1xi32>
    %120 = arith.cmpi eq, %21, %119 : vector<2x1xi32>
    %121 = vector.shape_cast %120 : vector<2x1xi1> to vector<2x1xi1>
    %122 = vector.broadcast %121 : vector<2x1xi1> to vector<2x128xi1>
    %123 = arith.select %122, %118, %90 : vector<2x128xi1>, vector<2x128xf32>
    %c6 = arith.constant 6 : index
    %c0_43 = arith.constant 0 : index
    %124 = vector.load %arg15[%c6, %c0_43] : memref<16x512xf32, #tpu.memory_space<vmem>>, vector<2x512xf32>
    %cst_44 = arith.constant dense<0.000000e+00> : vector<2x512xf32>
    %125 = tpu.matmul %118, %20, %cst_44 {dimension_numbers = #tpu.dot_dimension_numbers<[1], [0], [0], [1], [0, 0, 1, 1], [], []>} : vector<2x128xf32>, vector<128x512xf32>, vector<2x512xf32> -> vector<2x512xf32>
    %126 = arith.addf %124, %125 : vector<2x512xf32>
    %127 = vector.extract_strided_slice %126 {offsets = [0, 0], sizes = [2, 128], strides = [1, 1]} : vector<2x512xf32> to vector<2x128xf32>
    %128 = arith.negf %127 : vector<2x128xf32>
    %129 = math.exp %128 : vector<2x128xf32>
    %cst_45 = arith.constant 1.000000e+00 : f32
    %130 = vector.broadcast %cst_45 : f32 to vector<2x128xf32>
    %131 = arith.addf %130, %129 : vector<2x128xf32>
    %132 = arith.divf %130, %131 : vector<2x128xf32>
    %133 = vector.extract_strided_slice %126 {offsets = [0, 128], sizes = [2, 128], strides = [1, 1]} : vector<2x512xf32> to vector<2x128xf32>
    %134 = arith.negf %133 : vector<2x128xf32>
    %135 = math.exp %134 : vector<2x128xf32>
    %cst_46 = arith.constant 1.000000e+00 : f32
    %136 = vector.broadcast %cst_46 : f32 to vector<2x128xf32>
    %137 = arith.addf %136, %135 : vector<2x128xf32>
    %138 = arith.divf %136, %137 : vector<2x128xf32>
    %139 = vector.extract_strided_slice %126 {offsets = [0, 256], sizes = [2, 128], strides = [1, 1]} : vector<2x512xf32> to vector<2x128xf32>
    %140 = math.tanh %139 : vector<2x128xf32>
    %141 = vector.extract_strided_slice %126 {offsets = [0, 384], sizes = [2, 128], strides = [1, 1]} : vector<2x512xf32> to vector<2x128xf32>
    %142 = arith.negf %141 : vector<2x128xf32>
    %143 = math.exp %142 : vector<2x128xf32>
    %cst_47 = arith.constant 1.000000e+00 : f32
    %144 = vector.broadcast %cst_47 : f32 to vector<2x128xf32>
    %145 = arith.addf %144, %143 : vector<2x128xf32>
    %146 = arith.divf %144, %145 : vector<2x128xf32>
    %147 = arith.mulf %138, %116 : vector<2x128xf32>
    %148 = arith.mulf %132, %140 : vector<2x128xf32>
    %149 = arith.addf %147, %148 : vector<2x128xf32>
    %150 = math.tanh %149 : vector<2x128xf32>
    %151 = arith.mulf %146, %150 : vector<2x128xf32>
    %c4_i32 = arith.constant 4 : i32
    %152 = vector.broadcast %c4_i32 : i32 to vector<2x1xi32>
    %153 = arith.cmpi eq, %21, %152 : vector<2x1xi32>
    %154 = vector.shape_cast %153 : vector<2x1xi1> to vector<2x1xi1>
    %155 = vector.broadcast %154 : vector<2x1xi1> to vector<2x128xi1>
    %156 = arith.select %155, %151, %123 : vector<2x128xi1>, vector<2x128xf32>
    %c8 = arith.constant 8 : index
    %c0_48 = arith.constant 0 : index
    %157 = vector.load %arg15[%c8, %c0_48] : memref<16x512xf32, #tpu.memory_space<vmem>>, vector<2x512xf32>
    %cst_49 = arith.constant dense<0.000000e+00> : vector<2x512xf32>
    %158 = tpu.matmul %151, %20, %cst_49 {dimension_numbers = #tpu.dot_dimension_numbers<[1], [0], [0], [1], [0, 0, 1, 1], [], []>} : vector<2x128xf32>, vector<128x512xf32>, vector<2x512xf32> -> vector<2x512xf32>
    %159 = arith.addf %157, %158 : vector<2x512xf32>
    %160 = vector.extract_strided_slice %159 {offsets = [0, 0], sizes = [2, 128], strides = [1, 1]} : vector<2x512xf32> to vector<2x128xf32>
    %161 = arith.negf %160 : vector<2x128xf32>
    %162 = math.exp %161 : vector<2x128xf32>
    %cst_50 = arith.constant 1.000000e+00 : f32
    %163 = vector.broadcast %cst_50 : f32 to vector<2x128xf32>
    %164 = arith.addf %163, %162 : vector<2x128xf32>
    %165 = arith.divf %163, %164 : vector<2x128xf32>
    %166 = vector.extract_strided_slice %159 {offsets = [0, 128], sizes = [2, 128], strides = [1, 1]} : vector<2x512xf32> to vector<2x128xf32>
    %167 = arith.negf %166 : vector<2x128xf32>
    %168 = math.exp %167 : vector<2x128xf32>
    %cst_51 = arith.constant 1.000000e+00 : f32
    %169 = vector.broadcast %cst_51 : f32 to vector<2x128xf32>
    %170 = arith.addf %169, %168 : vector<2x128xf32>
    %171 = arith.divf %169, %170 : vector<2x128xf32>
    %172 = vector.extract_strided_slice %159 {offsets = [0, 256], sizes = [2, 128], strides = [1, 1]} : vector<2x512xf32> to vector<2x128xf32>
    %173 = math.tanh %172 : vector<2x128xf32>
    %174 = vector.extract_strided_slice %159 {offsets = [0, 384], sizes = [2, 128], strides = [1, 1]} : vector<2x512xf32> to vector<2x128xf32>
    %175 = arith.negf %174 : vector<2x128xf32>
    %176 = math.exp %175 : vector<2x128xf32>
    %cst_52 = arith.constant 1.000000e+00 : f32
    %177 = vector.broadcast %cst_52 : f32 to vector<2x128xf32>
    %178 = arith.addf %177, %176 : vector<2x128xf32>
    %179 = arith.divf %177, %178 : vector<2x128xf32>
    %180 = arith.mulf %171, %149 : vector<2x128xf32>
    %181 = arith.mulf %165, %173 : vector<2x128xf32>
    %182 = arith.addf %180, %181 : vector<2x128xf32>
    %183 = math.tanh %182 : vector<2x128xf32>
    %184 = arith.mulf %179, %183 : vector<2x128xf32>
    %c5_i32 = arith.constant 5 : i32
    %185 = vector.broadcast %c5_i32 : i32 to vector<2x1xi32>
    %186 = arith.cmpi eq, %21, %185 : vector<2x1xi32>
    %187 = vector.shape_cast %186 : vector<2x1xi1> to vector<2x1xi1>
    %188 = vector.broadcast %187 : vector<2x1xi1> to vector<2x128xi1>
    %189 = arith.select %188, %184, %156 : vector<2x128xi1>, vector<2x128xf32>
    %c10 = arith.constant 10 : index
    %c0_53 = arith.constant 0 : index
    %190 = vector.load %arg15[%c10, %c0_53] : memref<16x512xf32, #tpu.memory_space<vmem>>, vector<2x512xf32>
    %cst_54 = arith.constant dense<0.000000e+00> : vector<2x512xf32>
    %191 = tpu.matmul %184, %20, %cst_54 {dimension_numbers = #tpu.dot_dimension_numbers<[1], [0], [0], [1], [0, 0, 1, 1], [], []>} : vector<2x128xf32>, vector<128x512xf32>, vector<2x512xf32> -> vector<2x512xf32>
    %192 = arith.addf %190, %191 : vector<2x512xf32>
    %193 = vector.extract_strided_slice %192 {offsets = [0, 0], sizes = [2, 128], strides = [1, 1]} : vector<2x512xf32> to vector<2x128xf32>
    %194 = arith.negf %193 : vector<2x128xf32>
    %195 = math.exp %194 : vector<2x128xf32>
    %cst_55 = arith.constant 1.000000e+00 : f32
    %196 = vector.broadcast %cst_55 : f32 to vector<2x128xf32>
    %197 = arith.addf %196, %195 : vector<2x128xf32>
    %198 = arith.divf %196, %197 : vector<2x128xf32>
    %199 = vector.extract_strided_slice %192 {offsets = [0, 128], sizes = [2, 128], strides = [1, 1]} : vector<2x512xf32> to vector<2x128xf32>
    %200 = arith.negf %199 : vector<2x128xf32>
    %201 = math.exp %200 : vector<2x128xf32>
    %cst_56 = arith.constant 1.000000e+00 : f32
    %202 = vector.broadcast %cst_56 : f32 to vector<2x128xf32>
    %203 = arith.addf %202, %201 : vector<2x128xf32>
    %204 = arith.divf %202, %203 : vector<2x128xf32>
    %205 = vector.extract_strided_slice %192 {offsets = [0, 256], sizes = [2, 128], strides = [1, 1]} : vector<2x512xf32> to vector<2x128xf32>
    %206 = math.tanh %205 : vector<2x128xf32>
    %207 = vector.extract_strided_slice %192 {offsets = [0, 384], sizes = [2, 128], strides = [1, 1]} : vector<2x512xf32> to vector<2x128xf32>
    %208 = arith.negf %207 : vector<2x128xf32>
    %209 = math.exp %208 : vector<2x128xf32>
    %cst_57 = arith.constant 1.000000e+00 : f32
    %210 = vector.broadcast %cst_57 : f32 to vector<2x128xf32>
    %211 = arith.addf %210, %209 : vector<2x128xf32>
    %212 = arith.divf %210, %211 : vector<2x128xf32>
    %213 = arith.mulf %204, %182 : vector<2x128xf32>
    %214 = arith.mulf %198, %206 : vector<2x128xf32>
    %215 = arith.addf %213, %214 : vector<2x128xf32>
    %216 = math.tanh %215 : vector<2x128xf32>
    %217 = arith.mulf %212, %216 : vector<2x128xf32>
    %c6_i32 = arith.constant 6 : i32
    %218 = vector.broadcast %c6_i32 : i32 to vector<2x1xi32>
    %219 = arith.cmpi eq, %21, %218 : vector<2x1xi32>
    %220 = vector.shape_cast %219 : vector<2x1xi1> to vector<2x1xi1>
    %221 = vector.broadcast %220 : vector<2x1xi1> to vector<2x128xi1>
    %222 = arith.select %221, %217, %189 : vector<2x128xi1>, vector<2x128xf32>
    %c12 = arith.constant 12 : index
    %c0_58 = arith.constant 0 : index
    %223 = vector.load %arg15[%c12, %c0_58] : memref<16x512xf32, #tpu.memory_space<vmem>>, vector<2x512xf32>
    %cst_59 = arith.constant dense<0.000000e+00> : vector<2x512xf32>
    %224 = tpu.matmul %217, %20, %cst_59 {dimension_numbers = #tpu.dot_dimension_numbers<[1], [0], [0], [1], [0, 0, 1, 1], [], []>} : vector<2x128xf32>, vector<128x512xf32>, vector<2x512xf32> -> vector<2x512xf32>
    %225 = arith.addf %223, %224 : vector<2x512xf32>
    %226 = vector.extract_strided_slice %225 {offsets = [0, 0], sizes = [2, 128], strides = [1, 1]} : vector<2x512xf32> to vector<2x128xf32>
    %227 = arith.negf %226 : vector<2x128xf32>
    %228 = math.exp %227 : vector<2x128xf32>
    %cst_60 = arith.constant 1.000000e+00 : f32
    %229 = vector.broadcast %cst_60 : f32 to vector<2x128xf32>
    %230 = arith.addf %229, %228 : vector<2x128xf32>
    %231 = arith.divf %229, %230 : vector<2x128xf32>
    %232 = vector.extract_strided_slice %225 {offsets = [0, 128], sizes = [2, 128], strides = [1, 1]} : vector<2x512xf32> to vector<2x128xf32>
    %233 = arith.negf %232 : vector<2x128xf32>
    %234 = math.exp %233 : vector<2x128xf32>
    %cst_61 = arith.constant 1.000000e+00 : f32
    %235 = vector.broadcast %cst_61 : f32 to vector<2x128xf32>
    %236 = arith.addf %235, %234 : vector<2x128xf32>
    %237 = arith.divf %235, %236 : vector<2x128xf32>
    %238 = vector.extract_strided_slice %225 {offsets = [0, 256], sizes = [2, 128], strides = [1, 1]} : vector<2x512xf32> to vector<2x128xf32>
    %239 = math.tanh %238 : vector<2x128xf32>
    %240 = vector.extract_strided_slice %225 {offsets = [0, 384], sizes = [2, 128], strides = [1, 1]} : vector<2x512xf32> to vector<2x128xf32>
    %241 = arith.negf %240 : vector<2x128xf32>
    %242 = math.exp %241 : vector<2x128xf32>
    %cst_62 = arith.constant 1.000000e+00 : f32
    %243 = vector.broadcast %cst_62 : f32 to vector<2x128xf32>
    %244 = arith.addf %243, %242 : vector<2x128xf32>
    %245 = arith.divf %243, %244 : vector<2x128xf32>
    %246 = arith.mulf %237, %215 : vector<2x128xf32>
    %247 = arith.mulf %231, %239 : vector<2x128xf32>
    %248 = arith.addf %246, %247 : vector<2x128xf32>
    %249 = math.tanh %248 : vector<2x128xf32>
    %250 = arith.mulf %245, %249 : vector<2x128xf32>
    %c7_i32 = arith.constant 7 : i32
    %251 = vector.broadcast %c7_i32 : i32 to vector<2x1xi32>
    %252 = arith.cmpi eq, %21, %251 : vector<2x1xi32>
    %253 = vector.shape_cast %252 : vector<2x1xi1> to vector<2x1xi1>
    %254 = vector.broadcast %253 : vector<2x1xi1> to vector<2x128xi1>
    %255 = arith.select %254, %250, %222 : vector<2x128xi1>, vector<2x128xf32>
    %c14 = arith.constant 14 : index
    %c0_63 = arith.constant 0 : index
    %256 = vector.load %arg15[%c14, %c0_63] : memref<16x512xf32, #tpu.memory_space<vmem>>, vector<2x512xf32>
    %cst_64 = arith.constant dense<0.000000e+00> : vector<2x512xf32>
    %257 = tpu.matmul %250, %20, %cst_64 {dimension_numbers = #tpu.dot_dimension_numbers<[1], [0], [0], [1], [0, 0, 1, 1], [], []>} : vector<2x128xf32>, vector<128x512xf32>, vector<2x512xf32> -> vector<2x512xf32>
    %258 = arith.addf %256, %257 : vector<2x512xf32>
    %259 = vector.extract_strided_slice %258 {offsets = [0, 0], sizes = [2, 128], strides = [1, 1]} : vector<2x512xf32> to vector<2x128xf32>
    %260 = arith.negf %259 : vector<2x128xf32>
    %261 = math.exp %260 : vector<2x128xf32>
    %cst_65 = arith.constant 1.000000e+00 : f32
    %262 = vector.broadcast %cst_65 : f32 to vector<2x128xf32>
    %263 = arith.addf %262, %261 : vector<2x128xf32>
    %264 = arith.divf %262, %263 : vector<2x128xf32>
    %265 = vector.extract_strided_slice %258 {offsets = [0, 128], sizes = [2, 128], strides = [1, 1]} : vector<2x512xf32> to vector<2x128xf32>
    %266 = arith.negf %265 : vector<2x128xf32>
    %267 = math.exp %266 : vector<2x128xf32>
    %cst_66 = arith.constant 1.000000e+00 : f32
    %268 = vector.broadcast %cst_66 : f32 to vector<2x128xf32>
    %269 = arith.addf %268, %267 : vector<2x128xf32>
    %270 = arith.divf %268, %269 : vector<2x128xf32>
    %271 = vector.extract_strided_slice %258 {offsets = [0, 256], sizes = [2, 128], strides = [1, 1]} : vector<2x512xf32> to vector<2x128xf32>
    %272 = math.tanh %271 : vector<2x128xf32>
    %273 = vector.extract_strided_slice %258 {offsets = [0, 384], sizes = [2, 128], strides = [1, 1]} : vector<2x512xf32> to vector<2x128xf32>
    %274 = arith.negf %273 : vector<2x128xf32>
    %275 = math.exp %274 : vector<2x128xf32>
    %cst_67 = arith.constant 1.000000e+00 : f32
    %276 = vector.broadcast %cst_67 : f32 to vector<2x128xf32>
    %277 = arith.addf %276, %275 : vector<2x128xf32>
    %278 = arith.divf %276, %277 : vector<2x128xf32>
    %279 = arith.mulf %270, %248 : vector<2x128xf32>
    %280 = arith.mulf %264, %272 : vector<2x128xf32>
    %281 = arith.addf %279, %280 : vector<2x128xf32>
    %282 = math.tanh %281 : vector<2x128xf32>
    %283 = arith.mulf %278, %282 : vector<2x128xf32>
    %c8_i32 = arith.constant 8 : i32
    %284 = vector.broadcast %c8_i32 : i32 to vector<2x1xi32>
    %285 = arith.cmpi eq, %21, %284 : vector<2x1xi32>
    %286 = vector.shape_cast %285 : vector<2x1xi1> to vector<2x1xi1>
    %287 = vector.broadcast %286 : vector<2x1xi1> to vector<2x128xi1>
    %288 = arith.select %287, %283, %255 : vector<2x128xi1>, vector<2x128xf32>
    %c0_68 = arith.constant 0 : index
    %c0_69 = arith.constant 0 : index
    %289 = vector.load %arg12[%c0_68, %c0_69] : memref<128x128xf32, #tpu.memory_space<vmem>>, vector<128x128xf32>
    %cst_70 = arith.constant dense<0.000000e+00> : vector<2x128xf32>
    %290 = tpu.matmul %288, %289, %cst_70 {dimension_numbers = #tpu.dot_dimension_numbers<[1], [0], [0], [1], [0, 0, 1, 1], [], []>} : vector<2x128xf32>, vector<128x128xf32>, vector<2x128xf32> -> vector<2x128xf32>
    %c0_71 = arith.constant 0 : index
    %c0_72 = arith.constant 0 : index
    %291 = vector.load %arg13[%c0_71, %c0_72] : memref<1x128xf32, #tpu.memory_space<vmem>>, vector<1x128xf32>
    %292 = vector.broadcast %291 : vector<1x128xf32> to vector<2x128xf32>
    %293 = arith.addf %290, %292 : vector<2x128xf32>
    %c0_73 = arith.constant 0 : index
    %c0_74 = arith.constant 0 : index
    %294 = vector.load %arg4[%c0_73, %c0_74] : memref<8x2xf32, #tpu.memory_space<vmem>>, vector<8x2xf32>
    %cst_75 = arith.constant dense<0.000000e+00> : vector<8x128xf32>
    %295 = tpu.matmul %294, %293, %cst_75 {dimension_numbers = #tpu.dot_dimension_numbers<[1], [0], [0], [1], [0, 0, 1, 1], [], []>} : vector<8x2xf32>, vector<2x128xf32>, vector<8x128xf32> -> vector<8x128xf32>
    %296 = vector.extract_strided_slice %12 {offsets = [0, 0], sizes = [8, 128], strides = [1, 1]} : vector<24x128xf32> to vector<8x128xf32>
    %c0_76 = arith.constant 0 : index
    %c0_77 = arith.constant 0 : index
    %297 = vector.load %arg3[%c0_76, %c0_77] : memref<24x1xf32, #tpu.memory_space<vmem>>, vector<8x1xf32>
    %298 = arith.subf %296, %295 : vector<8x128xf32>
    %299 = arith.mulf %298, %298 : vector<8x128xf32>
    %cst_78 = arith.constant dense<0.000000e+00> : vector<8xf32>
    %300 = vector.multi_reduction <add>, %299, %cst_78 [1] : vector<8x128xf32> to vector<8xf32>
    %301 = vector.shape_cast %300 : vector<8xf32> to vector<8x1xf32>
    %302 = arith.mulf %301, %297 : vector<8x1xf32>
    %303 = vector.broadcast %302 : vector<8x1xf32> to vector<8x2xf32>
    %304 = arith.mulf %303, %294 : vector<8x2xf32>
    %cst_79 = arith.constant dense<0.000000e+00> : vector<2xf32>
    %305 = vector.multi_reduction <add>, %304, %cst_79 [0] : vector<8x2xf32> to vector<2xf32>
    %306 = vector.shape_cast %305 : vector<2xf32> to vector<1x2xf32>
    %307 = vector.broadcast %297 : vector<8x1xf32> to vector<8x2xf32>
    %308 = arith.mulf %307, %294 : vector<8x2xf32>
    %cst_80 = arith.constant dense<0.000000e+00> : vector<2xf32>
    %309 = vector.multi_reduction <add>, %308, %cst_80 [0] : vector<8x2xf32> to vector<2xf32>
    %310 = vector.shape_cast %309 : vector<2xf32> to vector<1x2xf32>
    %311 = arith.divf %306, %310 : vector<1x2xf32>
    %312 = vector.extract_strided_slice %12 {offsets = [8, 0], sizes = [8, 128], strides = [1, 1]} : vector<24x128xf32> to vector<8x128xf32>
    %c8_81 = arith.constant 8 : index
    %c0_82 = arith.constant 0 : index
    %313 = vector.load %arg3[%c8_81, %c0_82] : memref<24x1xf32, #tpu.memory_space<vmem>>, vector<8x1xf32>
    %314 = arith.subf %312, %295 : vector<8x128xf32>
    %315 = arith.mulf %314, %314 : vector<8x128xf32>
    %cst_83 = arith.constant dense<0.000000e+00> : vector<8xf32>
    %316 = vector.multi_reduction <add>, %315, %cst_83 [1] : vector<8x128xf32> to vector<8xf32>
    %317 = vector.shape_cast %316 : vector<8xf32> to vector<8x1xf32>
    %318 = arith.mulf %317, %313 : vector<8x1xf32>
    %319 = vector.broadcast %318 : vector<8x1xf32> to vector<8x2xf32>
    %320 = arith.mulf %319, %294 : vector<8x2xf32>
    %cst_84 = arith.constant dense<0.000000e+00> : vector<2xf32>
    %321 = vector.multi_reduction <add>, %320, %cst_84 [0] : vector<8x2xf32> to vector<2xf32>
    %322 = vector.shape_cast %321 : vector<2xf32> to vector<1x2xf32>
    %323 = vector.broadcast %313 : vector<8x1xf32> to vector<8x2xf32>
    %324 = arith.mulf %323, %294 : vector<8x2xf32>
    %cst_85 = arith.constant dense<0.000000e+00> : vector<2xf32>
    %325 = vector.multi_reduction <add>, %324, %cst_85 [0] : vector<8x2xf32> to vector<2xf32>
    %326 = vector.shape_cast %325 : vector<2xf32> to vector<1x2xf32>
    %327 = arith.divf %322, %326 : vector<1x2xf32>
    %328 = vector.extract_strided_slice %12 {offsets = [16, 0], sizes = [8, 128], strides = [1, 1]} : vector<24x128xf32> to vector<8x128xf32>
    %c16 = arith.constant 16 : index
    %c0_86 = arith.constant 0 : index
    %329 = vector.load %arg3[%c16, %c0_86] : memref<24x1xf32, #tpu.memory_space<vmem>>, vector<8x1xf32>
    %330 = arith.subf %328, %295 : vector<8x128xf32>
    %331 = arith.mulf %330, %330 : vector<8x128xf32>
    %cst_87 = arith.constant dense<0.000000e+00> : vector<8xf32>
    %332 = vector.multi_reduction <add>, %331, %cst_87 [1] : vector<8x128xf32> to vector<8xf32>
    %333 = vector.shape_cast %332 : vector<8xf32> to vector<8x1xf32>
    %334 = arith.mulf %333, %329 : vector<8x1xf32>
    %335 = vector.broadcast %334 : vector<8x1xf32> to vector<8x2xf32>
    %336 = arith.mulf %335, %294 : vector<8x2xf32>
    %cst_88 = arith.constant dense<0.000000e+00> : vector<2xf32>
    %337 = vector.multi_reduction <add>, %336, %cst_88 [0] : vector<8x2xf32> to vector<2xf32>
    %338 = vector.shape_cast %337 : vector<2xf32> to vector<1x2xf32>
    %339 = vector.broadcast %329 : vector<8x1xf32> to vector<8x2xf32>
    %340 = arith.mulf %339, %294 : vector<8x2xf32>
    %cst_89 = arith.constant dense<0.000000e+00> : vector<2xf32>
    %341 = vector.multi_reduction <add>, %340, %cst_89 [0] : vector<8x2xf32> to vector<2xf32>
    %342 = vector.shape_cast %341 : vector<2xf32> to vector<1x2xf32>
    %343 = arith.divf %338, %342 : vector<1x2xf32>
    %344 = tpu.concatenate %311, %327, %343 in 0 : vector<1x2xf32>, vector<1x2xf32>, vector<1x2xf32> -> vector<3x2xf32>
    %cst_90 = arith.constant 0.000000e+00 : f32
    %345 = vector.broadcast %cst_90 : f32 to vector<8x128xf32>
    %c0_91 = arith.constant 0 : index
    %c0_92 = arith.constant 0 : index
    %346 = vector.load %arg14[%c0_91, %c0_92] : memref<8x128xf32, #tpu.memory_space<vmem>>, vector<8x128xf32>
    tpu.vector_store %arg14[%c0_91, %c0_92], %345 {strides = array<i32>} : memref<8x128xf32, #tpu.memory_space<vmem>>, vector<8x128xf32>,
    %c0_93 = arith.constant 0 : index
    %c0_94 = arith.constant 0 : index
    %347 = vector.load %arg14[%c0_93, %c0_94] : memref<8x128xf32, #tpu.memory_space<vmem>>, vector<3x2xf32>
    tpu.vector_store %arg14[%c0_93, %c0_94], %344 {strides = array<i32>} : memref<8x128xf32, #tpu.memory_space<vmem>>, vector<3x2xf32>,
    return
  }
}

</mosaic_0001>

<bundles_post_ra>
// kernel: tpu_custom_call.1
= control target key start
LH: loop header
LB: loop body
LE: loop exit
PB: predicated region body
PF: predicated region fallthrough
CT: control target
= control target key end

     0   :  { %19 = vsyncpa [#allocation4], 0  ;;  %s3647_s0 = inlined_call_operand.vmem [shape: f32[24,128], index: 0, kind: input, shape index: {}]   ;;  %s3648_s1 = inlined_call_operand.hbm [shape: f32[16,128], index: 1, kind: input, shape index: {}]   ;;  %s3649_s2 = inlined_call_operand.vmem [shape: s32[2,1], index: 2, kind: input, shape index: {}]   ;;  %s3650_s3 = inlined_call_operand.vmem [shape: f32[24,1], index: 3, kind: input, shape index: {}]   ;;  %s3651_s4 = inlined_call_operand.vmem [shape: f32[8,2], index: 4, kind: input, shape index: {}]   ;;  %s3652_s5 = inlined_call_operand.hbm [shape: f32[128,128], index: 5, kind: input, shape index: {}]   ;;  %s3653_s6 = inlined_call_operand.vmem [shape: f32[1,128], index: 6, kind: input, shape index: {}]   ;;  %s3654_s7 = inlined_call_operand.hbm [shape: f32[128,128], index: 7, kind: input, shape index: {}]   ;;  %s3655_s8 = inlined_call_operand.vmem [shape: f32[1,128], index: 8, kind: input, shape index: {}]   ;;  %s3656_s9 = inlined_call_operand.hbm [shape: f32[128,512], index: 9, kind: input, shape index: {}]   ;;  %s3657_s10 = inlined_call_operand.hbm [shape: f32[128,512], index: 10, kind: input, shape index: {}]   ;;  %s3658_s11 = inlined_call_operand.vmem [shape: f32[1,512], index: 11, kind: input, shape index: {}]   ;;  %s3659_s12 = inlined_call_operand.hbm [shape: f32[128,128], index: 12, kind: input, shape index: {}]   ;;  %s3660_s13 = inlined_call_operand.vmem [shape: f32[1,128], index: 13, kind: input, shape index: {}]   ;;  %s3661_s14 = inlined_call_operand.hbm [shape: f32[8,128], index: 14, kind: output, shape index: {}]  }
   0x1   :  { %20 = vsyncpa [#allocation7], 0 }
   0x2   :  { %21 = vsyncpa [#allocation10], 0 }
   0x3   :  { %22 = vsyncpa [#allocation13], 0 }
   0x4   :  { %23 = vsyncpa [#allocation5], 0  ;;  %s49_s15 = sshll.u32 %s3652_s5, 4  ;;  %s2514_s16 = smov [#allocation6]   ;;  %s50_s15 = int_to_ptr.hbm [resolvable:$true] %s49_s15 }
   0x5   :  { %s51_s17 = sshll.u32 %s2514_s16, 4  ;;  %s79_s20 = sshll.u32 %s3656_s9, 4  ;;  %s52_s17 = int_to_ptr.vmem [resolvable:$true] %s51_s17  ;;  %s80_s20 = int_to_ptr.hbm [resolvable:$true] %s79_s20 }
   0x6   :  { %s2515_s21 = smov 128   ;;  %s2516_s22 = smov 8  }
   0x7   :  { %57 = dma.hbm_to_vmem [thread:$0]  %s50_s15, 2048, %s52_s17, [#allocation7], %s2515_s21, %s2515_s21, %s2516_s22  }
   0x8   :  { %s2517_s23 = smov [#allocation9]   ;;  %s2518_s25 = smov 512  }
   0x9   :  { %s81_s24 = sshll.u32 %s2517_s23, 4  ;;  %s2519_s5 = smov 32   ;;  %s82_s24 = int_to_ptr.vmem [resolvable:$true] %s81_s24 }
   0xa   :  { %87 = dma.hbm_to_vmem [thread:$0]  %s80_s20, 8192, %s82_s24, [#allocation10], %s2518_s25, %s2518_s25, %s2519_s5  }
   0xb   :  { %s30_s28 = sshll.u32 %s3648_s1, 4  ;;  %s2520_s29 = smov [#allocation3]   ;;  %s31_s28 = int_to_ptr.hbm [resolvable:$true] %s30_s28 }
   0xc   :  { %s32_s9 = sshll.u32 %s2520_s29, 4  ;;  %s64_s18 = sshll.u32 %s3654_s7, 4  ;;  %s33_s9 = int_to_ptr.vmem [resolvable:$true] %s32_s9  ;;  %s65_s18 = int_to_ptr.hbm [resolvable:$true] %s64_s18 }
   0xd   :  { %38 = dma.hbm_to_vmem [thread:$0]  %s31_s28, 256, %s33_s9, [#allocation4], %s2515_s21, %s2515_s21, %s2516_s22  }
   0xe   :  { %s2521_s15 = smov [#allocation8]   ;;  %s92_s23 = sshll.u32 %s3657_s10, 4  ;;  %s93_s23 = int_to_ptr.hbm [resolvable:$true] %s92_s23 }
   0xf   :  { %s66_s17 = sshll.u32 %s2521_s15, 4  ;;  %s107_s7 = sshll.u32 %s3659_s12, 4  ;;  %s67_s17 = int_to_ptr.vmem [resolvable:$true] %s66_s17  ;;  %s108_s7 = int_to_ptr.hbm [resolvable:$true] %s107_s7 }
  0x10   :  { %72 = dma.hbm_to_vmem [thread:$0]  %s65_s18, 2048, %s67_s17, [#allocation7], %s2515_s21, %s2515_s21, %s2516_s22  }
  0x11   :  { %s2522_s26 = smov [#allocation11]   ;;  %s2523_s28 = smov [#allocation12]  }
  0x12   :  { %s94_s27 = sshll.u32 %s2522_s26, 4  ;;  %s109_s29 = sshll.u32 %s2523_s28, 4  ;;  %s95_s27 = int_to_ptr.vmem [resolvable:$true] %s94_s27  ;;  %s110_s29 = int_to_ptr.vmem [resolvable:$true] %s109_s29 }
  0x13   :  { %100 = dma.hbm_to_vmem [thread:$0]  %s93_s23, 8192, %s95_s27, [#allocation10], %s2518_s25, %s2518_s25, %s2519_s5  }
  0x14   :  { %115 = dma.hbm_to_vmem [thread:$0]  %s108_s7, 2048, %s110_s29, [#allocation13], %s2515_s21, %s2515_s21, %s2516_s22  }
  0x15   :  { %2504 = dma.done.wait [#allocation4], 256  }
  0x16   :  { %2505 = vsyncadd [#allocation4], 4294967040 }
  0x17   :  { %2506 = dma.done.wait [#allocation7], 4096  }
  0x18   :  { %2507 = vsyncadd [#allocation7], 4294963200 }
  0x19   :  { %2508 = dma.done.wait [#allocation10], 16384  }
  0x1a   :  { %2509 = vsyncadd [#allocation10], 4294950912 }
  0x1b   :  { %2510 = dma.done.wait [#allocation13], 2048  }
  0x1c   :  { %2511 = vsyncadd [#allocation13], 4294965248  ;;  %v160_v0 = vld [vmem:[#allocation6 + $0x78] sm:$0xff]  ;;  %v159_v1 = vld [vmem:[#allocation6 + $0x70] sm:$0xff]  ;;  %s2079_s10 = sshll.u32 %s3661_s14, 4  ;;  %s2080_s10 = int_to_ptr.hbm [resolvable:$true] %s2079_s10 }
  0x1d   :  { %165 = vmatpush.msra.mxu0 %v160_v0  ;;  %v158_v2 = vld [vmem:[#allocation6 + $0x68] sm:$0xff]  ;;  %v157_v3 = vld [vmem:[#allocation6 + $0x60] sm:$0xff]  ;;  %v156_v4 = vld [vmem:[#allocation6 + $0x58] sm:$0xff] }
  0x1e   :  { %v155_v5 = vld [vmem:[#allocation6 + $0x50] sm:$0xff]  ;;  %v154_v6 = vld [vmem:[#allocation6 + $0x48] sm:$0xff]  ;;  %v153_v7 = vld [vmem:[#allocation6 + $0x40] sm:$0xff] }
  0x1f   :  { %166 = vmatpush.msra.mxu0 %v159_v1  ;;  %v152_v8 = vld [vmem:[#allocation6 + $0x38] sm:$0xff]  ;;  %v151_v9 = vld [vmem:[#allocation6 + $0x30] sm:$0xff]  ;;  %v302_v10 = vld [vmem:[#allocation9 + $0x1e0] sm:$0xff] }
  0x20   :  { %v303_v11 = vld [vmem:[#allocation9 + $0x1e8] sm:$0xff]  ;;  %v298_v12 = vld [vmem:[#allocation9 + $0x1c0] sm:$0xff]  ;;  %316 = vmatpush.msra.mxu2 %v302_v10  ;;  %v209_v16 = vld [vmem:[#allocation8 + $0x78] sm:$0xff] }
  0x21   :  { %167 = vmatpush.msra.mxu0 %v158_v2  ;;  %v299_v13 = vld [vmem:[#allocation9 + $0x1c8] sm:$0xff]  ;;  %339 = vmatpush.msra.mxu3 %v303_v11  ;;  %v294_v15 = vld [vmem:[#allocation9 + $0x1a0] sm:$0xff]  ;;  %v208_v18 = vld [vmem:[#allocation8 + $0x70] sm:$0xff] }
  0x22   :  { %v150_v14 = vld [vmem:[#allocation6 + $0x28] sm:$0xff]  ;;  %317 = vmatpush.msra.mxu2 %v298_v12  ;;  %v149_v19 = vld [vmem:[#allocation6 + $0x20] sm:$0xff]  ;;  %214 = vmatpush.msra.mxu1 %v209_v16  ;;  %v148_v23 = vld [vmem:[#allocation6 + $0x18] sm:$0xff] }
  0x23   :  { %168 = vmatpush.msra.mxu0 %v157_v3  ;;  %v295_v17 = vld [vmem:[#allocation9 + $0x1a8] sm:$0xff]  ;;  %340 = vmatpush.msra.mxu3 %v299_v13  ;;  %v290_v20 = vld [vmem:[#allocation9 + $0x180] sm:$0xff]  ;;  %v147_v27 = vld [vmem:[#allocation6 + $0x10] sm:$0xff] }
  0x24   :  { %318 = vmatpush.msra.mxu2 %v294_v15  ;;  %v291_v21 = vld [vmem:[#allocation9 + $0x188] sm:$0xff]  ;;  %215 = vmatpush.msra.mxu1 %v208_v18  ;;  %v286_v24 = vld [vmem:[#allocation9 + $0x160] sm:$0xff]  ;;  %v205_v30 = vld [vmem:[#allocation8 + $0x58] sm:$0xff] }
  0x25   :  { %169 = vmatpush.msra.mxu0 %v156_v4  ;;  %v207_v22 = vld [vmem:[#allocation8 + $0x68] sm:$0xff]  ;;  %341 = vmatpush.msra.mxu3 %v295_v17  ;;  %v206_v26 = vld [vmem:[#allocation8 + $0x60] sm:$0xff]  ;;  %v204_v34 = vld [vmem:[#allocation8 + $0x50] sm:$0xff] }
  0x26   :  { %319 = vmatpush.msra.mxu2 %v290_v20  ;;  %v287_v25 = vld [vmem:[#allocation9 + $0x168] sm:$0xff]  ;;  %216 = vmatpush.msra.mxu1 %v207_v22  ;;  %v282_v28 = vld [vmem:[#allocation9 + $0x140] sm:$0xff]  ;;  %v142_v37 = vld [vmem:[%s3647_s0] sm:$0xff] }
  0x27   :  { %170 = vmatpush.msra.mxu0 %v155_v5  ;;  %342 = vmatpush.msra.mxu3 %v291_v21  ;;  %v283_v29 = vld [vmem:[#allocation9 + $0x148] sm:$0xff]  ;;  %v278_v32 = vld [vmem:[#allocation9 + $0x120] sm:$0xff]  ;;  %v304_v42 = vld [vmem:[#allocation9 + $0x1f0] sm:$0xff] }
  0x28   :  { %320 = vmatpush.msra.mxu2 %v286_v24  ;;  %v146_v31 = vld [vmem:[#allocation6 + $0x8] sm:$0xff]  ;;  %217 = vmatpush.msra.mxu1 %v206_v26  ;;  %v145_v35 = vld [vmem:[#allocation6] sm:$0xff]  ;;  %v300_v46 = vld [vmem:[#allocation9 + $0x1d0] sm:$0xff] }
  0x29   :  { %171 = vmatpush.msra.mxu0 %v154_v6  ;;  %343 = vmatpush.msra.mxu3 %v287_v25  ;;  %v279_v33 = vld [vmem:[#allocation9 + $0x128] sm:$0xff]  ;;  %v274_v36 = vld [vmem:[#allocation9 + $0x100] sm:$0xff]  ;;  %v201_v48 = vld [vmem:[#allocation8 + $0x38] sm:$0xff] }
  0x2a   :  { %321 = vmatpush.msra.mxu2 %v282_v28  ;;  %218 = vmatpush.msra.mxu1 %v205_v30  ;;  %v275_v38 = vld [vmem:[#allocation9 + $0x108] sm:$0xff]  ;;  %v270_v39 = vld [vmem:[#allocation9 + $0xe0] sm:$0xff]  ;;  %v296_v50 = vld [vmem:[#allocation9 + $0x1b0] sm:$0xff] }
  0x2b   :  { %172 = vmatpush.msra.mxu0 %v153_v7  ;;  %344 = vmatpush.msra.mxu3 %v283_v29  ;;  %v203_v40 = vld [vmem:[#allocation8 + $0x48] sm:$0xff]  ;;  %v266_v43 = vld [vmem:[#allocation9 + $0xc0] sm:$0xff]  ;;  %v200_v52 = vld [vmem:[#allocation8 + $0x30] sm:$0xff] }
  0x2c   :  { %322 = vmatpush.msra.mxu2 %v278_v32  ;;  %219 = vmatpush.msra.mxu1 %v204_v34  ;;  %v271_v41 = vld [vmem:[#allocation9 + $0xe8] sm:$0xff]  ;;  %v202_v44 = vld [vmem:[#allocation8 + $0x40] sm:$0xff]  ;;  %v143_v53 = vld [vmem:[%s3647_s0 + $0x8] sm:$0xff] }
  0x2d   :  { %173 = vmatpush.msra.mxu0 %v152_v8  ;;  %345 = vmatpush.msra.mxu3 %v279_v33  ;;  %v267_v45 = vld [vmem:[#allocation9 + $0xc8] sm:$0xff]  ;;  %v262_v47 = vld [vmem:[#allocation9 + $0xa0] sm:$0xff]  ;;  %v292_v58 = vld [vmem:[#allocation9 + $0x190] sm:$0xff] }
  0x2e   :  { %323 = vmatpush.msra.mxu2 %v274_v36  ;;  %220 = vmatpush.msra.mxu1 %v203_v40  ;;  %v263_v49 = vld [vmem:[#allocation9 + $0xa8] sm:$0xff]  ;;  %v258_v51 = vld [vmem:[#allocation9 + $0x80] sm:$0xff]  ;;  %v288_v62 = vld [vmem:[#allocation9 + $0x170] sm:$0xff] }
  0x2f   :  { %174 = vmatpush.msra.mxu0 %v151_v9  ;;  %346 = vmatpush.msra.mxu3 %v275_v38  ;;  %v259_v54 = vld [vmem:[#allocation9 + $0x88] sm:$0xff]  ;;  %v254_v55 = vld [vmem:[#allocation9 + $0x60] sm:$0xff]  ;;  %v197_v0 = vld [vmem:[#allocation8 + $0x18] sm:$0xff] }
  0x30   :  { %324 = vmatpush.msra.mxu2 %v270_v39  ;;  %221 = vmatpush.msra.mxu1 %v202_v44  ;;  %v199_v56 = vld [vmem:[#allocation8 + $0x28] sm:$0xff]  ;;  %v250_v59 = vld [vmem:[#allocation9 + $0x40] sm:$0xff]  ;;  %v284_v2 = vld [vmem:[#allocation9 + $0x150] sm:$0xff] }
  0x31   :  { %175 = vmatpush.msra.mxu0 %v150_v14  ;;  %347 = vmatpush.msra.mxu3 %v271_v41  ;;  %v255_v57 = vld [vmem:[#allocation9 + $0x68] sm:$0xff]  ;;  %v198_v60 = vld [vmem:[#allocation8 + $0x20] sm:$0xff]  ;;  %v196_v4 = vld [vmem:[#allocation8 + $0x10] sm:$0xff] }
  0x32   :  { %325 = vmatpush.msra.mxu2 %v266_v43  ;;  %222 = vmatpush.msra.mxu1 %v201_v48  ;;  %v251_v61 = vld [vmem:[#allocation9 + $0x48] sm:$0xff]  ;;  %v246_v63 = vld [vmem:[#allocation9 + $0x20] sm:$0xff]  ;;  %v280_v10 = vld [vmem:[#allocation9 + $0x130] sm:$0xff] }
  0x33   :  { %176 = vmatpush.msra.mxu0 %v149_v19  ;;  %348 = vmatpush.msra.mxu3 %v267_v45  ;;  %v247_v1 = vld [vmem:[#allocation9 + $0x28] sm:$0xff]  ;;  %v242_v3 = vld [vmem:[#allocation9] sm:$0xff]  ;;  %v276_v14 = vld [vmem:[#allocation9 + $0x110] sm:$0xff] }
  0x34   :  { %326 = vmatpush.msra.mxu2 %v262_v47  ;;  %223 = vmatpush.msra.mxu1 %v200_v52  ;;  %v144_v5 = vld [vmem:[%s3647_s0 + $0x10] sm:$0xff]  ;;  %v243_v6 = vld [vmem:[#allocation9 + $0x8] sm:$0xff]  ;;  %v305_v17 = vld [vmem:[#allocation9 + $0x1f8] sm:$0xff] }
  0x35   :  { %177 = vmatpush.msra.mxu0 %v148_v23  ;;  %349 = vmatpush.msra.mxu3 %v263_v49  ;;  %v2641_v7 = vld [vmem:[#allocation11 + $0x1e0] sm:$0xff]  ;;  %v2643_v8 = vld [vmem:[#allocation11 + $0x1e8] sm:$0xff]  ;;  %v272_v18 = vld [vmem:[#allocation9 + $0xf0] sm:$0xff] }
  0x36   :  { %327 = vmatpush.msra.mxu2 %v258_v51  ;;  %224 = vmatpush.msra.mxu1 %v199_v56  ;;  %v195_v9 = vld [vmem:[#allocation8 + $0x8] sm:$0xff]  ;;  %v2645_v11 = vld [vmem:[#allocation11 + $0x1c0] sm:$0xff]  ;;  %v301_v21 = vld [vmem:[#allocation9 + $0x1d8] sm:$0xff] }
  0x37   :  { %178 = vmatpush.msra.mxu0 %v147_v27  ;;  %350 = vmatpush.msra.mxu3 %v259_v54  ;;  %v2647_v12 = vld [vmem:[#allocation11 + $0x1c8] sm:$0xff]  ;;  %v194_v13 = vld [vmem:[#allocation8] sm:$0xff]  ;;  %v268_v22 = vld [vmem:[#allocation9 + $0xd0] sm:$0xff] }
  0x38   :  { %328 = vmatpush.msra.mxu2 %v254_v55  ;;  %225 = vmatpush.msra.mxu1 %v198_v60  ;;  %v2651_v15 = vld [vmem:[#allocation11 + $0x1a0] sm:$0xff]  ;;  %v2653_v16 = vld [vmem:[#allocation11 + $0x1a8] sm:$0xff]  ;;  %v297_v25 = vld [vmem:[#allocation9 + $0x1b8] sm:$0xff] }
  0x39   :  { %179 = vmatpush.msra.mxu0 %v146_v31  ;;  %351 = vmatpush.msra.mxu3 %v255_v57  ;;  %3758 = vst [vmem:[#allocation20_spill] sm:$0xff] %v2651_v15  ;;  %v2657_v19 = vld [vmem:[#allocation11 + $0x180] sm:$0xff]  ;;  %v2659_v20 = vld [vmem:[#allocation11 + $0x188] sm:$0xff]  ;;  %v2669_v26 = vld [vmem:[#allocation3] sm:$0xff] }
  0x3a   :  { %329 = vmatpush.msra.mxu2 %v250_v59  ;;  %226 = vmatpush.msra.mxu1 %v197_v0  ;;  %3759 = vst [vmem:[#allocation21_spill] sm:$0xff] %v2653_v16  ;;  %v2663_v23 = vld [vmem:[#allocation11 + $0x160] sm:$0xff]  ;;  %v2665_v24 = vld [vmem:[#allocation11 + $0x168] sm:$0xff]  ;;  %v293_v29 = vld [vmem:[#allocation9 + $0x198] sm:$0xff] }
  0x3b   :  { %180 = vmatpush.msra.mxu0 %v145_v35  ;;  %352 = vmatpush.msra.mxu3 %v251_v61  ;;  %3760 = vst [vmem:[#allocation22_spill] sm:$0xff] %v2657_v19  ;;  %v2671_v27 = vld [vmem:[#allocation11 + $0x140] sm:$0xff]  ;;  %v2673_v28 = vld [vmem:[#allocation11 + $0x148] sm:$0xff]  ;;  %v289_v32 = vld [vmem:[#allocation9 + $0x178] sm:$0xff] }
  0x3c   :  { %181 = vmatmul.f32.vlgmr.msra.gmra.mxu0 %v142_v37  ;;  %330 = vmatpush.msra.mxu2 %v246_v63  ;;  %3761 = vst [vmem:[#allocation23_spill] sm:$0xff] %v2659_v20  ;;  %v2677_v30 = vld [vmem:[#allocation11 + $0x120] sm:$0xff]  ;;  %v2679_v31 = vld [vmem:[#allocation11 + $0x128] sm:$0xff]  ;;  %v264_v33 = vld [vmem:[#allocation9 + $0xb0] sm:$0xff] }
  0x3d   :  { %362 = vmatpush.msrb.mxu0 %v304_v42  ;;  %353 = vmatpush.msra.mxu3 %v247_v1  ;;  %3762 = vst [vmem:[#allocation24_spill] sm:$0xff] %v2663_v23  ;;  %v2684_v34 = vld [vmem:[#allocation11 + $0x100] sm:$0xff]  ;;  %v2686_v35 = vld [vmem:[#allocation11 + $0x108] sm:$0xff]  ;;  %v285_v36 = vld [vmem:[#allocation9 + $0x158] sm:$0xff] }
  0x3e   :  { %331 = vmatpush.msra.mxu2 %v242_v3  ;;  %227 = vmatpush.msra.mxu1 %v196_v4  ;;  %3763 = vst [vmem:[#allocation25_spill] sm:$0xff] %v2665_v24  ;;  %v260_v37 = vld [vmem:[#allocation9 + $0x90] sm:$0xff]  ;;  %v2691_v38 = vld [vmem:[#allocation11 + $0xe0] sm:$0xff]  ;;  %v2693_v39 = vld [vmem:[#allocation11 + $0xe8] sm:$0xff] }
  0x3f   :  { %363 = vmatpush.msrb.mxu0 %v300_v46  ;;  %354 = vmatpush.msra.mxu3 %v243_v6  ;;  %3764 = vst [vmem:[#allocation26_spill] sm:$0xff] %v2671_v27  ;;  %v281_v40 = vld [vmem:[#allocation9 + $0x138] sm:$0xff]  ;;  %v256_v41 = vld [vmem:[#allocation9 + $0x70] sm:$0xff]  ;;  %v2697_v42 = vld [vmem:[#allocation11 + $0xc0] sm:$0xff] }
  0x40   :  { %485 = vmatpush.msrb.mxu2 %v2641_v7  ;;  %228 = vmatpush.msra.mxu1 %v195_v9  ;;  %3765 = vst [vmem:[#allocation27_spill] sm:$0xff] %v2673_v28  ;;  %v2699_v43 = vld [vmem:[#allocation11 + $0xc8] sm:$0xff]  ;;  %v277_v44 = vld [vmem:[#allocation9 + $0x118] sm:$0xff]  ;;  %v2703_v45 = vld [vmem:[#allocation11 + $0xa0] sm:$0xff] }
  0x41   :  { %364 = vmatpush.msrb.mxu0 %v296_v50  ;;  %505 = vmatpush.msrb.mxu3 %v2643_v8  ;;  %v2705_v46 = vld [vmem:[#allocation11 + $0xa8] sm:$0xff]  ;;  %v273_v47 = vld [vmem:[#allocation9 + $0xf8] sm:$0xff]  ;;  %v252_v48 = vld [vmem:[#allocation9 + $0x50] sm:$0xff] }
  0x42   :  { %486 = vmatpush.msrb.mxu2 %v2645_v11  ;;  %229 = vmatpush.msra.mxu1 %v194_v13  ;;  %v2711_v49 = vld [vmem:[#allocation11 + $0x80] sm:$0xff]  ;;  %v2713_v50 = vld [vmem:[#allocation11 + $0x88] sm:$0xff]  ;;  %v2716_v51 = vld [vmem:[#allocation3 + $0x8] sm:$0xff] }
  0x43   :  { %365 = vmatpush.msrb.mxu0 %v292_v58  ;;  %506 = vmatpush.msrb.mxu3 %v2647_v12  ;;  %v269_v52 = vld [vmem:[#allocation9 + $0xd8] sm:$0xff]  ;;  %v2720_v54 = vld [vmem:[#allocation11 + $0x60] sm:$0xff]  ;;  %v2722_v55 = vld [vmem:[#allocation11 + $0x68] sm:$0xff] }
  0x44   :  { %184 = vmatmul.f32.gmra.mxu0 %v143_v53  ;;  %487 = vmatpush.msrb.mxu2 %v2651_v15  ;;  %v248_v53 = vld [vmem:[#allocation9 + $0x30] sm:$0xff]  ;;  %3766 = vst [vmem:[#allocation28_spill] sm:$0xff] %v2722_v55  ;;  %v265_v56 = vld [vmem:[#allocation9 + $0xb8] sm:$0xff]  ;;  %v2726_v58 = vld [vmem:[#allocation11 + $0x40] sm:$0xff] }
  0x45   :  { %366 = vmatpush.msrb.mxu0 %v288_v62  ;;  %507 = vmatpush.msrb.mxu3 %v2653_v16  ;;  %v244_v57 = vld [vmem:[#allocation9 + $0x10] sm:$0xff]  ;;  %3767 = vst [vmem:[#allocation29_spill] sm:$0xff] %v2726_v58  ;;  %v2728_v59 = vld [vmem:[#allocation11 + $0x48] sm:$0xff]  ;;  %v261_v60 = vld [vmem:[#allocation9 + $0x98] sm:$0xff] }
  0x46   :  { %385 = vmatpush.msrb.mxu1 %v305_v17  ;;  %488 = vmatpush.msrb.mxu2 %v2657_v19  ;;  %3768 = vst [vmem:[#allocation30_spill] sm:$0xff] %v2728_v59  ;;  %v2731_v61 = vld [vmem:[#allocation11 + $0x1f0] sm:$0xff]  ;;  %v2734_v62 = vld [vmem:[#allocation11 + $0x20] sm:$0xff]  ;;  %v2736_v63 = vld [vmem:[#allocation11 + $0x28] sm:$0xff] }
  0x47   :  { %367 = vmatpush.msrb.mxu0 %v284_v2  ;;  %508 = vmatpush.msrb.mxu3 %v2659_v20  ;;  %3769 = vst [vmem:[#allocation31_spill] sm:$0xff] %v2734_v62  ;;  %v257_v0 = vld [vmem:[#allocation9 + $0x78] sm:$0xff]  ;;  %v2739_v1 = vld [vmem:[#allocation11 + $0x1d0] sm:$0xff]  ;;  %v2743_v2 = vld [vmem:[#allocation11] sm:$0xff] }
  0x48   :  { %386 = vmatpush.msrb.mxu1 %v301_v21  ;;  %489 = vmatpush.msrb.mxu2 %v2663_v23  ;;  %3770 = vst [vmem:[#allocation32_spill] sm:$0xff] %v2736_v63  ;;  %v2745_v3 = vld [vmem:[#allocation11 + $0x8] sm:$0xff]  ;;  %v253_v4 = vld [vmem:[#allocation9 + $0x58] sm:$0xff]  ;;  %v2751_v6 = vld [vmem:[#allocation11 + $0x1b0] sm:$0xff] }
  0x49   :  { %368 = vmatpush.msrb.mxu0 %v280_v10  ;;  %509 = vmatpush.msrb.mxu3 %v2665_v24  ;;  %3771 = vst [vmem:[#allocation33_spill] sm:$0xff] %v2743_v2  ;;  %v249_v9 = vld [vmem:[#allocation9 + $0x38] sm:$0xff]  ;;  %v2756_v10 = vld [vmem:[#allocation11 + $0x190] sm:$0xff] }
  0x4a   :  { %387 = vmatpush.msrb.mxu1 %v297_v25  ;;  %332 = vmatmul.f32.vlgmr.msra.gmra.mxu2 %v2669_v26  ;;  %3772 = vst [vmem:[#allocation34_spill] sm:$0xff] %v2745_v3  ;;  %v245_v13 = vld [vmem:[#allocation9 + $0x18] sm:$0xff]  ;;  %v2764_v17 = vld [vmem:[#allocation11 + $0x150] sm:$0xff] }
  0x4b   :  { %369 = vmatpush.msrb.mxu0 %v276_v14  ;;  %490 = vmatpush.msrb.mxu2 %v2671_v27  ;;  %v2759_v14 = vld [vmem:[#allocation11 + $0x170] sm:$0xff] }
  0x4c   :  { %187 = vmatmul.f32.gmra.mxu0 %v144_v5  ;;  %510 = vmatpush.msrb.mxu3 %v2673_v28  ;;  %v3662_v5 = vmov 0.0   ;;  %v2774_v21 = vld [vmem:[#allocation11 + $0x110] sm:$0xff] }
  0x4d   :  { %370 = vmatpush.msrb.mxu0 %v272_v18  ;;  %388 = vmatpush.msrb.mxu1 %v293_v29  ;;  %2069 = vst [vmem:[#allocation14] sm:$0xff] %v3662_v5  ;;  %v2769_v18 = vld [vmem:[#allocation11 + $0x130] sm:$0xff] }
  0x4e   :  { %355 = vmatmul.f32.vlgmr.msra.gmra.mxu3 %v2669_v26  ;;  %491 = vmatpush.msrb.mxu2 %v2677_v30  ;;  %v2785_v25 = vld [vmem:[#allocation11 + $0xd0] sm:$0xff] }
  0x4f   :  { %371 = vmatpush.msrb.mxu0 %v268_v22  ;;  %511 = vmatpush.msrb.mxu3 %v2679_v31  ;;  %v2779_v22 = vld [vmem:[#allocation11 + $0xf0] sm:$0xff] }
  0x50   :  { %389 = vmatpush.msrb.mxu1 %v289_v32  ;;  %492 = vmatpush.msrb.mxu2 %v2684_v34  ;;  %v2790_v29 = vld [vmem:[#allocation11 + $0xb0] sm:$0xff] }
  0x51   :  { %372 = vmatpush.msrb.mxu0 %v264_v33  ;;  %512 = vmatpush.msrb.mxu3 %v2686_v35  ;;  %v2795_v32 = vld [vmem:[#allocation11 + $0x90] sm:$0xff] }
  0x52   :  { %390 = vmatpush.msrb.mxu1 %v285_v36  ;;  %493 = vmatpush.msrb.mxu2 %v2691_v38  ;;  %v2134_v33 = vld [vmem:[%s3653_s6] ss:$0 sm:$0xff] }
  0x53   :  { %373 = vmatpush.msrb.mxu0 %v260_v37  ;;  %513 = vmatpush.msrb.mxu3 %v2693_v39  ;;  %v2803_v36 = vld [vmem:[#allocation11 + $0x70] sm:$0xff] }
  0x54   :  { %391 = vmatpush.msrb.mxu1 %v281_v40  ;;  %494 = vmatpush.msrb.mxu2 %v2697_v42  ;;  %3773 = vst [vmem:[#allocation35_spill] sm:$0xff] %v2803_v36  ;;  %v2808_v37 = vld [vmem:[#allocation11 + $0x50] sm:$0xff] }
  0x55   :  { %374 = vmatpush.msrb.mxu0 %v256_v41  ;;  %514 = vmatpush.msrb.mxu3 %v2699_v43  ;;  %3774 = vst [vmem:[#allocation36_spill] sm:$0xff] %v2808_v37 }
  0x56   :  { %392 = vmatpush.msrb.mxu1 %v277_v44  ;;  %495 = vmatpush.msrb.mxu2 %v2703_v45  ;;  %v2813_v44 = vld [vmem:[#allocation11 + $0x30] sm:$0xff] }
  0x57   :  { %515 = vmatpush.msrb.mxu3 %v2705_v46  ;;  %375 = vmatpush.msrb.mxu0 %v252_v48  ;;  %3775 = vst [vmem:[#allocation37_spill] sm:$0xff] %v2813_v44  ;;  %v2818_v48 = vld [vmem:[#allocation11 + $0x1f8] sm:$0xff] }
  0x58   :  { %393 = vmatpush.msrb.mxu1 %v273_v47  ;;  %496 = vmatpush.msrb.mxu2 %v2711_v49 }
  0x59   :  { %516 = vmatpush.msrb.mxu3 %v2713_v50  ;;  %335 = vmatmul.f32.gmra.mxu2 %v2716_v51 }
  0x5a   :  { %358 = vmatmul.f32.gmra.mxu3 %v2716_v51  ;;  %394 = vmatpush.msrb.mxu1 %v269_v52  ;;  %v2820_v52 = vld [vmem:[#allocation11 + $0x10] sm:$0xff] }
  0x5b   :  { %376 = vmatpush.msrb.mxu0 %v248_v53  ;;  %497 = vmatpush.msrb.mxu2 %v2720_v54  ;;  %3776 = vst [vmem:[#allocation38_spill] sm:$0xff] %v2820_v52  ;;  %v2825_v53 = vld [vmem:[#allocation11 + $0x1d8] sm:$0xff] }
  0x5c   :  { %517 = vmatpush.msrb.mxu3 %v2722_v55  ;;  %395 = vmatpush.msrb.mxu1 %v265_v56  ;;  %v2830_v56 = vld [vmem:[#allocation11 + $0x1b8] sm:$0xff] }
  0x5d   :  { %377 = vmatpush.msrb.mxu0 %v244_v57  ;;  %498 = vmatpush.msrb.mxu2 %v2726_v58 }
  0x5e   :  { %518 = vmatpush.msrb.mxu3 %v2728_v59  ;;  %396 = vmatpush.msrb.mxu1 %v261_v60 }
  0x5f   :  { %525 = vmatpush.msra.mxu0 %v2731_v61  ;;  %499 = vmatpush.msrb.mxu2 %v2734_v62 }
  0x60   :  { %519 = vmatpush.msrb.mxu3 %v2736_v63  ;;  %397 = vmatpush.msrb.mxu1 %v257_v0  ;;  %v2836_v0 = vld [vmem:[#allocation11 + $0x198] sm:$0xff] }
  0x61   :  { %526 = vmatpush.msra.mxu0 %v2739_v1  ;;  %500 = vmatpush.msrb.mxu2 %v2743_v2 }
  0x62   :  { %520 = vmatpush.msrb.mxu3 %v2745_v3  ;;  %398 = vmatpush.msrb.mxu1 %v253_v4 }
  0x63   :  { %501 = vmatmul.f32.vlgmr.msrb.gmra.mxu2 %v3662_v5  ;;  %521 = vmatmul.f32.vlgmr.msrb.gmra.mxu3 %v3662_v5 }
  0x64   :  { %527 = vmatpush.msra.mxu0 %v2751_v6  ;;  %399 = vmatpush.msrb.mxu1 %v249_v9  ;;  %v2842_v9 = vld [vmem:[#allocation11 + $0x178] sm:$0xff] }
  0x65   :  { %378 = vmatmul.f32.vlgmr.msrb.gmra.mxu0 %v2669_v26  ;;  %643 = vmatpush.msra.mxu2 %v2641_v7 }
  0x66   :  { %528 = vmatpush.msra.mxu0 %v2756_v10  ;;  %400 = vmatpush.msrb.mxu1 %v245_v13  ;;  %v2848_v13 = vld [vmem:[#allocation11 + $0x158] sm:$0xff] }
  0x67   :  { %663 = vmatpush.msra.mxu3 %v2643_v8  ;;  %644 = vmatpush.msra.mxu2 %v2645_v11 }
  0x68   :  { %529 = vmatpush.msra.mxu0 %v2759_v14 }
  0x69   :  { %664 = vmatpush.msra.mxu3 %v2647_v12  ;;  %645 = vmatpush.msra.mxu2 %v2651_v15 }
  0x6a   :  { %530 = vmatpush.msra.mxu0 %v2764_v17 }
  0x6b   :  { %665 = vmatpush.msra.mxu3 %v2653_v16  ;;  %646 = vmatpush.msra.mxu2 %v2657_v19 }
  0x6c   :  { %531 = vmatpush.msra.mxu0 %v2769_v18 }
  0x6d   :  { %381 = vmatmul.f32.gmra.mxu0 %v2716_v51  ;;  %666 = vmatpush.msra.mxu3 %v2659_v20 }
  0x6e   :  { %532 = vmatpush.msra.mxu0 %v2774_v21  ;;  %647 = vmatpush.msra.mxu2 %v2663_v23 }
  0x6f   :  { %667 = vmatpush.msra.mxu3 %v2665_v24 }
  0x70   :  { %533 = vmatpush.msra.mxu0 %v2779_v22  ;;  %648 = vmatpush.msra.mxu2 %v2671_v27 }
  0x71   :  { %668 = vmatpush.msra.mxu3 %v2673_v28 }
  0x72   :  { %534 = vmatpush.msra.mxu0 %v2785_v25  ;;  %649 = vmatpush.msra.mxu2 %v2677_v30 }
  0x73   :  { %669 = vmatpush.msra.mxu3 %v2679_v31 }
  0x74   :  { %535 = vmatpush.msra.mxu0 %v2790_v29  ;;  %650 = vmatpush.msra.mxu2 %v2684_v34 }
  0x75   :  { %670 = vmatpush.msra.mxu3 %v2686_v35 }
  0x76   :  { %536 = vmatpush.msra.mxu0 %v2795_v32  ;;  %651 = vmatpush.msra.mxu2 %v2691_v38 }
  0x77   :  { %671 = vmatpush.msra.mxu3 %v2693_v39 }
  0x78   :  { %537 = vmatpush.msra.mxu0 %v2803_v36  ;;  %652 = vmatpush.msra.mxu2 %v2697_v42 }
  0x79   :  { %672 = vmatpush.msra.mxu3 %v2699_v43 }
  0x7a   :  { %538 = vmatpush.msra.mxu0 %v2808_v37  ;;  %653 = vmatpush.msra.mxu2 %v2703_v45 }
  0x7b   :  { %673 = vmatpush.msra.mxu3 %v2705_v46 }
  0x7c   :  { %539 = vmatpush.msra.mxu0 %v2813_v44  ;;  %654 = vmatpush.msra.mxu2 %v2711_v49 }
  0x7d   :  { %674 = vmatpush.msra.mxu3 %v2713_v50 }
  0x7e   :  { %540 = vmatpush.msra.mxu0 %v2820_v52  ;;  %655 = vmatpush.msra.mxu2 %v2720_v54 }
  0x7f   :  { %541 = vmatmul.f32.vlgmr.msra.gmra.mxu0 %v3662_v5  ;;  %675 = vmatpush.msra.mxu3 %v2722_v55  ;;  %v2865_v5 = vld [vmem:[#allocation11 + $0x118] sm:$0xff] }
  0x80   :  { %683 = vmatpush.msrb.mxu0 %v2731_v61  ;;  %656 = vmatpush.msra.mxu2 %v2726_v58 }
  0x81   :  { %676 = vmatpush.msra.mxu3 %v2728_v59 }
  0x82   :  { %684 = vmatpush.msrb.mxu0 %v2739_v1  ;;  %657 = vmatpush.msra.mxu2 %v2734_v62 }
  0x83   :  { %677 = vmatpush.msra.mxu3 %v2736_v63 }
  0x84   :  { %685 = vmatpush.msrb.mxu0 %v2751_v6  ;;  %658 = vmatpush.msra.mxu2 %v2743_v2 }
  0x85   :  { %678 = vmatpush.msra.mxu3 %v2745_v3 }
  0x86   :  { %686 = vmatpush.msrb.mxu0 %v2756_v10  ;;  %819 = vmatpush.msrb.mxu2 %v2641_v7 }
  0x87   :  { %839 = vmatpush.msrb.mxu3 %v2643_v8 }
  0x88   :  { %687 = vmatpush.msrb.mxu0 %v2759_v14  ;;  %820 = vmatpush.msrb.mxu2 %v2645_v11 }
  0x89   :  { %840 = vmatpush.msrb.mxu3 %v2647_v12 }
  0x8a   :  { %688 = vmatpush.msrb.mxu0 %v2764_v17  ;;  %821 = vmatpush.msrb.mxu2 %v2651_v15 }
  0x8b   :  { %841 = vmatpush.msrb.mxu3 %v2653_v16  ;;  %v2919_v16 = vld [vmem:[#allocation11 + $0x18] sm:$0xff] }
  0x8c   :  { %689 = vmatpush.msrb.mxu0 %v2769_v18  ;;  %822 = vmatpush.msrb.mxu2 %v2657_v19  ;;  %v2906_v19 = vld [vmem:[#allocation11 + $0x58] sm:$0xff]  ;;  %3781 = vst [vmem:[#allocation43_spill] sm:$0xff] %v2919_v16 }
  0x8d   :  { %842 = vmatpush.msrb.mxu3 %v2659_v20  ;;  %3779 = vst [vmem:[#allocation41_spill] sm:$0xff] %v2906_v19  ;;  %v2912_v20 = vld [vmem:[#allocation11 + $0x38] sm:$0xff] }
  0x8e   :  { %690 = vmatpush.msrb.mxu0 %v2774_v21  ;;  %823 = vmatpush.msrb.mxu2 %v2663_v23  ;;  %3780 = vst [vmem:[#allocation42_spill] sm:$0xff] %v2912_v20 }
  0x8f   :  { %843 = vmatpush.msrb.mxu3 %v2665_v24 }
  0x90   :  { %691 = vmatpush.msrb.mxu0 %v2779_v22  ;;  %824 = vmatpush.msrb.mxu2 %v2671_v27 }
  0x91   :  { %844 = vmatpush.msrb.mxu3 %v2673_v28 }
  0x92   :  { %692 = vmatpush.msrb.mxu0 %v2785_v25  ;;  %825 = vmatpush.msrb.mxu2 %v2677_v30 }
  0x93   :  { %845 = vmatpush.msrb.mxu3 %v2679_v31 }
  0x94   :  { %693 = vmatpush.msrb.mxu0 %v2790_v29  ;;  %826 = vmatpush.msrb.mxu2 %v2684_v34 }
  0x95   :  { %846 = vmatpush.msrb.mxu3 %v2686_v35 }
  0x96   :  { %694 = vmatpush.msrb.mxu0 %v2795_v32  ;;  %827 = vmatpush.msrb.mxu2 %v2691_v38 }
  0x97   :  { %847 = vmatpush.msrb.mxu3 %v2693_v39 }
  0x98   :  { %695 = vmatpush.msrb.mxu0 %v2803_v36  ;;  %828 = vmatpush.msrb.mxu2 %v2697_v42 }
  0x99   :  { %848 = vmatpush.msrb.mxu3 %v2699_v43 }
  0x9a   :  { %696 = vmatpush.msrb.mxu0 %v2808_v37  ;;  %829 = vmatpush.msrb.mxu2 %v2703_v45 }
  0x9b   :  { %849 = vmatpush.msrb.mxu3 %v2705_v46 }
  0x9c   :  { %697 = vmatpush.msrb.mxu0 %v2813_v44  ;;  %830 = vmatpush.msrb.mxu2 %v2711_v49 }
  0x9d   :  { %850 = vmatpush.msrb.mxu3 %v2713_v50 }
  0x9e   :  { %698 = vmatpush.msrb.mxu0 %v2820_v52  ;;  %831 = vmatpush.msrb.mxu2 %v2720_v54 }
  0x9f   :  { %851 = vmatpush.msrb.mxu3 %v2722_v55 }
  0xa0   :  { %859 = vmatpush.msra.mxu0 %v2731_v61  ;;  %832 = vmatpush.msrb.mxu2 %v2726_v58 }
  0xa1   :  { %852 = vmatpush.msrb.mxu3 %v2728_v59 }
  0xa2   :  { %860 = vmatpush.msra.mxu0 %v2739_v1  ;;  %833 = vmatpush.msrb.mxu2 %v2734_v62 }
  0xa3   :  { %853 = vmatpush.msrb.mxu3 %v2736_v63 }
  0xa4   :  { %861 = vmatpush.msra.mxu0 %v2751_v6  ;;  %834 = vmatpush.msrb.mxu2 %v2743_v2 }
  0xa5   :  { %854 = vmatpush.msrb.mxu3 %v2745_v3 }
  0xa6   :  { %862 = vmatpush.msra.mxu0 %v2756_v10 }
  0xa8   :  { %863 = vmatpush.msra.mxu0 %v2759_v14 }
  0xaa   :  { %864 = vmatpush.msra.mxu0 %v2764_v17 }
  0xac   :  { %865 = vmatpush.msra.mxu0 %v2769_v18 }
  0xae   :  { %866 = vmatpush.msra.mxu0 %v2774_v21 }
  0xb0   :  { %867 = vmatpush.msra.mxu0 %v2779_v22 }
  0xb2   :  { %868 = vmatpush.msra.mxu0 %v2785_v25 }
  0xb4   :  { %869 = vmatpush.msra.mxu0 %v2790_v29 }
  0xb6   :  { %870 = vmatpush.msra.mxu0 %v2795_v32 }
  0xb8   :  { %871 = vmatpush.msra.mxu0 %v2803_v36 }
  0xb9   :  { %v182_v40 = vpop.f32.mrf.mxu0 }
  0xba   :  { %v183_v41 = vadd.f32 %v2134_v33, %v182_v40  ;;  %v2853_v40 = vld [vmem:[%s3649_s2] sm:$0x3]  ;;  %872 = vmatpush.msra.mxu0 %v2808_v37 }
  0xbb   :  { %3777 = vst [vmem:[#allocation39_spill] sm:$0xff] %v2853_v40  ;;  %vm632_vm0 = vcmp.eq.s32.totalorder %v2853_v40, 1  ;;  %v2871_v40 = vld [vmem:[#allocation11 + $0xf8] sm:$0xff] }
  0xbc   :  { %v191_v47 = vmax.f32 %v183_v41, 0.0  ;;  %v3663_v41 = vmov 0   ;;  %873 = vmatpush.msra.mxu0 %v2813_v44 }
  0xbd   :  { %2131 = vset.pattern.permute.xlu0 %v3663_v41 }
  0xbe   :  { %230 = vmatmul.f32.vlgmr.msra.gmra.mxu1 %v191_v47  ;;  %v2859_v47 = vld [vmem:[#allocation11 + $0x138] sm:$0xff]  ;;  %874 = vmatpush.msra.mxu0 %v2820_v52 }
  0xbf   :  { %545 = vmatpush.msra.mxu1 %v2818_v48 }
  0xc1   :  { %v185_v57 = vpop.f32.mrf.mxu0  ;;  %546 = vmatpush.msra.mxu1 %v2825_v53 }
  0xc2   :  { %v186_v60 = vadd.f32 %v2134_v33, %v185_v57  ;;  %v633_v57 = vsel %vm632_vm0, 1, %v3663_v41  ;;  %v3791_v36 = vld [vmem:[#allocation39_spill] sm:$0xff] }
  0xc3   :  { %547 = vmatpush.msra.mxu1 %v2830_v56  ;;  %635 = vperm.xlu0 %2131, %v633_v57   ;;  %v2882_v57 = vld [vmem:[#allocation11 + $0xb8] sm:$0xff]  ;;  %vm805_vm2 = vcmp.eq.s32.totalorder %v3791_v36, 2 }
  0xc4   :  { %v192_v4 = vmax.f32 %v186_v60, 0.0 }
  0xc5   :  { %548 = vmatpush.msra.mxu1 %v2836_v0 }
  0xc6   :  { %233 = vmatmul.f32.gmra.mxu1 %v192_v4 }
  0xc7   :  { %549 = vmatpush.msra.mxu1 %v2842_v9 }
  0xc9   :  { %v188_v60 = vpop.f32.mrf.mxu0  ;;  %550 = vmatpush.msra.mxu1 %v2848_v13 }
  0xca   :  { %v189_v4 = vadd.f32 %v2134_v33, %v188_v60  ;;  %v2877_v33 = vld [vmem:[#allocation11 + $0xd8] sm:$0xff] }
  0xcb   :  { %551 = vmatpush.msra.mxu1 %v2859_v47  ;;  %v2888_v60 = vld [vmem:[#allocation11 + $0x98] sm:$0xff] }
  0xcc   :  { %v193_v41 = vmax.f32 %v189_v4, 0.0  ;;  %v2899_v4 = vld [vmem:[#allocation11 + $0x78] sm:$0xff] }
  0xcd   :  { %552 = vmatpush.msra.mxu1 %v2865_v5  ;;  %3778 = vst [vmem:[#allocation40_spill] sm:$0xff] %v2899_v4 }
  0xce   :  { %236 = vmatmul.f32.gmra.mxu1 %v193_v41  ;;  %v2896_v41 = vld [vmem:[%s3658_s11] sm:$0xf] }
  0xcf   :  { %553 = vmatpush.msra.mxu1 %v2871_v40  ;;  %v3782_v24 = vperm.slane %v2896_v41, 0  ;;  %v3783_v28 = vperm.slane %v2896_v41, 1  ;;  %v310_v52 = vperm.slane %v2896_v41, 2 }
  0xd1   :  { %554 = vmatpush.msra.mxu1 %v2877_v33  ;;  %v356_v23 = vpop.f32.mrf.mxu3 }
  0xd2   :  { %v357_v27 = vadd.f32 %v356_v23, %v3783_v28  ;;  %v3785_v23 = vmov 0  }
  0xd3   :  { %555 = vmatpush.msra.mxu1 %v2882_v57  ;;  %2132 = vset.pattern.permute.xlu1 %v3785_v23 }
  0xd4   :  { %409 = vst [vmem:[#allocation2] sm:$0xff] %v357_v27  ;;  %2133 = vset.pattern.permute.xlu2 %v3785_v23  ;;  %v3786_v27 = vperm.slane %v2896_v41, 0 }
  0xd5   :  { %556 = vmatpush.msra.mxu1 %v2888_v60 }
  0xd6   :  { %401 = vmatmul.f32.vlgmr.msrb.gmra.mxu1 %v2669_v26  ;;  %v333_v26 = vpop.f32.mrf.mxu2 }
  0xd7   :  { %557 = vmatpush.msra.mxu1 %v2899_v4  ;;  %v334_v15 = vadd.f32 %v333_v26, %v3782_v24  ;;  %v3787_v26 = vperm.slane %v2896_v41, 1 }
  0xd9   :  { %558 = vmatpush.msra.mxu1 %v2906_v19  ;;  %408 = vst [vmem:[#allocation2 + $0x30] sm:$0xff] %v334_v15  ;;  %v3784_v15 = vmov 0.0  }
  0xdb   :  { %559 = vmatpush.msra.mxu1 %v2912_v20 }
  0xdd   :  { %560 = vmatpush.msra.mxu1 %v2919_v16 }
  0xde   :  { %404 = vmatmul.f32.gmra.mxu1 %v2716_v51  ;;  %v336_v24 = vpop.f32.mrf.mxu2  ;;  %v359_v51 = vpop.f32.mrf.mxu3 }
  0xdf   :  { %703 = vmatpush.msrb.mxu1 %v2818_v48  ;;  %v337_v28 = vadd.f32 %v336_v24, %v3786_v27 }
  0xe1   :  { %704 = vmatpush.msrb.mxu1 %v2825_v53  ;;  %412 = vst [vmem:[#allocation2 + $0x8] sm:$0xff] %v337_v28 }
  0xe2   :  { %v379_v3 = vpop.f32.mrf.mxu0 }
  0xe3   :  { %705 = vmatpush.msrb.mxu1 %v2830_v56  ;;  %v380_v2 = vadd.f32 %v379_v3, %v310_v52 }
  0xe5   :  { %706 = vmatpush.msrb.mxu1 %v2836_v0  ;;  %410 = vst [vmem:[#allocation2 + $0x18] sm:$0xff] %v380_v2 }
  0xe6   :  { %561 = vmatmul.f32.vlgmr.msra.gmra.mxu1 %v3784_v15  ;;  %v360_v15 = vadd.f32 %v359_v51, %v3787_v26  ;;  %v502_v62 = vpop.f32.mrf.mxu2  ;;  %v522_v24 = vpop.f32.mrf.mxu3 }
  0xe7   :  { %707 = vmatpush.msrb.mxu1 %v2842_v9 }
  0xe8   :  { %413 = vst [vmem:[#allocation2 + $0x20] sm:$0xff] %v360_v15 }
  0xe9   :  { %708 = vmatpush.msrb.mxu1 %v2848_v13 }
  0xea   :  { %v382_v44 = vpop.f32.mrf.mxu0 }
  0xeb   :  { %709 = vmatpush.msrb.mxu1 %v2859_v47  ;;  %v383_v63 = vadd.f32 %v382_v44, %v310_v52  ;;  %v311_v52 = vperm.slane %v2896_v41, 3 }
  0xed   :  { %710 = vmatpush.msrb.mxu1 %v2865_v5  ;;  %414 = vst [vmem:[#allocation2 + $0x28] sm:$0xff] %v383_v63 }
  0xef   :  { %711 = vmatpush.msrb.mxu1 %v2871_v40 }
  0xf1   :  { %712 = vmatpush.msrb.mxu1 %v2877_v33 }
  0xf3   :  { %713 = vmatpush.msrb.mxu1 %v2882_v57 }
  0xf5   :  { %714 = vmatpush.msrb.mxu1 %v2888_v60 }
  0xf7   :  { %715 = vmatpush.msrb.mxu1 %v2899_v4 }
  0xf9   :  { %716 = vmatpush.msrb.mxu1 %v2906_v19 }
  0xfb   :  { %717 = vmatpush.msrb.mxu1 %v2912_v20 }
  0xfd   :  { %718 = vmatpush.msrb.mxu1 %v2919_v16 }
  0xff   :  { %879 = vmatpush.msra.mxu1 %v2818_v48 }
 0x101   :  { %880 = vmatpush.msra.mxu1 %v2825_v53 }
 0x103   :  { %881 = vmatpush.msra.mxu1 %v2830_v56 }
 0x105   :  { %882 = vmatpush.msra.mxu1 %v2836_v0 }
 0x107   :  { %883 = vmatpush.msra.mxu1 %v2842_v9 }
 0x109   :  { %884 = vmatpush.msra.mxu1 %v2848_v13 }
 0x10b   :  { %885 = vmatpush.msra.mxu1 %v2859_v47 }
 0x10d   :  { %886 = vmatpush.msra.mxu1 %v2865_v5 }
 0x10f   :  { %887 = vmatpush.msra.mxu1 %v2871_v40 }
 0x111   :  { %888 = vmatpush.msra.mxu1 %v2877_v33 }
 0x113   :  { %889 = vmatpush.msra.mxu1 %v2882_v57 }
 0x115   :  { %890 = vmatpush.msra.mxu1 %v2888_v60 }
 0x117   :  { %891 = vmatpush.msra.mxu1 %v2899_v4 }
 0x119   :  { %892 = vmatpush.msra.mxu1 %v2906_v19  ;;  %v482_v19 = vld [vmem:[#allocation2] sm:$0x3] }
 0x11a   :  { %v566_v37 = vadd.f32 %v522_v24, %v482_v19 }
 0x11b   :  { %893 = vmatpush.msra.mxu1 %v2912_v20 }
 0x11c   :  { %v2093_v28 = vmul.f32 -1.442695, %v566_v37 }
 0x11d   :  { %894 = vmatpush.msra.mxu1 %v2919_v16  ;;  %v481_v16 = vld [vmem:[#allocation2 + $0x30] sm:$0x3] }
 0x11e   :  { %v565_v27 = vadd.f32 %v502_v62, %v481_v16 }
 0x120   :  { %v2092_v59 = vmul.f32 -1.442695, %v565_v27 }
 0x122   :  { %2137 = vpow2.f32 %v2092_v59 }
 0x123   :  { %2139 = vpow2.f32 %v2093_v28 }
 0x128   :  { %v2138_v2 = vpop.eup %2137 }
 0x129   :  { %v2140_v3 = vpop.eup %2139  ;;  %v572_v44 = vadd.f32 1.0, %v2138_v2 }
 0x12a   :  { %v591_v63 = vadd.f32 1.0, %v2140_v3 }
 0x12b   :  { %2141 = vrcp.f32 %v572_v44  ;;  %vm578_vm1 = vweird.f32 %v572_v44 }
 0x12c   :  { %2143 = vrcp.f32 %v591_v63  ;;  %vm597_vm4 = vweird.f32 %v591_v63 }
 0x131   :  { %v2142_v16 = vpop.eup %2141 }
 0x132   :  { %v2144_v19 = vpop.eup %2143  ;;  %v574_v37 = vmul.f32 %v2142_v16, %v572_v44  ;;  %vm579_vm3 = vweird.f32 %v2142_v16 }
 0x133   :  { %v593_v59 = vmul.f32 %v2144_v19, %v591_v63  ;;  %vm598_vm5 = vweird.f32 %v2144_v19  ;;  %vm3016_vm6 = vmor %vm578_vm1, %vm579_vm3 }
 0x134   :  { %v575_v27 = vsub.f32 1.0, %v574_v37  ;;  %vm599_vm7 = vmor %vm597_vm4, %vm598_vm5 }
 0x135   :  { %v594_v28 = vsub.f32 1.0, %v593_v59 }
 0x136   :  { %v576_v4 = vmul.f32 %v2142_v16, %v575_v27  ;;  %v582_v27 = vand.u32 2147483647, %v572_v44 }
 0x137   :  { %v595_v41 = vmul.f32 %v2144_v19, %v594_v28 }
 0x138   :  { %v577_v37 = vadd.f32 %v2142_v16, %v576_v4  ;;  %vm583_vm8 = vcmp.eq.f32.partialorder %v582_v27, 8.507059e+37 }
 0x139   :  { %v596_v28 = vadd.f32 %v2144_v19, %v595_v41 }
 0x13b   :  { %v3007_v20 = vpop.f32.mrf.mxu1 }
 0x13c   :  { %3788 = vst [vmem:[#allocation44_spill] sm:$0xff] %v3007_v20 }
 0x143   :  { %v3009_v51 = vpop.f32.mrf.mxu1 }
 0x144   :  { %3789 = vst [vmem:[#allocation45_spill] sm:$0xff] %v3009_v51  ;;  %v542_v51 = vpop.f32.mrf.mxu0 }
 0x14b   :  { %v3011_v26 = vpop.f32.mrf.mxu1 }
 0x14c   :  { %3790 = vst [vmem:[#allocation46_spill] sm:$0xff] %v3011_v26  ;;  %v483_v26 = vld [vmem:[#allocation2 + $0x18] sm:$0x3] }
 0x153   :  { %v402_v15 = vpop.f32.mrf.mxu1 }
 0x154   :  { %v403_v20 = vadd.f32 %v402_v15, %v311_v52 }
 0x156   :  { %411 = vst [vmem:[#allocation2 + $0x10] sm:$0xff] %v403_v20  ;;  %v567_v20 = vadd.f32 %v542_v51, %v483_v26  ;;  %v581_v26 = vsel %vm3016_vm6, %v2142_v16, %v577_v37 }
 0x15b   :  { %v405_v62 = vpop.f32.mrf.mxu1 }
 0x15c   :  { %v406_v24 = vadd.f32 %v405_v62, %v311_v52  ;;  %v806_v52 = vsel %vm805_vm2, 1, %v3785_v23  ;;  %v603_v62 = vand.u32 2147483648, %v591_v63 }
 0x15d   :  { %v484_v2 = vld [vmem:[#allocation2 + $0x10] sm:$0x3]  ;;  %808 = vperm.xlu0 %2131, %v806_v52  }
 0x15e   :  { %415 = vst [vmem:[#allocation2 + $0x38] sm:$0xff] %v406_v24  ;;  %v584_v24 = vand.u32 2147483648, %v572_v44  ;;  %v604_v51 = vor.u32 1.1754944e-38, %v603_v62 }
 0x163   :  { %v562_v3 = vpop.f32.mrf.mxu1 }
 0x164   :  { %v568_v58 = vadd.f32 %v562_v3, %v484_v2  ;;  %v601_v2 = vand.u32 2147483647, %v591_v63  ;;  %v600_v3 = vsel %vm599_vm7, %v2144_v19, %v596_v28 }
 0x166   :  { %v2094_v15 = vmul.f32 -1.442695, %v568_v58  ;;  %v585_v58 = vor.u32 1.1754944e-38, %v584_v24  ;;  %vm602_vm9 = vcmp.eq.f32.partialorder %v601_v2, 8.507059e+37  ;;  %v3795_v2 = vld [vmem:[#allocation21_spill] sm:$0xff] }
 0x167   :  { %v605_v36 = vsel %vm602_vm9, %v604_v51, %v600_v3  ;;  %v3815_v51 = vld [vmem:[#allocation38_spill] sm:$0xff] }
 0x168   :  { %2145 = vpow2.f32 %v2094_v15  ;;  %v586_v23 = vsel %vm583_vm8, %v585_v58, %v581_v26  ;;  %v627_v55 = vmul.f32 0.0, %v605_v36  ;;  %v3816_v58 = vld [vmem:[#allocation43_spill] sm:$0xff] }
 0x169   :  { %2147 = vtanh.f32 %v567_v20 }
 0x16e   :  { %v2146_v52 = vpop.eup %2145 }
 0x16f   :  { %v611_v15 = vadd.f32 1.0, %v2146_v52  ;;  %v2148_v4 = vpop.eup %2147  ;;  %v642_v52 = vld [vmem:[#allocation2 + $0x10] sm:$0xc] }
 0x170   :  { %v628_v44 = vmul.f32 %v2148_v4, %v586_v23 }
 0x171   :  { %2149 = vrcp.f32 %v611_v15  ;;  %v623_v24 = vand.u32 2147483648, %v611_v15  ;;  %v621_v19 = vand.u32 2147483647, %v611_v15  ;;  %vm617_vm11 = vweird.f32 %v611_v15 }
 0x172   :  { %v3022_v63 = vadd.f32 %v628_v44, %v627_v55  ;;  %v3794_v55 = vld [vmem:[#allocation20_spill] sm:$0xff] }
 0x173   :  { %v624_v59 = vor.u32 1.1754944e-38, %v623_v24  ;;  %vm622_vm13 = vcmp.eq.f32.partialorder %v621_v19, 8.507059e+37  ;;  %v639_v24 = vld [vmem:[#allocation2 + $0x30] sm:$0xc] }
 0x174   :  { %2151 = vtanh.f32 %v3022_v63 }
 0x177   :  { %v2150_v41 = vpop.eup %2149 }
 0x178   :  { %v613_v20 = vmul.f32 %v2150_v41, %v611_v15  ;;  %vm618_vm10 = vweird.f32 %v2150_v41 }
 0x179   :  { %vm619_vm12 = vmor %vm617_vm11, %vm618_vm10 }
 0x17a   :  { %v614_v62 = vsub.f32 1.0, %v613_v20  ;;  %v2152_v28 = vpop.eup %2151 }
 0x17c   :  { %v615_v16 = vmul.f32 %v2150_v41, %v614_v62 }
 0x17e   :  { %v616_v37 = vadd.f32 %v2150_v41, %v615_v16  ;;  %v640_v16 = vld [vmem:[#allocation2] sm:$0xc] }
 0x180   :  { %v620_v27 = vsel %vm619_vm12, %v2150_v41, %v616_v37 }
 0x181   :  { %v625_v36 = vsel %vm622_vm13, %v624_v59, %v620_v27 }
 0x182   :  { %v3025_v23 = vmul.f32 %v2152_v28, %v625_v36 }
 0x184   :  { %659 = vmatmul.f32.vlgmr.msra.gmra.mxu2 %v3025_v23  ;;  %679 = vmatmul.f32.vlgmr.msra.gmra.mxu3 %v3025_v23 }
 0x185   :  { %699 = vmatmul.f32.vlgmr.msrb.gmra.mxu0 %v3025_v23  ;;  %719 = vmatmul.f32.vlgmr.msrb.gmra.mxu1 %v3025_v23 }
 0x186   :  { %995 = vmatpush.msra.mxu2 %v2641_v7  ;;  %1015 = vmatpush.msra.mxu3 %v2643_v8  ;;  %v3796_v7 = vld [vmem:[#allocation22_spill] sm:$0xff]  ;;  %v3797_v8 = vld [vmem:[#allocation23_spill] sm:$0xff] }
 0x187   :  { %1035 = vmatpush.msrb.mxu0 %v2731_v61  ;;  %1055 = vmatpush.msrb.mxu1 %v2818_v48  ;;  %v3800_v61 = vld [vmem:[#allocation26_spill] sm:$0xff] }
 0x188   :  { %996 = vmatpush.msra.mxu2 %v2645_v11  ;;  %1016 = vmatpush.msra.mxu3 %v2647_v12  ;;  %v3798_v11 = vld [vmem:[#allocation24_spill] sm:$0xff]  ;;  %v3799_v12 = vld [vmem:[#allocation25_spill] sm:$0xff] }
 0x189   :  { %1036 = vmatpush.msrb.mxu0 %v2739_v1  ;;  %1056 = vmatpush.msrb.mxu1 %v2825_v53  ;;  %v3801_v1 = vld [vmem:[#allocation27_spill] sm:$0xff] }
 0x18a   :  { %997 = vmatpush.msra.mxu2 %v3794_v55  ;;  %1017 = vmatpush.msra.mxu3 %v3795_v2 }
 0x18b   :  { %1037 = vmatpush.msrb.mxu0 %v2751_v6  ;;  %1057 = vmatpush.msrb.mxu1 %v2830_v56 }
 0x18c   :  { %998 = vmatpush.msra.mxu2 %v3796_v7  ;;  %1018 = vmatpush.msra.mxu3 %v3797_v8 }
 0x18d   :  { %1038 = vmatpush.msrb.mxu0 %v2756_v10  ;;  %1058 = vmatpush.msrb.mxu1 %v2836_v0 }
 0x18e   :  { %999 = vmatpush.msra.mxu2 %v3798_v11  ;;  %1019 = vmatpush.msra.mxu3 %v3799_v12 }
 0x18f   :  { %1039 = vmatpush.msrb.mxu0 %v2759_v14  ;;  %1059 = vmatpush.msrb.mxu1 %v2842_v9 }
 0x190   :  { %1000 = vmatpush.msra.mxu2 %v3800_v61  ;;  %1020 = vmatpush.msra.mxu3 %v3801_v1  ;;  %v3817_v61 = vld [vmem:[#allocation39_spill] sm:$0xff]  ;;  %v3818_v1 = vmov 0  }
 0x191   :  { %1040 = vmatpush.msrb.mxu0 %v2764_v17  ;;  %1060 = vmatpush.msrb.mxu1 %v2848_v13  ;;  %vm981_vm14 = vcmp.eq.s32.totalorder %v3817_v61, 3  ;;  %vm1157_vm13 = vcmp.eq.s32.totalorder %v3817_v61, 4 }
 0x192   :  { %1001 = vmatpush.msra.mxu2 %v2677_v30  ;;  %1021 = vmatpush.msra.mxu3 %v2679_v31  ;;  %v3802_v30 = vld [vmem:[#allocation28_spill] sm:$0xff]  ;;  %v3803_v31 = vld [vmem:[#allocation35_spill] sm:$0xff] }
 0x193   :  { %1041 = vmatpush.msrb.mxu0 %v2769_v18  ;;  %1061 = vmatpush.msrb.mxu1 %v2859_v47 }
 0x194   :  { %1002 = vmatpush.msra.mxu2 %v2684_v34  ;;  %1022 = vmatpush.msra.mxu3 %v2686_v35  ;;  %v3804_v34 = vld [vmem:[#allocation40_spill] sm:$0xff]  ;;  %v3805_v35 = vld [vmem:[#allocation29_spill] sm:$0xff] }
 0x195   :  { %1042 = vmatpush.msrb.mxu0 %v2774_v21  ;;  %1062 = vmatpush.msrb.mxu1 %v2865_v5 }
 0x196   :  { %1003 = vmatpush.msra.mxu2 %v2691_v38  ;;  %1023 = vmatpush.msra.mxu3 %v2693_v39  ;;  %v3806_v38 = vld [vmem:[#allocation30_spill] sm:$0xff]  ;;  %v3807_v39 = vld [vmem:[#allocation36_spill] sm:$0xff] }
 0x197   :  { %1043 = vmatpush.msrb.mxu0 %v2779_v22  ;;  %1063 = vmatpush.msrb.mxu1 %v2871_v40 }
 0x198   :  { %1004 = vmatpush.msra.mxu2 %v2697_v42  ;;  %1024 = vmatpush.msra.mxu3 %v2699_v43  ;;  %v3808_v42 = vld [vmem:[#allocation41_spill] sm:$0xff]  ;;  %v3809_v43 = vld [vmem:[#allocation31_spill] sm:$0xff] }
 0x199   :  { %1044 = vmatpush.msrb.mxu0 %v2785_v25  ;;  %1064 = vmatpush.msrb.mxu1 %v2877_v33 }
 0x19a   :  { %1005 = vmatpush.msra.mxu2 %v2703_v45  ;;  %1025 = vmatpush.msra.mxu3 %v2705_v46  ;;  %v3810_v45 = vld [vmem:[#allocation32_spill] sm:$0xff]  ;;  %v3811_v46 = vld [vmem:[#allocation37_spill] sm:$0xff] }
 0x19b   :  { %1045 = vmatpush.msrb.mxu0 %v2790_v29  ;;  %1065 = vmatpush.msrb.mxu1 %v2882_v57 }
 0x19c   :  { %1006 = vmatpush.msra.mxu2 %v2711_v49  ;;  %1026 = vmatpush.msra.mxu3 %v2713_v50  ;;  %v3812_v49 = vld [vmem:[#allocation42_spill] sm:$0xff]  ;;  %v3813_v50 = vld [vmem:[#allocation33_spill] sm:$0xff] }
 0x19d   :  { %1046 = vmatpush.msrb.mxu0 %v2795_v32  ;;  %1066 = vmatpush.msrb.mxu1 %v2888_v60 }
 0x19e   :  { %1007 = vmatpush.msra.mxu2 %v2720_v54  ;;  %1027 = vmatpush.msra.mxu3 %v3802_v30  ;;  %v3814_v54 = vld [vmem:[#allocation34_spill] sm:$0xff]  ;;  %v982_v30 = vsel %vm981_vm14, 1, %v3818_v1 }
 0x19f   :  { %1047 = vmatpush.msrb.mxu0 %v3803_v31  ;;  %1067 = vmatpush.msrb.mxu1 %v3804_v34 }
 0x1a0   :  { %1008 = vmatpush.msra.mxu2 %v3805_v35  ;;  %1028 = vmatpush.msra.mxu3 %v3806_v38  ;;  %v641_v38 = vld [vmem:[#allocation2 + $0x18] sm:$0xc] }
 0x1a1   :  { %1048 = vmatpush.msrb.mxu0 %v3807_v39  ;;  %1068 = vmatpush.msrb.mxu1 %v3808_v42 }
 0x1a2   :  { %1009 = vmatpush.msra.mxu2 %v3809_v43  ;;  %1029 = vmatpush.msra.mxu3 %v3810_v45 }
 0x1a3   :  { %1049 = vmatpush.msrb.mxu0 %v3811_v46  ;;  %1069 = vmatpush.msrb.mxu1 %v3812_v49 }
 0x1a4   :  { %1010 = vmatpush.msra.mxu2 %v3813_v50  ;;  %1030 = vmatpush.msra.mxu3 %v3814_v54 }
 0x1a5   :  { %1050 = vmatpush.msrb.mxu0 %v3815_v51  ;;  %1070 = vmatpush.msrb.mxu1 %v3816_v58 }
 0x1a6   :  { %984 = vperm.xlu1 %2132, %v982_v30  }
 0x202   :  { %v720_v26 = vpop.f32.mrf.mxu1  ;;  %v700_v8 = vpop.f32.mrf.mxu0 }
 0x203   :  { %v730_v3 = vrot.slane %v720_v26, 6  ;;  %v729_v12 = vrot.slane %v700_v8, 6 }
 0x205   :  { %v738_v15 = vadd.f32 %v730_v3, %v642_v52  ;;  %v737_v45 = vadd.f32 %v729_v12, %v641_v38 }
 0x207   :  { %v2097_v4 = vmul.f32 -1.442695, %v738_v15  ;;  %v660_v44 = vpop.f32.mrf.mxu2  ;;  %v680_v41 = vpop.f32.mrf.mxu3 }
 0x208   :  { %v727_v20 = vrot.slane %v660_v44, 6  ;;  %v728_v62 = vrot.slane %v680_v41, 6 }
 0x209   :  { %2153 = vpow2.f32 %v2097_v4 }
 0x20a   :  { %v735_v19 = vadd.f32 %v727_v20, %v639_v24  ;;  %v736_v37 = vadd.f32 %v728_v62, %v640_v16 }
 0x20c   :  { %v2095_v59 = vmul.f32 -1.442695, %v735_v19  ;;  %v2096_v27 = vmul.f32 -1.442695, %v736_v37 }
 0x20e   :  { %2155 = vpow2.f32 %v2095_v59 }
 0x20f   :  { %v2154_v28 = vpop.eup %2153  ;;  %2157 = vpow2.f32 %v2096_v27 }
 0x210   :  { %v3095_v36 = vadd.f32 1.0, %v2154_v28 }
 0x212   :  { %2159 = vrcp.f32 %v3095_v36  ;;  %vm787_vm8 = vweird.f32 %v3095_v36 }
 0x214   :  { %v2156_v55 = vpop.eup %2155 }
 0x215   :  { %v2158_v2 = vpop.eup %2157  ;;  %v742_v7 = vadd.f32 1.0, %v2156_v55 }
 0x216   :  { %v761_v11 = vadd.f32 1.0, %v2158_v2  ;;  %v798_v2 = vrot.slane %v3022_v63, 6  ;;  %v791_v63 = vand.u32 2147483647, %v3095_v36 }
 0x217   :  { %2161 = vrcp.f32 %v742_v7  ;;  %v754_v15 = vand.u32 2147483648, %v742_v7  ;;  %v752_v41 = vand.u32 2147483647, %v742_v7  ;;  %vm748_vm1 = vweird.f32 %v742_v7 }
 0x218   :  { %2163 = vrcp.f32 %v761_v11  ;;  %v2160_v35 = vpop.eup %2159  ;;  %v773_v20 = vand.u32 2147483648, %v761_v11  ;;  %v771_v24 = vand.u32 2147483647, %v761_v11  ;;  %vm767_vm3 = vweird.f32 %v761_v11 }
 0x219   :  { %v783_v3 = vmul.f32 %v2160_v35, %v3095_v36  ;;  %2165 = vtanh.f32 %v737_v45  ;;  %v755_v37 = vor.u32 1.1754944e-38, %v754_v15  ;;  %vm753_vm4 = vcmp.eq.f32.partialorder %v752_v41, 8.507059e+37 }
 0x21a   :  { %v774_v28 = vor.u32 1.1754944e-38, %v773_v20  ;;  %vm772_vm6 = vcmp.eq.f32.partialorder %v771_v24, 8.507059e+37  ;;  %vm788_vm7 = vweird.f32 %v2160_v35  ;;  %vm792_vm10 = vcmp.eq.f32.partialorder %v791_v63, 8.507059e+37  ;;  %v3117_v24 = vld [vmem:[#allocation11 + $0x1f0] sm:$0xff] }
 0x21b   :  { %v784_v16 = vsub.f32 1.0, %v783_v3  ;;  %vm789_vm9 = vmor %vm787_vm8, %vm788_vm7 }
 0x21d   :  { %v2162_v43 = vpop.eup %2161  ;;  %v785_v30 = vmul.f32 %v2160_v35, %v784_v16  ;;  %v3124_v16 = vld [vmem:[#allocation11 + $0x1c8] sm:$0xff] }
 0x21e   :  { %v2164_v50 = vpop.eup %2163  ;;  %v744_v54 = vmul.f32 %v2162_v43, %v742_v7  ;;  %vm749_vm15 = vweird.f32 %v2162_v43 }
 0x21f   :  { %v763_v26 = vmul.f32 %v2164_v50, %v761_v11  ;;  %vm768_vm0 = vweird.f32 %v2164_v50  ;;  %vm750_vm2 = vmor %vm748_vm1, %vm749_vm15  ;;  %v2166_v55 = vpop.eup %2165  ;;  %v786_v3 = vadd.f32 %v2160_v35, %v785_v30  ;;  %v793_v11 = vand.u32 2147483648, %v3095_v36  ;;  %v3111_v36 = vld [vmem:[#allocation11 + $0x1e0] sm:$0xff] }
 0x220   :  { %v745_v52 = vsub.f32 1.0, %v744_v54  ;;  %vm769_vm5 = vmor %vm767_vm3, %vm768_vm0 }
 0x221   :  { %v764_v4 = vsub.f32 1.0, %v763_v26  ;;  %v636_v26 = vpop.permute.xlu0 %635 }
 0x222   :  { %v746_v44 = vmul.f32 %v2162_v43, %v745_v52  ;;  %vm637_vm11 = vcmp.eq.s32.totalorder %v636_v26, 1 }
 0x223   :  { %v765_v62 = vmul.f32 %v2164_v50, %v764_v4  ;;  %v638_v20 = vsel %vm637_vm11, %v3025_v23, 0.0  ;;  %v3121_v23 = vld [vmem:[#allocation11 + $0x1c0] sm:$0xff] }
 0x224   :  { %v747_v19 = vadd.f32 %v2162_v43, %v746_v44 }
 0x225   :  { %v766_v59 = vadd.f32 %v2164_v50, %v765_v62 }
 0x226   :  { %v751_v27 = vsel %vm750_vm2, %v2162_v43, %v747_v19  ;;  %v790_v43 = vsel %vm789_vm9, %v2160_v35, %v786_v3  ;;  %v3114_v35 = vld [vmem:[#allocation11 + $0x1e8] sm:$0xff]  ;;  %v3127_v19 = vld [vmem:[#allocation11 + $0x1d0] sm:$0xff] }
 0x227   :  { %v756_v8 = vsel %vm753_vm4, %v755_v37, %v751_v27  ;;  %v770_v12 = vsel %vm769_vm5, %v2164_v50, %v766_v59  ;;  %v794_v50 = vor.u32 1.1754944e-38, %v793_v11  ;;  %v3131_v37 = vld [vmem:[#allocation11 + $0x1a0] sm:$0xff]  ;;  %v3134_v59 = vld [vmem:[#allocation11 + $0x1a8] sm:$0xff] }
 0x228   :  { %v801_v38 = vmul.f32 %v2166_v55, %v756_v8  ;;  %v775_v45 = vsel %vm772_vm6, %v774_v28, %v770_v12  ;;  %v3142_v27 = vld [vmem:[#allocation11 + $0x188] sm:$0xff]  ;;  %v818_v55 = vld [vmem:[#allocation2 + $0x10] sm:$0x30] }
 0x229   :  { %v800_v54 = vmul.f32 %v798_v2, %v775_v45  ;;  %v809_v52 = vpop.permute.xlu0 %808  ;;  %v795_v4 = vsel %vm792_vm10, %v794_v50, %v790_v43  ;;  %v3150_v28 = vld [vmem:[#allocation11 + $0x168] sm:$0xff]  ;;  %v816_v45 = vld [vmem:[#allocation2] sm:$0x30] }
 0x22a   :  { %vm810_vm12 = vcmp.eq.s32.totalorder %v809_v52, 1 }
 0x22b   :  { %v3102_v7 = vadd.f32 %v801_v38, %v800_v54  ;;  %v815_v38 = vld [vmem:[#allocation2 + $0x30] sm:$0x30] }
 0x22d   :  { %2167 = vtanh.f32 %v3102_v7 }
 0x233   :  { %v2168_v15 = vpop.eup %2167 }
 0x234   :  { %v804_v44 = vmul.f32 %v2168_v15, %v795_v4 }
 0x236   :  { %v812_v41 = vrot.slane %v804_v44, 2  ;;  %v1158_v44 = vsel %vm1157_vm13, 1, %v3818_v1 }
 0x237   :  { %1160 = vperm.xlu1 %2132, %v1158_v44  }
 0x238   :  { %v3109_v62 = vsel %vm810_vm12, %v812_v41, %v638_v20  ;;  %835 = vmatmul.f32.vlgmr.msrb.gmra.mxu2 %v812_v41  ;;  %855 = vmatmul.f32.vlgmr.msrb.gmra.mxu3 %v812_v41  ;;  %v817_v20 = vld [vmem:[#allocation2 + $0x18] sm:$0x30] }
 0x239   :  { %875 = vmatmul.f32.vlgmr.msra.gmra.mxu0 %v812_v41  ;;  %895 = vmatmul.f32.vlgmr.msra.gmra.mxu1 %v812_v41 }
 0x23a   :  { %1171 = vmatpush.msrb.mxu2 %v3111_v36  ;;  %1191 = vmatpush.msrb.mxu3 %v3114_v35 }
 0x23b   :  { %1211 = vmatpush.msra.mxu0 %v3117_v24  ;;  %1231 = vmatpush.msra.mxu1 %v2818_v48  ;;  %v3139_v48 = vld [vmem:[#allocation11 + $0x180] sm:$0xff] }
 0x23c   :  { %1172 = vmatpush.msrb.mxu2 %v3121_v23  ;;  %1192 = vmatpush.msrb.mxu3 %v3124_v16 }
 0x23d   :  { %1212 = vmatpush.msra.mxu0 %v3127_v19  ;;  %1232 = vmatpush.msra.mxu1 %v2825_v53  ;;  %v3147_v53 = vld [vmem:[#allocation11 + $0x160] sm:$0xff] }
 0x23e   :  { %1173 = vmatpush.msrb.mxu2 %v3131_v37  ;;  %1193 = vmatpush.msrb.mxu3 %v3134_v59 }
 0x23f   :  { %1213 = vmatpush.msra.mxu0 %v2751_v6  ;;  %1233 = vmatpush.msra.mxu1 %v2830_v56  ;;  %v3155_v6 = vld [vmem:[#allocation11 + $0x140] sm:$0xff]  ;;  %v3158_v56 = vld [vmem:[#allocation11 + $0x148] sm:$0xff] }
 0x240   :  { %1174 = vmatpush.msrb.mxu2 %v3139_v48  ;;  %1194 = vmatpush.msrb.mxu3 %v3142_v27 }
 0x241   :  { %1214 = vmatpush.msra.mxu0 %v2756_v10  ;;  %1234 = vmatpush.msra.mxu1 %v2836_v0  ;;  %v3163_v10 = vld [vmem:[#allocation11 + $0x120] sm:$0xff]  ;;  %v3166_v0 = vld [vmem:[#allocation11 + $0x128] sm:$0xff] }
 0x242   :  { %1175 = vmatpush.msrb.mxu2 %v3147_v53  ;;  %1195 = vmatpush.msrb.mxu3 %v3150_v28 }
 0x243   :  { %1215 = vmatpush.msra.mxu0 %v2759_v14  ;;  %1235 = vmatpush.msra.mxu1 %v2842_v9  ;;  %v3171_v14 = vld [vmem:[#allocation11 + $0x100] sm:$0xff]  ;;  %v3174_v9 = vld [vmem:[#allocation11 + $0x108] sm:$0xff] }
 0x244   :  { %1176 = vmatpush.msrb.mxu2 %v3155_v6  ;;  %1196 = vmatpush.msrb.mxu3 %v3158_v56 }
 0x245   :  { %1216 = vmatpush.msra.mxu0 %v2764_v17  ;;  %1236 = vmatpush.msra.mxu1 %v2848_v13  ;;  %v3179_v17 = vld [vmem:[#allocation11 + $0xe0] sm:$0xff]  ;;  %v3182_v13 = vld [vmem:[#allocation11 + $0xe8] sm:$0xff] }
 0x246   :  { %1177 = vmatpush.msrb.mxu2 %v3163_v10  ;;  %1197 = vmatpush.msrb.mxu3 %v3166_v0 }
 0x247   :  { %1217 = vmatpush.msra.mxu0 %v2769_v18  ;;  %1237 = vmatpush.msra.mxu1 %v2859_v47  ;;  %v3187_v18 = vld [vmem:[#allocation11 + $0xc0] sm:$0xff]  ;;  %v3190_v47 = vld [vmem:[#allocation11 + $0xc8] sm:$0xff] }
 0x248   :  { %1178 = vmatpush.msrb.mxu2 %v3171_v14  ;;  %1198 = vmatpush.msrb.mxu3 %v3174_v9  ;;  %3819 = vst [vmem:[#allocation20_spill] sm:$0xff] %v3187_v18 }
 0x249   :  { %1218 = vmatpush.msra.mxu0 %v2774_v21  ;;  %1238 = vmatpush.msra.mxu1 %v2865_v5  ;;  %3820 = vst [vmem:[#allocation21_spill] sm:$0xff] %v3190_v47  ;;  %v3195_v5 = vld [vmem:[#allocation11 + $0xa0] sm:$0xff]  ;;  %v3198_v21 = vld [vmem:[#allocation11 + $0xa8] sm:$0xff] }
 0x24a   :  { %1179 = vmatpush.msrb.mxu2 %v3179_v17  ;;  %1199 = vmatpush.msrb.mxu3 %v3182_v13  ;;  %3821 = vst [vmem:[#allocation22_spill] sm:$0xff] %v3195_v5 }
 0x24b   :  { %1219 = vmatpush.msra.mxu0 %v2779_v22  ;;  %1239 = vmatpush.msra.mxu1 %v2871_v40  ;;  %3822 = vst [vmem:[#allocation23_spill] sm:$0xff] %v3198_v21  ;;  %v3203_v22 = vld [vmem:[#allocation11 + $0x80] sm:$0xff]  ;;  %v3206_v40 = vld [vmem:[#allocation11 + $0x88] sm:$0xff] }
 0x24c   :  { %1180 = vmatpush.msrb.mxu2 %v3187_v18  ;;  %1200 = vmatpush.msrb.mxu3 %v3190_v47  ;;  %3823 = vst [vmem:[#allocation24_spill] sm:$0xff] %v3203_v22 }
 0x24d   :  { %1220 = vmatpush.msra.mxu0 %v2785_v25  ;;  %1240 = vmatpush.msra.mxu1 %v2877_v33  ;;  %3824 = vst [vmem:[#allocation25_spill] sm:$0xff] %v3206_v40  ;;  %v3211_v25 = vld [vmem:[#allocation11 + $0x60] sm:$0xff]  ;;  %v3214_v33 = vld [vmem:[#allocation11 + $0x68] sm:$0xff] }
 0x24e   :  { %1181 = vmatpush.msrb.mxu2 %v3195_v5  ;;  %1201 = vmatpush.msrb.mxu3 %v3198_v21  ;;  %3825 = vst [vmem:[#allocation26_spill] sm:$0xff] %v3211_v25 }
 0x24f   :  { %1221 = vmatpush.msra.mxu0 %v2790_v29  ;;  %1241 = vmatpush.msra.mxu1 %v2882_v57  ;;  %3826 = vst [vmem:[#allocation27_spill] sm:$0xff] %v3214_v33  ;;  %v3219_v29 = vld [vmem:[#allocation11 + $0x40] sm:$0xff]  ;;  %v3222_v57 = vld [vmem:[#allocation11 + $0x48] sm:$0xff] }
 0x250   :  { %1182 = vmatpush.msrb.mxu2 %v3203_v22  ;;  %1202 = vmatpush.msrb.mxu3 %v3206_v40  ;;  %3827 = vst [vmem:[#allocation28_spill] sm:$0xff] %v3219_v29 }
 0x251   :  { %1222 = vmatpush.msra.mxu0 %v2795_v32  ;;  %1242 = vmatpush.msra.mxu1 %v2888_v60  ;;  %3828 = vst [vmem:[#allocation35_spill] sm:$0xff] %v3222_v57  ;;  %v3227_v32 = vld [vmem:[#allocation11 + $0x20] sm:$0xff]  ;;  %v3230_v60 = vld [vmem:[#allocation11 + $0x28] sm:$0xff] }
 0x252   :  { %1183 = vmatpush.msrb.mxu2 %v3211_v25  ;;  %1203 = vmatpush.msrb.mxu3 %v3214_v33  ;;  %3829 = vst [vmem:[#allocation40_spill] sm:$0xff] %v3227_v32 }
 0x253   :  { %1223 = vmatpush.msra.mxu0 %v3803_v31  ;;  %1243 = vmatpush.msra.mxu1 %v3804_v34  ;;  %3830 = vst [vmem:[#allocation29_spill] sm:$0xff] %v3230_v60  ;;  %v3235_v31 = vld [vmem:[#allocation11] sm:$0xff]  ;;  %v3238_v34 = vld [vmem:[#allocation11 + $0x8] sm:$0xff] }
 0x254   :  { %1184 = vmatpush.msrb.mxu2 %v3219_v29  ;;  %1204 = vmatpush.msrb.mxu3 %v3222_v57  ;;  %3831 = vst [vmem:[#allocation30_spill] sm:$0xff] %v3235_v31 }
 0x255   :  { %1224 = vmatpush.msra.mxu0 %v3807_v39  ;;  %1244 = vmatpush.msra.mxu1 %v3808_v42  ;;  %3832 = vst [vmem:[#allocation36_spill] sm:$0xff] %v3238_v34 }
 0x256   :  { %1185 = vmatpush.msrb.mxu2 %v3227_v32  ;;  %1205 = vmatpush.msrb.mxu3 %v3230_v60 }
 0x257   :  { %1225 = vmatpush.msra.mxu0 %v3811_v46  ;;  %1245 = vmatpush.msra.mxu1 %v3812_v49 }
 0x258   :  { %1186 = vmatpush.msrb.mxu2 %v3235_v31  ;;  %1206 = vmatpush.msrb.mxu3 %v3238_v34 }
 0x259   :  { %1226 = vmatpush.msra.mxu0 %v3815_v51  ;;  %1246 = vmatpush.msra.mxu1 %v3816_v58 }
 0x2b6   :  { %v896_v39 = vpop.f32.mrf.mxu1  ;;  %v876_v52 = vpop.f32.mrf.mxu0 }
 0x2b7   :  { %v906_v42 = vrot.slane %v896_v39, 4  ;;  %v905_v4 = vrot.slane %v876_v52, 4 }
 0x2b9   :  { %v914_v2 = vadd.f32 %v906_v42, %v818_v55  ;;  %v913_v42 = vadd.f32 %v905_v4, %v817_v20 }
 0x2bb   :  { %v2100_v8 = vmul.f32 -1.442695, %v914_v2  ;;  %v836_v46 = vpop.f32.mrf.mxu2  ;;  %v856_v12 = vpop.f32.mrf.mxu3 }
 0x2bc   :  { %v903_v49 = vrot.slane %v836_v46, 4  ;;  %v904_v30 = vrot.slane %v856_v12, 4 }
 0x2bd   :  { %2169 = vpow2.f32 %v2100_v8 }
 0x2be   :  { %v911_v54 = vadd.f32 %v903_v49, %v815_v38  ;;  %v912_v26 = vadd.f32 %v904_v30, %v816_v45 }
 0x2c0   :  { %v2098_v3 = vmul.f32 -1.442695, %v911_v54  ;;  %v2099_v11 = vmul.f32 -1.442695, %v912_v26 }
 0x2c2   :  { %2171 = vpow2.f32 %v2098_v3 }
 0x2c3   :  { %v2170_v51 = vpop.eup %2169  ;;  %2173 = vpow2.f32 %v2099_v11 }
 0x2c4   :  { %v957_v58 = vadd.f32 1.0, %v2170_v51 }
 0x2c6   :  { %2175 = vrcp.f32 %v957_v58  ;;  %vm963_vm7 = vweird.f32 %v957_v58 }
 0x2c8   :  { %v2172_v63 = vpop.eup %2171 }
 0x2c9   :  { %v2174_v43 = vpop.eup %2173  ;;  %v918_v50 = vadd.f32 1.0, %v2172_v63 }
 0x2ca   :  { %v937_v15 = vadd.f32 1.0, %v2174_v43 }
 0x2cb   :  { %2177 = vrcp.f32 %v918_v50  ;;  %v930_v49 = vand.u32 2147483648, %v918_v50  ;;  %v928_v45 = vand.u32 2147483647, %v918_v50  ;;  %vm924_vm0 = vweird.f32 %v918_v50 }
 0x2cc   :  { %2179 = vrcp.f32 %v937_v15  ;;  %v2176_v41 = vpop.eup %2175  ;;  %v949_v54 = vand.u32 2147483648, %v937_v15  ;;  %v947_v26 = vand.u32 2147483647, %v937_v15  ;;  %vm943_vm2 = vweird.f32 %v937_v15 }
 0x2cd   :  { %v959_v46 = vmul.f32 %v2176_v41, %v957_v58  ;;  %2181 = vtanh.f32 %v913_v42  ;;  %v931_v51 = vor.u32 1.1754944e-38, %v930_v49  ;;  %vm929_vm3 = vcmp.eq.f32.partialorder %v928_v45, 8.507059e+37 }
 0x2ce   :  { %v950_v52 = vor.u32 1.1754944e-38, %v949_v54  ;;  %vm948_vm5 = vcmp.eq.f32.partialorder %v947_v26, 8.507059e+37  ;;  %v974_v42 = vrot.slane %v3102_v7, 6  ;;  %vm964_vm6 = vweird.f32 %v2176_v41 }
 0x2cf   :  { %v960_v3 = vsub.f32 1.0, %v959_v46  ;;  %v969_v49 = vand.u32 2147483648, %v957_v58  ;;  %vm965_vm8 = vmor %vm963_vm7, %vm964_vm6 }
 0x2d1   :  { %v2178_v39 = vpop.eup %2177 }
 0x2d2   :  { %v2180_v55 = vpop.eup %2179  ;;  %v920_v2 = vmul.f32 %v2178_v39, %v918_v50  ;;  %vm925_vm14 = vweird.f32 %v2178_v39 }
 0x2d3   :  { %v939_v8 = vmul.f32 %v2180_v55, %v937_v15  ;;  %vm944_vm15 = vweird.f32 %v2180_v55  ;;  %vm926_vm1 = vmor %vm924_vm0, %vm925_vm14  ;;  %v2182_v4 = vpop.eup %2181  ;;  %v967_v15 = vand.u32 2147483647, %v957_v58  ;;  %v3255_v58 = vld [vmem:[#allocation11 + $0x1f8] sm:$0xff] }
 0x2d4   :  { %v921_v12 = vsub.f32 1.0, %v920_v2  ;;  %vm945_vm4 = vmor %vm943_vm2, %vm944_vm15  ;;  %v961_v2 = vmul.f32 %v2176_v41, %v960_v3  ;;  %v3269_v3 = vld [vmem:[#allocation11 + $0x1b8] sm:$0xff] }
 0x2d5   :  { %v940_v30 = vsub.f32 1.0, %v939_v8  ;;  %vm968_vm9 = vcmp.eq.f32.partialorder %v967_v15, 8.507059e+37  ;;  %v3333_v15 = vld [vmem:[#allocation11 + $0xb8] sm:$0xff] }
 0x2d6   :  { %v922_v38 = vmul.f32 %v2178_v39, %v921_v12  ;;  %v962_v50 = vadd.f32 %v2176_v41, %v961_v2  ;;  %v3309_v2 = vld [vmem:[#allocation11 + $0x118] sm:$0xff]  ;;  %3836 = vst [vmem:[#allocation37_spill] sm:$0xff] %v3333_v15 }
 0x2d7   :  { %v941_v61 = vmul.f32 %v2180_v55, %v940_v30 }
 0x2d8   :  { %v923_v11 = vadd.f32 %v2178_v39, %v922_v38  ;;  %v970_v38 = vor.u32 1.1754944e-38, %v969_v49  ;;  %v3330_v49 = vld [vmem:[#allocation11 + $0xb0] sm:$0xff] }
 0x2d9   :  { %v942_v63 = vadd.f32 %v2180_v55, %v941_v61  ;;  %3835 = vst [vmem:[#allocation32_spill] sm:$0xff] %v3330_v49 }
 0x2da   :  { %v927_v43 = vsel %vm926_vm1, %v2178_v39, %v923_v11  ;;  %v966_v39 = vsel %vm965_vm8, %v2176_v41, %v962_v50  ;;  %v3266_v41 = vld [vmem:[#allocation11 + $0x1b0] sm:$0xff]  ;;  %v3325_v50 = vld [vmem:[#allocation11 + $0xd8] sm:$0xff] }
 0x2db   :  { %v932_v44 = vsel %vm929_vm3, %v931_v51, %v927_v43  ;;  %v946_v20 = vsel %vm945_vm4, %v2180_v55, %v942_v63  ;;  %v985_v55 = vpop.permute.xlu1 %984  ;;  %v971_v7 = vsel %vm968_vm9, %v970_v38, %v966_v39  ;;  %v3274_v11 = vld [vmem:[#allocation11 + $0x190] sm:$0xff]  ;;  %v3277_v51 = vld [vmem:[#allocation11 + $0x198] sm:$0xff]  ;;  %3834 = vst [vmem:[#allocation31_spill] sm:$0xff] %v3325_v50 }
 0x2dc   :  { %v977_v8 = vmul.f32 %v2182_v4, %v932_v44  ;;  %v951_v12 = vsel %vm948_vm5, %v950_v52, %v946_v20  ;;  %vm986_vm10 = vcmp.eq.s32.totalorder %v985_v55, 1  ;;  %v3282_v63 = vld [vmem:[#allocation11 + $0x170] sm:$0xff]  ;;  %v3285_v43 = vld [vmem:[#allocation11 + $0x178] sm:$0xff] }
 0x2dd   :  { %v976_v46 = vmul.f32 %v974_v42, %v951_v12  ;;  %v3290_v52 = vld [vmem:[#allocation11 + $0x150] sm:$0xff]  ;;  %v3293_v4 = vld [vmem:[#allocation11 + $0x158] sm:$0xff] }
 0x2de   :  { %v3298_v44 = vld [vmem:[#allocation11 + $0x130] sm:$0xff]  ;;  %v3301_v20 = vld [vmem:[#allocation11 + $0x138] sm:$0xff] }
 0x2df   :  { %v3246_v30 = vadd.f32 %v977_v8, %v976_v46  ;;  %v3306_v42 = vld [vmem:[#allocation11 + $0x110] sm:$0xff]  ;;  %v3317_v12 = vld [vmem:[#allocation11 + $0xf8] sm:$0xff] }
 0x2e0   :  { %v3314_v8 = vld [vmem:[#allocation11 + $0xf0] sm:$0xff]  ;;  %v3341_v38 = vld [vmem:[#allocation11 + $0x98] sm:$0xff] }
 0x2e1   :  { %2183 = vtanh.f32 %v3246_v30  ;;  %v3322_v46 = vld [vmem:[#allocation11 + $0xd0] sm:$0xff]  ;;  %3838 = vst [vmem:[#allocation33_spill] sm:$0xff] %v3341_v38 }
 0x2e2   :  { %3833 = vst [vmem:[#allocation41_spill] sm:$0xff] %v3322_v46  ;;  %v3338_v39 = vld [vmem:[#allocation11 + $0x90] sm:$0xff] }
 0x2e3   :  { %3837 = vst [vmem:[#allocation42_spill] sm:$0xff] %v3338_v39  ;;  %v3346_v55 = vld [vmem:[#allocation11 + $0x70] sm:$0xff] }
 0x2e4   :  { %3839 = vst [vmem:[#allocation34_spill] sm:$0xff] %v3346_v55 }
 0x2e7   :  { %v2184_v45 = vpop.eup %2183 }
 0x2e8   :  { %v980_v54 = vmul.f32 %v2184_v45, %v971_v7  ;;  %v3349_v45 = vld [vmem:[#allocation11 + $0x78] sm:$0xff]  ;;  %v3354_v7 = vld [vmem:[#allocation11 + $0x50] sm:$0xff] }
 0x2e9   :  { %3840 = vst [vmem:[#allocation38_spill] sm:$0xff] %v3349_v45 }
 0x2ea   :  { %v988_v61 = vrot.slane %v980_v54, 4  ;;  %3841 = vst [vmem:[#allocation43_spill] sm:$0xff] %v3354_v7  ;;  %v3357_v54 = vld [vmem:[#allocation11 + $0x58] sm:$0xff] }
 0x2eb   :  { %3842 = vst [vmem:[#allocation39_spill] sm:$0xff] %v3357_v54 }
 0x2ec   :  { %v3250_v26 = vsel %vm986_vm10, %v988_v61, %v3109_v62  ;;  %1011 = vmatmul.f32.vlgmr.msra.gmra.mxu2 %v988_v61  ;;  %1031 = vmatmul.f32.vlgmr.msra.gmra.mxu3 %v988_v61  ;;  %v3261_v62 = vld [vmem:[#allocation11 + $0x1d8] sm:$0xff] }
 0x2ed   :  { %1051 = vmatmul.f32.vlgmr.msrb.gmra.mxu0 %v988_v61  ;;  %1071 = vmatmul.f32.vlgmr.msrb.gmra.mxu1 %v988_v61  ;;  %v3362_v61 = vld [vmem:[#allocation11 + $0x30] sm:$0xff] }
 0x2ee   :  { %1332 = vmatpush.msra.mxu2 %v3111_v36  ;;  %1352 = vmatpush.msra.mxu3 %v3114_v35  ;;  %3843 = vst [vmem:[#allocation47_spill] sm:$0xff] %v3362_v61 }
 0x2ef   :  { %1372 = vmatpush.msrb.mxu0 %v3117_v24  ;;  %1392 = vmatpush.msrb.mxu1 %v3255_v58 }
 0x2f0   :  { %1333 = vmatpush.msra.mxu2 %v3121_v23  ;;  %1353 = vmatpush.msra.mxu3 %v3124_v16 }
 0x2f1   :  { %1373 = vmatpush.msrb.mxu0 %v3127_v19  ;;  %1393 = vmatpush.msrb.mxu1 %v3261_v62 }
 0x2f2   :  { %1334 = vmatpush.msra.mxu2 %v3131_v37  ;;  %1354 = vmatpush.msra.mxu3 %v3134_v59 }
 0x2f3   :  { %1374 = vmatpush.msrb.mxu0 %v3266_v41  ;;  %1394 = vmatpush.msrb.mxu1 %v3269_v3 }
 0x2f4   :  { %1335 = vmatpush.msra.mxu2 %v3139_v48  ;;  %1355 = vmatpush.msra.mxu3 %v3142_v27 }
 0x2f5   :  { %1375 = vmatpush.msrb.mxu0 %v3274_v11  ;;  %1395 = vmatpush.msrb.mxu1 %v3277_v51 }
 0x2f6   :  { %1336 = vmatpush.msra.mxu2 %v3147_v53  ;;  %1356 = vmatpush.msra.mxu3 %v3150_v28 }
 0x2f7   :  { %1376 = vmatpush.msrb.mxu0 %v3282_v63  ;;  %1396 = vmatpush.msrb.mxu1 %v3285_v43 }
 0x2f8   :  { %1337 = vmatpush.msra.mxu2 %v3155_v6  ;;  %1357 = vmatpush.msra.mxu3 %v3158_v56 }
 0x2f9   :  { %1377 = vmatpush.msrb.mxu0 %v3290_v52  ;;  %1397 = vmatpush.msrb.mxu1 %v3293_v4 }
 0x2fa   :  { %1338 = vmatpush.msra.mxu2 %v3163_v10  ;;  %1358 = vmatpush.msra.mxu3 %v3166_v0 }
 0x2fb   :  { %1378 = vmatpush.msrb.mxu0 %v3298_v44  ;;  %1398 = vmatpush.msrb.mxu1 %v3301_v20 }
 0x2fc   :  { %1339 = vmatpush.msra.mxu2 %v3171_v14  ;;  %1359 = vmatpush.msra.mxu3 %v3174_v9 }
 0x2fd   :  { %1379 = vmatpush.msrb.mxu0 %v3306_v42  ;;  %1399 = vmatpush.msrb.mxu1 %v3309_v2 }
 0x2fe   :  { %1340 = vmatpush.msra.mxu2 %v3179_v17  ;;  %1360 = vmatpush.msra.mxu3 %v3182_v13 }
 0x2ff   :  { %1380 = vmatpush.msrb.mxu0 %v3314_v8  ;;  %1400 = vmatpush.msrb.mxu1 %v3317_v12 }
 0x300   :  { %1341 = vmatpush.msra.mxu2 %v3187_v18  ;;  %1361 = vmatpush.msra.mxu3 %v3190_v47 }
 0x301   :  { %1381 = vmatpush.msrb.mxu0 %v3322_v46  ;;  %1401 = vmatpush.msrb.mxu1 %v3325_v50  ;;  %v1150_v46 = vrot.slane %v3246_v30, 6 }
 0x302   :  { %1342 = vmatpush.msra.mxu2 %v3195_v5  ;;  %1362 = vmatpush.msra.mxu3 %v3198_v21 }
 0x303   :  { %1382 = vmatpush.msrb.mxu0 %v3330_v49  ;;  %1402 = vmatpush.msrb.mxu1 %v3333_v15 }
 0x304   :  { %1343 = vmatpush.msra.mxu2 %v3203_v22  ;;  %1363 = vmatpush.msra.mxu3 %v3206_v40 }
 0x305   :  { %1383 = vmatpush.msrb.mxu0 %v3338_v39  ;;  %1403 = vmatpush.msrb.mxu1 %v3341_v38 }
 0x306   :  { %1344 = vmatpush.msra.mxu2 %v3211_v25  ;;  %1364 = vmatpush.msra.mxu3 %v3214_v33 }
 0x307   :  { %1384 = vmatpush.msrb.mxu0 %v3346_v55  ;;  %1404 = vmatpush.msrb.mxu1 %v3349_v45  ;;  %v3365_v45 = vld [vmem:[#allocation11 + $0x38] sm:$0xff] }
 0x308   :  { %1345 = vmatpush.msra.mxu2 %v3219_v29  ;;  %1365 = vmatpush.msra.mxu3 %v3222_v57  ;;  %3844 = vst [vmem:[#allocation48_spill] sm:$0xff] %v3365_v45  ;;  %v994_v57 = vld [vmem:[#allocation2 + $0x10] sm:$0xc0] }
 0x309   :  { %1385 = vmatpush.msrb.mxu0 %v3354_v7  ;;  %1405 = vmatpush.msrb.mxu1 %v3357_v54  ;;  %v3370_v7 = vld [vmem:[#allocation11 + $0x10] sm:$0xff]  ;;  %v3373_v54 = vld [vmem:[#allocation11 + $0x18] sm:$0xff] }
 0x30a   :  { %1346 = vmatpush.msra.mxu2 %v3227_v32  ;;  %1366 = vmatpush.msra.mxu3 %v3230_v60  ;;  %3845 = vst [vmem:[#allocation49_spill] sm:$0xff] %v3370_v7 }
 0x30b   :  { %1386 = vmatpush.msrb.mxu0 %v3362_v61  ;;  %1406 = vmatpush.msrb.mxu1 %v3365_v45  ;;  %3846 = vst [vmem:[#allocation50_spill] sm:$0xff] %v3373_v54 }
 0x30c   :  { %1347 = vmatpush.msra.mxu2 %v3235_v31  ;;  %1367 = vmatpush.msra.mxu3 %v3238_v34  ;;  %v991_v31 = vld [vmem:[#allocation2 + $0x30] sm:$0xc0]  ;;  %v992_v34 = vld [vmem:[#allocation2] sm:$0xc0] }
 0x30d   :  { %1387 = vmatpush.msrb.mxu0 %v3370_v7  ;;  %1407 = vmatpush.msrb.mxu1 %v3373_v54 }
 0x36a   :  { %v1072_v60 = vpop.f32.mrf.mxu1 }
 0x36b   :  { %v1082_v32 = vrot.slane %v1072_v60, 2 }
 0x36d   :  { %v1090_v61 = vadd.f32 %v1082_v32, %v994_v57  ;;  %v1052_v32 = vpop.f32.mrf.mxu0 }
 0x36f   :  { %v2103_v29 = vmul.f32 -1.442695, %v1090_v61  ;;  %v1012_v55 = vpop.f32.mrf.mxu2  ;;  %v1032_v33 = vpop.f32.mrf.mxu3 }
 0x370   :  { %v1079_v45 = vrot.slane %v1012_v55, 2  ;;  %v1080_v25 = vrot.slane %v1032_v33, 2  ;;  %v1081_v33 = vrot.slane %v1052_v32, 2 }
 0x371   :  { %2185 = vpow2.f32 %v2103_v29  ;;  %v993_v29 = vld [vmem:[#allocation2 + $0x18] sm:$0xc0] }
 0x372   :  { %v1087_v38 = vadd.f32 %v1079_v45, %v991_v31  ;;  %v1088_v39 = vadd.f32 %v1080_v25, %v992_v34  ;;  %v3382_v25 = vld [vmem:[%s3649_s2] sm:$0x3]  ;;  %v1089_v34 = vadd.f32 %v1081_v33, %v993_v29 }
 0x373   :  { %3847 = vst [vmem:[#allocation51_spill] sm:$0xff] %v3382_v25  ;;  %vm1321_vm11 = vcmp.eq.s32.totalorder %v3382_v25, 5 }
 0x374   :  { %v2101_v40 = vmul.f32 -1.442695, %v1087_v38  ;;  %v2102_v7 = vmul.f32 -1.442695, %v1088_v39 }
 0x376   :  { %2187 = vpow2.f32 %v2101_v40 }
 0x377   :  { %v2186_v22 = vpop.eup %2185  ;;  %2189 = vpow2.f32 %v2102_v7 }
 0x378   :  { %v3376_v54 = vadd.f32 1.0, %v2186_v22  ;;  %v1322_v22 = vsel %vm1321_vm11, 1, %v3818_v1 }
 0x379   :  { %1324 = vperm.xlu2 %2133, %v1322_v22  }
 0x37a   :  { %2191 = vrcp.f32 %v3376_v54  ;;  %vm1139_vm5 = vweird.f32 %v3376_v54 }
 0x37c   :  { %v2188_v60 = vpop.eup %2187 }
 0x37d   :  { %v2190_v15 = vpop.eup %2189  ;;  %v1094_v57 = vadd.f32 1.0, %v2188_v60 }
 0x37e   :  { %v1113_v55 = vadd.f32 1.0, %v2190_v15 }
 0x37f   :  { %2193 = vrcp.f32 %v1094_v57  ;;  %v1106_v61 = vand.u32 2147483648, %v1094_v57  ;;  %v1104_v49 = vand.u32 2147483647, %v1094_v57  ;;  %vm1100_vm14 = vweird.f32 %v1094_v57 }
 0x380   :  { %2195 = vrcp.f32 %v1113_v55  ;;  %v2192_v40 = vpop.eup %2191  ;;  %v1125_v25 = vand.u32 2147483648, %v1113_v55  ;;  %v1123_v1 = vand.u32 2147483647, %v1113_v55  ;;  %vm1119_vm0 = vweird.f32 %v1113_v55 }
 0x381   :  { %v1135_v45 = vmul.f32 %v2192_v40, %v3376_v54  ;;  %2197 = vtanh.f32 %v1089_v34  ;;  %v1107_v33 = vor.u32 1.1754944e-38, %v1106_v61  ;;  %vm1105_vm1 = vcmp.eq.f32.partialorder %v1104_v49, 8.507059e+37  ;;  %v3854_v61 = vld [vmem:[#allocation32_spill] sm:$0xff] }
 0x382   :  { %v1126_v34 = vor.u32 1.1754944e-38, %v1125_v25  ;;  %vm1124_vm3 = vcmp.eq.f32.partialorder %v1123_v1, 8.507059e+37  ;;  %vm1140_vm4 = vweird.f32 %v2192_v40  ;;  %v3850_v25 = vld [vmem:[#allocation41_spill] sm:$0xff] }
 0x383   :  { %v1136_v5 = vsub.f32 1.0, %v1135_v45  ;;  %vm1141_vm6 = vmor %vm1139_vm5, %vm1140_vm4 }
 0x385   :  { %v2194_v31 = vpop.eup %2193 }
 0x386   :  { %v2196_v39 = vpop.eup %2195  ;;  %v1096_v38 = vmul.f32 %v2194_v31, %v1094_v57  ;;  %vm1101_vm12 = vweird.f32 %v2194_v31 }
 0x387   :  { %v1115_v15 = vmul.f32 %v2196_v39, %v1113_v55  ;;  %vm1120_vm13 = vweird.f32 %v2196_v39  ;;  %vm1102_vm15 = vmor %vm1100_vm14, %vm1101_vm12 }
 0x388   :  { %v1097_v7 = vsub.f32 1.0, %v1096_v38  ;;  %vm1121_vm2 = vmor %vm1119_vm0, %vm1120_vm13  ;;  %v2198_v38 = vpop.eup %2197 }
 0x389   :  { %v1116_v60 = vsub.f32 1.0, %v1115_v15 }
 0x38a   :  { %v1098_v32 = vmul.f32 %v2194_v31, %v1097_v7 }
 0x38b   :  { %v1117_v21 = vmul.f32 %v2196_v39, %v1116_v60  ;;  %v1137_v60 = vmul.f32 %v2192_v40, %v1136_v5  ;;  %v1161_v5 = vpop.permute.xlu1 %1160 }
 0x38c   :  { %v1099_v22 = vadd.f32 %v2194_v31, %v1098_v32  ;;  %vm1162_vm8 = vcmp.eq.s32.totalorder %v1161_v5, 1  ;;  %v3869_v5 = vld [vmem:[#allocation29_spill] sm:$0xff] }
 0x38d   :  { %v1118_v29 = vadd.f32 %v2196_v39, %v1117_v21  ;;  %v1138_v57 = vadd.f32 %v2192_v40, %v1137_v60  ;;  %v1145_v21 = vand.u32 2147483648, %v3376_v54  ;;  %v3862_v60 = vld [vmem:[#allocation34_spill] sm:$0xff] }
 0x38e   :  { %v1103_v50 = vsel %vm1102_vm15, %v2194_v31, %v1099_v22  ;;  %v3852_v31 = vld [vmem:[#allocation22_spill] sm:$0xff]  ;;  %v3855_v22 = vld [vmem:[#allocation37_spill] sm:$0xff] }
 0x38f   :  { %v1108_v15 = vsel %vm1105_vm1, %v1107_v33, %v1103_v50  ;;  %v1122_v7 = vsel %vm1121_vm2, %v2196_v39, %v1118_v29  ;;  %v1143_v50 = vand.u32 2147483647, %v3376_v54  ;;  %v1142_v1 = vsel %vm1141_vm6, %v2192_v40, %v1138_v57  ;;  %v3849_v54 = vld [vmem:[#allocation21_spill] sm:$0xff]  ;;  %v3851_v40 = vld [vmem:[#allocation31_spill] sm:$0xff]  ;;  %v3856_v33 = vld [vmem:[#allocation24_spill] sm:$0xff] }
 0x390   :  { %v1153_v47 = vmul.f32 %v2198_v38, %v1108_v15  ;;  %v1127_v18 = vsel %vm1124_vm3, %v1126_v34, %v1122_v7  ;;  %v1146_v49 = vor.u32 1.1754944e-38, %v1145_v21  ;;  %v3853_v39 = vld [vmem:[#allocation23_spill] sm:$0xff]  ;;  %v3857_v29 = vld [vmem:[#allocation25_spill] sm:$0xff]  ;;  %v3858_v34 = vld [vmem:[#allocation42_spill] sm:$0xff] }
 0x391   :  { %v1152_v45 = vmul.f32 %v1150_v46, %v1127_v18  ;;  %vm1144_vm7 = vcmp.eq.f32.partialorder %v1143_v50, 8.507059e+37  ;;  %v3859_v38 = vld [vmem:[#allocation33_spill] sm:$0xff]  ;;  %v3860_v15 = vld [vmem:[#allocation26_spill] sm:$0xff]  ;;  %v3861_v7 = vld [vmem:[#allocation27_spill] sm:$0xff] }
 0x392   :  { %v1147_v55 = vsel %vm1144_vm7, %v1146_v49, %v1142_v1  ;;  %v3864_v57 = vld [vmem:[#allocation28_spill] sm:$0xff]  ;;  %v3865_v21 = vld [vmem:[#allocation35_spill] sm:$0xff] }
 0x393   :  { %v3388_v32 = vadd.f32 %v1153_v47, %v1152_v45  ;;  %v3863_v45 = vld [vmem:[#allocation38_spill] sm:$0xff]  ;;  %v3866_v50 = vld [vmem:[#allocation43_spill] sm:$0xff]  ;;  %v3868_v49 = vld [vmem:[#allocation40_spill] sm:$0xff] }
 0x394   :  { %v3867_v1 = vld [vmem:[#allocation39_spill] sm:$0xff] }
 0x395   :  { %2199 = vtanh.f32 %v3388_v32 }
 0x39b   :  { %v2200_v30 = vpop.eup %2199 }
 0x39c   :  { %v1156_v18 = vmul.f32 %v2200_v30, %v1147_v55  ;;  %v3870_v30 = vld [vmem:[#allocation47_spill] sm:$0xff]  ;;  %v3871_v55 = vld [vmem:[#allocation48_spill] sm:$0xff] }
 0x39e   :  { %v1164_v47 = vrot.slane %v1156_v18, 6  ;;  %v3872_v18 = vld [vmem:[#allocation30_spill] sm:$0xff] }
 0x3a0   :  { %v3395_v46 = vsel %vm1162_vm8, %v1164_v47, %v3250_v26  ;;  %1187 = vmatmul.f32.vlgmr.msrb.gmra.mxu2 %v1164_v47  ;;  %1207 = vmatmul.f32.vlgmr.msrb.gmra.mxu3 %v1164_v47  ;;  %v3848_v26 = vld [vmem:[#allocation20_spill] sm:$0xff] }
 0x3a1   :  { %1227 = vmatmul.f32.vlgmr.msra.gmra.mxu0 %v1164_v47  ;;  %1247 = vmatmul.f32.vlgmr.msra.gmra.mxu1 %v1164_v47  ;;  %v3873_v47 = vld [vmem:[#allocation36_spill] sm:$0xff] }
 0x3a2   :  { %1508 = vmatpush.msrb.mxu2 %v3111_v36  ;;  %1528 = vmatpush.msrb.mxu3 %v3114_v35 }
 0x3a3   :  { %1548 = vmatpush.msra.mxu0 %v3117_v24  ;;  %1568 = vmatpush.msra.mxu1 %v3255_v58 }
 0x3a4   :  { %1509 = vmatpush.msrb.mxu2 %v3121_v23  ;;  %1529 = vmatpush.msrb.mxu3 %v3124_v16 }
 0x3a5   :  { %1549 = vmatpush.msra.mxu0 %v3127_v19  ;;  %1569 = vmatpush.msra.mxu1 %v3261_v62 }
 0x3a6   :  { %1510 = vmatpush.msrb.mxu2 %v3131_v37  ;;  %1530 = vmatpush.msrb.mxu3 %v3134_v59 }
 0x3a7   :  { %1550 = vmatpush.msra.mxu0 %v3266_v41  ;;  %1570 = vmatpush.msra.mxu1 %v3269_v3 }
 0x3a8   :  { %1511 = vmatpush.msrb.mxu2 %v3139_v48  ;;  %1531 = vmatpush.msrb.mxu3 %v3142_v27 }
 0x3a9   :  { %1551 = vmatpush.msra.mxu0 %v3274_v11  ;;  %1571 = vmatpush.msra.mxu1 %v3277_v51 }
 0x3aa   :  { %1512 = vmatpush.msrb.mxu2 %v3147_v53  ;;  %1532 = vmatpush.msrb.mxu3 %v3150_v28 }
 0x3ab   :  { %1552 = vmatpush.msra.mxu0 %v3282_v63  ;;  %1572 = vmatpush.msra.mxu1 %v3285_v43 }
 0x3ac   :  { %1513 = vmatpush.msrb.mxu2 %v3155_v6  ;;  %1533 = vmatpush.msrb.mxu3 %v3158_v56 }
 0x3ad   :  { %1553 = vmatpush.msra.mxu0 %v3290_v52  ;;  %1573 = vmatpush.msra.mxu1 %v3293_v4 }
 0x3ae   :  { %1514 = vmatpush.msrb.mxu2 %v3163_v10  ;;  %1534 = vmatpush.msrb.mxu3 %v3166_v0 }
 0x3af   :  { %1554 = vmatpush.msra.mxu0 %v3298_v44  ;;  %1574 = vmatpush.msra.mxu1 %v3301_v20 }
 0x3b0   :  { %1515 = vmatpush.msrb.mxu2 %v3171_v14  ;;  %1535 = vmatpush.msrb.mxu3 %v3174_v9 }
 0x3b1   :  { %1555 = vmatpush.msra.mxu0 %v3306_v42  ;;  %1575 = vmatpush.msra.mxu1 %v3309_v2 }
 0x3b2   :  { %1516 = vmatpush.msrb.mxu2 %v3179_v17  ;;  %1536 = vmatpush.msrb.mxu3 %v3182_v13 }
 0x3b3   :  { %1556 = vmatpush.msra.mxu0 %v3314_v8  ;;  %1576 = vmatpush.msra.mxu1 %v3317_v12 }
 0x3b4   :  { %1517 = vmatpush.msrb.mxu2 %v3848_v26  ;;  %1537 = vmatpush.msrb.mxu3 %v3849_v54 }
 0x3b5   :  { %1557 = vmatpush.msra.mxu0 %v3850_v25  ;;  %1577 = vmatpush.msra.mxu1 %v3851_v40  ;;  %v1314_v25 = vrot.slane %v3388_v32, 6 }
 0x3b6   :  { %1518 = vmatpush.msrb.mxu2 %v3852_v31  ;;  %1538 = vmatpush.msrb.mxu3 %v3853_v39 }
 0x3b7   :  { %1558 = vmatpush.msra.mxu0 %v3854_v61  ;;  %1578 = vmatpush.msra.mxu1 %v3855_v22 }
 0x3b8   :  { %1519 = vmatpush.msrb.mxu2 %v3856_v33  ;;  %1539 = vmatpush.msrb.mxu3 %v3857_v29 }
 0x3b9   :  { %1559 = vmatpush.msra.mxu0 %v3858_v34  ;;  %1579 = vmatpush.msra.mxu1 %v3859_v38 }
 0x3ba   :  { %1520 = vmatpush.msrb.mxu2 %v3860_v15  ;;  %1540 = vmatpush.msrb.mxu3 %v3861_v7 }
 0x3bb   :  { %1560 = vmatpush.msra.mxu0 %v3862_v60  ;;  %1580 = vmatpush.msra.mxu1 %v3863_v45  ;;  %v3874_v45 = vld [vmem:[#allocation49_spill] sm:$0xff] }
 0x3bc   :  { %1521 = vmatpush.msrb.mxu2 %v3864_v57  ;;  %1541 = vmatpush.msrb.mxu3 %v3865_v21  ;;  %v3875_v57 = vld [vmem:[#allocation50_spill] sm:$0xff]  ;;  %v1170_v21 = vld [vmem:[#allocation2 + $0x38] sm:$0x3] }
 0x3bd   :  { %1561 = vmatpush.msra.mxu0 %v3866_v50  ;;  %1581 = vmatpush.msra.mxu1 %v3867_v1 }
 0x3be   :  { %1522 = vmatpush.msrb.mxu2 %v3868_v49  ;;  %1542 = vmatpush.msrb.mxu3 %v3869_v5  ;;  %v1167_v49 = vld [vmem:[#allocation2 + $0x8] sm:$0x3]  ;;  %v1168_v5 = vld [vmem:[#allocation2 + $0x20] sm:$0x3] }
 0x3bf   :  { %1562 = vmatpush.msra.mxu0 %v3870_v30  ;;  %1582 = vmatpush.msra.mxu1 %v3871_v55 }
 0x3c0   :  { %1523 = vmatpush.msrb.mxu2 %v3872_v18  ;;  %1543 = vmatpush.msrb.mxu3 %v3873_v47 }
 0x3c1   :  { %1563 = vmatpush.msra.mxu0 %v3874_v45  ;;  %1583 = vmatpush.msra.mxu1 %v3875_v57 }
 0x41e   :  { %v1248_v50 = vpop.f32.mrf.mxu1 }
 0x41f   :  { %v1254_v60 = vadd.f32 %v1248_v50, %v1170_v21  ;;  %v3876_v21 = vld [vmem:[#allocation51_spill] sm:$0xff]  ;;  %v3877_v50 = vmov 0  }
 0x420   :  { %vm1494_vm9 = vcmp.eq.s32.totalorder %v3876_v21, 6 }
 0x421   :  { %v2106_v1 = vmul.f32 -1.442695, %v1254_v60  ;;  %v1228_v60 = vpop.f32.mrf.mxu0 }
 0x423   :  { %2201 = vpow2.f32 %v2106_v1  ;;  %v1188_v7 = vpop.f32.mrf.mxu2  ;;  %v1208_v15 = vpop.f32.mrf.mxu3  ;;  %v1495_v1 = vsel %vm1494_vm9, 1, %v3877_v50 }
 0x424   :  { %v1251_v30 = vadd.f32 %v1188_v7, %v1167_v49  ;;  %v1252_v38 = vadd.f32 %v1208_v15, %v1168_v5  ;;  %v1169_v15 = vld [vmem:[#allocation2 + $0x28] sm:$0x3]  ;;  %1497 = vperm.xlu2 %2133, %v1495_v1  }
 0x425   :  { %v1253_v49 = vadd.f32 %v1228_v60, %v1169_v15 }
 0x426   :  { %v2104_v55 = vmul.f32 -1.442695, %v1251_v30  ;;  %v2105_v34 = vmul.f32 -1.442695, %v1252_v38 }
 0x428   :  { %2203 = vpow2.f32 %v2104_v55 }
 0x429   :  { %v2202_v18 = vpop.eup %2201  ;;  %2205 = vpow2.f32 %v2105_v34 }
 0x42a   :  { %v1297_v47 = vadd.f32 1.0, %v2202_v18 }
 0x42c   :  { %2207 = vrcp.f32 %v1297_v47  ;;  %vm1303_vm3 = vweird.f32 %v1297_v47 }
 0x42e   :  { %v2204_v45 = vpop.eup %2203 }
 0x42f   :  { %v2206_v29 = vpop.eup %2205  ;;  %v1258_v57 = vadd.f32 1.0, %v2204_v45 }
 0x430   :  { %v1277_v33 = vadd.f32 1.0, %v2206_v29 }
 0x431   :  { %2209 = vrcp.f32 %v1258_v57  ;;  %v1270_v45 = vand.u32 2147483648, %v1258_v57  ;;  %v1268_v61 = vand.u32 2147483647, %v1258_v57  ;;  %vm1264_vm12 = vweird.f32 %v1258_v57 }
 0x432   :  { %2211 = vrcp.f32 %v1277_v33  ;;  %v2208_v7 = vpop.eup %2207  ;;  %v1289_v39 = vand.u32 2147483648, %v1277_v33  ;;  %v1287_v50 = vand.u32 2147483647, %v1277_v33  ;;  %vm1283_vm14 = vweird.f32 %v1277_v33 }
 0x433   :  { %v1299_v55 = vmul.f32 %v2208_v7, %v1297_v47  ;;  %2213 = vtanh.f32 %v1253_v49  ;;  %v1271_v60 = vor.u32 1.1754944e-38, %v1270_v45  ;;  %vm1269_vm15 = vcmp.eq.f32.partialorder %v1268_v61, 8.507059e+37 }
 0x434   :  { %v1290_v49 = vor.u32 1.1754944e-38, %v1289_v39  ;;  %vm1288_vm1 = vcmp.eq.f32.partialorder %v1287_v50, 8.507059e+37  ;;  %vm1304_vm2 = vweird.f32 %v2208_v7  ;;  %v1325_v39 = vpop.permute.xlu2 %1324 }
 0x435   :  { %v1300_v31 = vsub.f32 1.0, %v1299_v55  ;;  %vm1305_vm4 = vmor %vm1303_vm3, %vm1304_vm2  ;;  %vm1326_vm6 = vcmp.eq.s32.totalorder %v1325_v39, 1 }
 0x437   :  { %v2210_v38 = vpop.eup %2209 }
 0x438   :  { %v2212_v5 = vpop.eup %2211  ;;  %v1260_v34 = vmul.f32 %v2210_v38, %v1258_v57  ;;  %vm1265_vm10 = vweird.f32 %v2210_v38 }
 0x439   :  { %v1279_v30 = vmul.f32 %v2212_v5, %v1277_v33  ;;  %vm1284_vm11 = vweird.f32 %v2212_v5  ;;  %vm1266_vm13 = vmor %vm1264_vm12, %vm1265_vm10 }
 0x43a   :  { %v1261_v18 = vsub.f32 1.0, %v1260_v34  ;;  %vm1285_vm0 = vmor %vm1283_vm14, %vm1284_vm11  ;;  %v2214_v34 = vpop.eup %2213 }
 0x43b   :  { %v1280_v29 = vsub.f32 1.0, %v1279_v30 }
 0x43c   :  { %v1262_v22 = vmul.f32 %v2210_v38, %v1261_v18 }
 0x43d   :  { %v1281_v21 = vmul.f32 %v2212_v5, %v1280_v29  ;;  %v1301_v29 = vmul.f32 %v2208_v7, %v1300_v31 }
 0x43e   :  { %v1263_v40 = vadd.f32 %v2210_v38, %v1262_v22 }
 0x43f   :  { %v1282_v1 = vadd.f32 %v2212_v5, %v1281_v21  ;;  %v1302_v57 = vadd.f32 %v2208_v7, %v1301_v29  ;;  %v1309_v21 = vand.u32 2147483648, %v1297_v47  ;;  %v3906_v29 = vld [vmem:[#allocation51_spill] sm:$0xff] }
 0x440   :  { %v1267_v15 = vsel %vm1266_vm13, %v2210_v38, %v1263_v40  ;;  %v1307_v40 = vand.u32 2147483647, %v1297_v47  ;;  %vm1670_vm7 = vcmp.eq.s32.totalorder %v3906_v29, 7 }
 0x441   :  { %v1272_v30 = vsel %vm1269_vm15, %v1271_v60, %v1267_v15  ;;  %v1286_v18 = vsel %vm1285_vm0, %v2212_v5, %v1282_v1  ;;  %v1306_v61 = vsel %vm1305_vm4, %v2208_v7, %v1302_v57  ;;  %v1310_v33 = vor.u32 1.1754944e-38, %v1309_v21 }
 0x442   :  { %v1317_v54 = vmul.f32 %v2214_v34, %v1272_v30  ;;  %v1291_v26 = vsel %vm1288_vm1, %v1290_v49, %v1286_v18  ;;  %vm1308_vm5 = vcmp.eq.f32.partialorder %v1307_v40, 8.507059e+37  ;;  %v1330_v40 = vld [vmem:[#allocation2 + $0x28] sm:$0xc] }
 0x443   :  { %v1316_v55 = vmul.f32 %v1314_v25, %v1291_v26  ;;  %v1311_v32 = vsel %vm1308_vm5, %v1310_v33, %v1306_v61  ;;  %v1329_v25 = vld [vmem:[#allocation2 + $0x20] sm:$0xc]  ;;  %vm1846_vm5 = vcmp.eq.s32.totalorder %v3906_v29, 8 }
 0x445   :  { %v3464_v22 = vadd.f32 %v1317_v54, %v1316_v55  ;;  %v1328_v54 = vld [vmem:[#allocation2 + $0x8] sm:$0xc]  ;;  %v3907_v55 = vmov 0  }
 0x446   :  { %v1671_v57 = vsel %vm1670_vm7, 1, %v3907_v55 }
 0x447   :  { %2215 = vtanh.f32 %v3464_v22  ;;  %1673 = vperm.xlu0 %2131, %v1671_v57  }
 0x44d   :  { %v2216_v50 = vpop.eup %2215 }
 0x44e   :  { %v1320_v31 = vmul.f32 %v2216_v50, %v1311_v32 }
 0x450   :  { %v3468_v26 = vsel %vm1326_vm6, %v1320_v31, %v3395_v46  ;;  %1348 = vmatmul.f32.vlgmr.msra.gmra.mxu2 %v1320_v31  ;;  %1368 = vmatmul.f32.vlgmr.msra.gmra.mxu3 %v1320_v31 }
 0x451   :  { %1388 = vmatmul.f32.vlgmr.msrb.gmra.mxu0 %v1320_v31  ;;  %1408 = vmatmul.f32.vlgmr.msrb.gmra.mxu1 %v1320_v31 }
 0x452   :  { %1684 = vmatpush.msra.mxu2 %v3111_v36  ;;  %1704 = vmatpush.msra.mxu3 %v3114_v35  ;;  %v3878_v36 = vld [vmem:[#allocation20_spill] sm:$0xff]  ;;  %v3879_v35 = vld [vmem:[#allocation21_spill] sm:$0xff] }
 0x453   :  { %1724 = vmatpush.msrb.mxu0 %v3117_v24  ;;  %1744 = vmatpush.msrb.mxu1 %v3255_v58  ;;  %v3880_v24 = vld [vmem:[#allocation41_spill] sm:$0xff]  ;;  %v3898_v58 = vld [vmem:[#allocation40_spill] sm:$0xff] }
 0x454   :  { %1685 = vmatpush.msra.mxu2 %v3121_v23  ;;  %1705 = vmatpush.msra.mxu3 %v3124_v16  ;;  %v3881_v23 = vld [vmem:[#allocation31_spill] sm:$0xff]  ;;  %v3882_v16 = vld [vmem:[#allocation22_spill] sm:$0xff] }
 0x455   :  { %1725 = vmatpush.msrb.mxu0 %v3127_v19  ;;  %1745 = vmatpush.msrb.mxu1 %v3261_v62  ;;  %v3883_v19 = vld [vmem:[#allocation23_spill] sm:$0xff]  ;;  %v3899_v62 = vld [vmem:[#allocation29_spill] sm:$0xff] }
 0x456   :  { %1686 = vmatpush.msra.mxu2 %v3131_v37  ;;  %1706 = vmatpush.msra.mxu3 %v3134_v59  ;;  %v3884_v37 = vld [vmem:[#allocation32_spill] sm:$0xff]  ;;  %v3885_v59 = vld [vmem:[#allocation37_spill] sm:$0xff] }
 0x457   :  { %1726 = vmatpush.msrb.mxu0 %v3266_v41  ;;  %1746 = vmatpush.msrb.mxu1 %v3269_v3  ;;  %v3900_v41 = vld [vmem:[#allocation47_spill] sm:$0xff]  ;;  %v3901_v3 = vld [vmem:[#allocation48_spill] sm:$0xff] }
 0x458   :  { %1687 = vmatpush.msra.mxu2 %v3139_v48  ;;  %1707 = vmatpush.msra.mxu3 %v3142_v27  ;;  %v3886_v48 = vld [vmem:[#allocation24_spill] sm:$0xff]  ;;  %v3887_v27 = vld [vmem:[#allocation25_spill] sm:$0xff] }
 0x459   :  { %1727 = vmatpush.msrb.mxu0 %v3274_v11  ;;  %1747 = vmatpush.msrb.mxu1 %v3277_v51  ;;  %v3902_v11 = vld [vmem:[#allocation30_spill] sm:$0xff]  ;;  %v3903_v51 = vld [vmem:[#allocation36_spill] sm:$0xff] }
 0x45a   :  { %1688 = vmatpush.msra.mxu2 %v3147_v53  ;;  %1708 = vmatpush.msra.mxu3 %v3150_v28  ;;  %v3888_v53 = vld [vmem:[#allocation42_spill] sm:$0xff]  ;;  %v3889_v28 = vld [vmem:[#allocation33_spill] sm:$0xff] }
 0x45b   :  { %1728 = vmatpush.msrb.mxu0 %v3282_v63  ;;  %1748 = vmatpush.msrb.mxu1 %v3285_v43  ;;  %v3904_v63 = vld [vmem:[#allocation49_spill] sm:$0xff]  ;;  %v3905_v43 = vld [vmem:[#allocation50_spill] sm:$0xff] }
 0x45c   :  { %1689 = vmatpush.msra.mxu2 %v3155_v6  ;;  %1709 = vmatpush.msra.mxu3 %v3158_v56  ;;  %v3890_v6 = vld [vmem:[#allocation26_spill] sm:$0xff]  ;;  %v3891_v56 = vld [vmem:[#allocation27_spill] sm:$0xff] }
 0x45d   :  { %1729 = vmatpush.msrb.mxu0 %v3290_v52  ;;  %1749 = vmatpush.msrb.mxu1 %v3293_v4 }
 0x45e   :  { %1690 = vmatpush.msra.mxu2 %v3163_v10  ;;  %1710 = vmatpush.msra.mxu3 %v3166_v0  ;;  %v3892_v10 = vld [vmem:[#allocation34_spill] sm:$0xff] }
 0x45f   :  { %1730 = vmatpush.msrb.mxu0 %v3298_v44  ;;  %1750 = vmatpush.msrb.mxu1 %v3301_v20  ;;  %v3893_v0 = vld [vmem:[#allocation38_spill] sm:$0xff]  ;;  %v1331_v44 = vld [vmem:[#allocation2 + $0x38] sm:$0xc] }
 0x460   :  { %1691 = vmatpush.msra.mxu2 %v3171_v14  ;;  %1711 = vmatpush.msra.mxu3 %v3174_v9  ;;  %v3894_v14 = vld [vmem:[#allocation28_spill] sm:$0xff]  ;;  %v3895_v9 = vld [vmem:[#allocation35_spill] sm:$0xff] }
 0x461   :  { %1731 = vmatpush.msrb.mxu0 %v3306_v42  ;;  %1751 = vmatpush.msrb.mxu1 %v3309_v2 }
 0x462   :  { %1692 = vmatpush.msra.mxu2 %v3179_v17  ;;  %1712 = vmatpush.msra.mxu3 %v3182_v13  ;;  %v3896_v17 = vld [vmem:[#allocation43_spill] sm:$0xff] }
 0x463   :  { %1732 = vmatpush.msrb.mxu0 %v3314_v8  ;;  %1752 = vmatpush.msrb.mxu1 %v3317_v12  ;;  %v3897_v13 = vld [vmem:[#allocation39_spill] sm:$0xff] }
 0x464   :  { %1693 = vmatpush.msra.mxu2 %v3878_v36  ;;  %1713 = vmatpush.msra.mxu3 %v3879_v35 }
 0x465   :  { %1733 = vmatpush.msrb.mxu0 %v3880_v24  ;;  %1753 = vmatpush.msrb.mxu1 %v3881_v23 }
 0x466   :  { %1694 = vmatpush.msra.mxu2 %v3882_v16  ;;  %1714 = vmatpush.msra.mxu3 %v3883_v19 }
 0x467   :  { %1734 = vmatpush.msrb.mxu0 %v3884_v37  ;;  %1754 = vmatpush.msrb.mxu1 %v3885_v59 }
 0x468   :  { %1695 = vmatpush.msra.mxu2 %v3886_v48  ;;  %1715 = vmatpush.msra.mxu3 %v3887_v27 }
 0x469   :  { %1735 = vmatpush.msrb.mxu0 %v3888_v53  ;;  %1755 = vmatpush.msrb.mxu1 %v3889_v28 }
 0x46a   :  { %1696 = vmatpush.msra.mxu2 %v3890_v6  ;;  %1716 = vmatpush.msra.mxu3 %v3891_v56 }
 0x46b   :  { %1736 = vmatpush.msrb.mxu0 %v3892_v10  ;;  %1756 = vmatpush.msrb.mxu1 %v3893_v0 }
 0x46c   :  { %1697 = vmatpush.msra.mxu2 %v3894_v14  ;;  %1717 = vmatpush.msra.mxu3 %v3895_v9  ;;  %v1487_v9 = vrot.slane %v3464_v22, 6 }
 0x46d   :  { %1737 = vmatpush.msrb.mxu0 %v3896_v17  ;;  %1757 = vmatpush.msrb.mxu1 %v3897_v13 }
 0x46e   :  { %1698 = vmatpush.msra.mxu2 %v3898_v58  ;;  %1718 = vmatpush.msra.mxu3 %v3899_v62 }
 0x46f   :  { %1738 = vmatpush.msrb.mxu0 %v3900_v41  ;;  %1758 = vmatpush.msrb.mxu1 %v3901_v3 }
 0x470   :  { %1699 = vmatpush.msra.mxu2 %v3902_v11  ;;  %1719 = vmatpush.msra.mxu3 %v3903_v51 }
 0x471   :  { %1739 = vmatpush.msrb.mxu0 %v3904_v63  ;;  %1759 = vmatpush.msrb.mxu1 %v3905_v43 }
 0x4ce   :  { %v1409_v52 = vpop.f32.mrf.mxu1  ;;  %v1389_v34 = vpop.f32.mrf.mxu0 }
 0x4cf   :  { %v1419_v4 = vrot.slane %v1409_v52, 6  ;;  %v1418_v18 = vrot.slane %v1389_v34, 6  ;;  %v1498_v52 = vpop.permute.xlu2 %1497 }
 0x4d0   :  { %vm1499_vm4 = vcmp.eq.s32.totalorder %v1498_v52, 1 }
 0x4d1   :  { %v1427_v20 = vadd.f32 %v1419_v4, %v1331_v44  ;;  %v1426_v61 = vadd.f32 %v1418_v18, %v1330_v40 }
 0x4d3   :  { %v2109_v42 = vmul.f32 -1.442695, %v1427_v20  ;;  %v1349_v2 = vpop.f32.mrf.mxu2  ;;  %v1369_v8 = vpop.f32.mrf.mxu3 }
 0x4d4   :  { %v1416_v12 = vrot.slane %v1349_v2, 6  ;;  %v1417_v46 = vrot.slane %v1369_v8, 6 }
 0x4d5   :  { %2217 = vpow2.f32 %v2109_v42 }
 0x4d6   :  { %v1424_v47 = vadd.f32 %v1416_v12, %v1328_v54  ;;  %v1425_v7 = vadd.f32 %v1417_v46, %v1329_v25  ;;  %v1507_v12 = vld [vmem:[#allocation2 + $0x38] sm:$0x30] }
 0x4d8   :  { %v2107_v38 = vmul.f32 -1.442695, %v1424_v47  ;;  %v2108_v5 = vmul.f32 -1.442695, %v1425_v7 }
 0x4da   :  { %2219 = vpow2.f32 %v2107_v38 }
 0x4db   :  { %v2218_v45 = vpop.eup %2217  ;;  %2221 = vpow2.f32 %v2108_v5  ;;  %v1504_v5 = vld [vmem:[#allocation2 + $0x8] sm:$0x30] }
 0x4dc   :  { %v1470_v60 = vadd.f32 1.0, %v2218_v45  ;;  %v1505_v45 = vld [vmem:[#allocation2 + $0x20] sm:$0x30] }
 0x4de   :  { %2223 = vrcp.f32 %v1470_v60  ;;  %v1482_v11 = vand.u32 2147483648, %v1470_v60  ;;  %vm1476_vm1 = vweird.f32 %v1470_v60  ;;  %v1480_v51 = vand.u32 2147483647, %v1470_v60 }
 0x4e0   :  { %v2220_v1 = vpop.eup %2219  ;;  %v1483_v43 = vor.u32 1.1754944e-38, %v1482_v11  ;;  %vm1481_vm3 = vcmp.eq.f32.partialorder %v1480_v51, 8.507059e+37 }
 0x4e1   :  { %v2222_v15 = vpop.eup %2221  ;;  %v1431_v49 = vadd.f32 1.0, %v2220_v1 }
 0x4e2   :  { %v1450_v30 = vadd.f32 1.0, %v2222_v15 }
 0x4e3   :  { %2225 = vrcp.f32 %v1431_v49  ;;  %v1443_v35 = vand.u32 2147483648, %v1431_v49  ;;  %v1441_v16 = vand.u32 2147483647, %v1431_v49  ;;  %vm1437_vm10 = vweird.f32 %v1431_v49 }
 0x4e4   :  { %2227 = vrcp.f32 %v1450_v30  ;;  %v2224_v21 = vpop.eup %2223  ;;  %v1462_v19 = vand.u32 2147483648, %v1450_v30  ;;  %v1460_v59 = vand.u32 2147483647, %v1450_v30  ;;  %vm1456_vm12 = vweird.f32 %v1450_v30 }
 0x4e5   :  { %v1472_v31 = vmul.f32 %v2224_v21, %v1470_v60  ;;  %2229 = vtanh.f32 %v1426_v61  ;;  %v1444_v53 = vor.u32 1.1754944e-38, %v1443_v35  ;;  %vm1442_vm13 = vcmp.eq.f32.partialorder %v1441_v16, 8.507059e+37  ;;  %v3549_v61 = vld [vmem:[%s3650_s3] sm:$0xff] }
 0x4e6   :  { %v1463_v56 = vor.u32 1.1754944e-38, %v1462_v19  ;;  %vm1461_vm15 = vcmp.eq.f32.partialorder %v1460_v59, 8.507059e+37  ;;  %vm1477_vm0 = vweird.f32 %v2224_v21  ;;  %1946 = vperm.xlu0 %2131, %v3549_v61  }
 0x4e7   :  { %v1473_v48 = vsub.f32 1.0, %v1472_v31  ;;  %vm1478_vm2 = vmor %vm1476_vm1, %vm1477_vm0 }
 0x4e9   :  { %v2226_v39 = vpop.eup %2225  ;;  %v1474_v17 = vmul.f32 %v2224_v21, %v1473_v48 }
 0x4ea   :  { %v2228_v33 = vpop.eup %2227  ;;  %v1433_v50 = vmul.f32 %v2226_v39, %v1431_v49  ;;  %vm1438_vm8 = vweird.f32 %v2226_v39 }
 0x4eb   :  { %v1452_v32 = vmul.f32 %v2228_v33, %v1450_v30  ;;  %vm1457_vm9 = vweird.f32 %v2228_v33  ;;  %vm1439_vm11 = vmor %vm1437_vm10, %vm1438_vm8  ;;  %v2230_v10 = vpop.eup %2229  ;;  %v1475_v3 = vadd.f32 %v2224_v21, %v1474_v17 }
 0x4ec   :  { %v1434_v36 = vsub.f32 1.0, %v1433_v50  ;;  %vm1458_vm14 = vmor %vm1456_vm12, %vm1457_vm9 }
 0x4ed   :  { %v1453_v24 = vsub.f32 1.0, %v1452_v32  ;;  %v1479_v63 = vsel %vm1478_vm2, %v2224_v21, %v1475_v3  ;;  %v1506_v32 = vld [vmem:[#allocation2 + $0x28] sm:$0x30] }
 0x4ee   :  { %v1435_v23 = vmul.f32 %v2226_v39, %v1434_v36  ;;  %v1484_v22 = vsel %vm1481_vm3, %v1483_v43, %v1479_v63 }
 0x4ef   :  { %v1454_v37 = vmul.f32 %v2228_v33, %v1453_v24 }
 0x4f0   :  { %v1436_v27 = vadd.f32 %v2226_v39, %v1435_v23 }
 0x4f1   :  { %v1455_v28 = vadd.f32 %v2228_v33, %v1454_v37 }
 0x4f2   :  { %v1440_v6 = vsel %vm1439_vm11, %v2226_v39, %v1436_v27 }
 0x4f3   :  { %v1445_v0 = vsel %vm1442_vm13, %v1444_v53, %v1440_v6  ;;  %v1459_v14 = vsel %vm1458_vm14, %v2228_v33, %v1455_v28  ;;  %v1847_v33 = vsel %vm1846_vm5, 1, %v3907_v55 }
 0x4f4   :  { %v1490_v13 = vmul.f32 %v2230_v10, %v1445_v0  ;;  %v1464_v58 = vsel %vm1461_vm15, %v1463_v56, %v1459_v14  ;;  %1849 = vperm.xlu1 %2132, %v1847_v33  }
 0x4f5   :  { %v1489_v62 = vmul.f32 %v1487_v9, %v1464_v58 }
 0x4f7   :  { %v3537_v41 = vadd.f32 %v1490_v13, %v1489_v62 }
 0x4f9   :  { %2231 = vtanh.f32 %v3537_v41  ;;  %v1663_v58 = vrot.slane %v3537_v41, 6  ;;  %v1674_v41 = vpop.permute.xlu0 %1673 }
 0x4fa   :  { %vm1675_vm2 = vcmp.eq.s32.totalorder %v1674_v41, 1 }
 0x4ff   :  { %v2232_v4 = vpop.eup %2231 }
 0x500   :  { %v1493_v44 = vmul.f32 %v2232_v4, %v1484_v22 }
 0x502   :  { %v1501_v20 = vrot.slane %v1493_v44, 2 }
 0x504   :  { %v3541_v42 = vsel %vm1499_vm4, %v1501_v20, %v3468_v26  ;;  %1524 = vmatmul.f32.vlgmr.msrb.gmra.mxu2 %v1501_v20  ;;  %1544 = vmatmul.f32.vlgmr.msrb.gmra.mxu3 %v1501_v20 }
 0x505   :  { %1564 = vmatmul.f32.vlgmr.msra.gmra.mxu0 %v1501_v20  ;;  %1584 = vmatmul.f32.vlgmr.msra.gmra.mxu1 %v1501_v20 }
 0x582   :  { %v1585_v2 = vpop.f32.mrf.mxu1  ;;  %v1565_v21 = vpop.f32.mrf.mxu0 }
 0x583   :  { %v1595_v8 = vrot.slane %v1585_v2, 4  ;;  %v1594_v39 = vrot.slane %v1565_v21, 4  ;;  %v1680_v21 = vld [vmem:[#allocation2 + $0x8] sm:$0xc0] }
 0x585   :  { %v1603_v46 = vadd.f32 %v1595_v8, %v1507_v12  ;;  %v1602_v36 = vadd.f32 %v1594_v39, %v1506_v32  ;;  %v1863_v39 = vld [vmem:[#allocation12 + $0x38] sm:$0xff]  ;;  %v1862_v32 = vld [vmem:[#allocation12 + $0x30] sm:$0xff] }
 0x587   :  { %v2112_v54 = vmul.f32 -1.442695, %v1603_v46  ;;  %v1525_v25 = vpop.f32.mrf.mxu2  ;;  %v1545_v47 = vpop.f32.mrf.mxu3 }
 0x588   :  { %v1592_v7 = vrot.slane %v1525_v25, 4  ;;  %v1593_v38 = vrot.slane %v1545_v47, 4  ;;  %v1870_v25 = vld [vmem:[#allocation12 + $0x70] sm:$0xff]  ;;  %v1869_v47 = vld [vmem:[#allocation12 + $0x68] sm:$0xff] }
 0x589   :  { %2233 = vpow2.f32 %v2112_v54  ;;  %v1871_v54 = vld [vmem:[#allocation12 + $0x78] sm:$0xff] }
 0x58a   :  { %v1600_v60 = vadd.f32 %v1592_v7, %v1504_v5  ;;  %v1601_v1 = vadd.f32 %v1593_v38, %v1505_v45  ;;  %1876 = vmatpush.msrb.mxu2 %v1871_v54  ;;  %v1868_v7 = vld [vmem:[#allocation12 + $0x60] sm:$0xff]  ;;  %v1867_v38 = vld [vmem:[#allocation12 + $0x58] sm:$0xff] }
 0x58c   :  { %v2110_v26 = vmul.f32 -1.442695, %v1600_v60  ;;  %v2111_v15 = vmul.f32 -1.442695, %v1601_v1  ;;  %1877 = vmatpush.msrb.mxu2 %v1870_v25  ;;  %v1866_v60 = vld [vmem:[#allocation12 + $0x50] sm:$0xff] }
 0x58d   :  { %v1683_v1 = vld [vmem:[#allocation2 + $0x38] sm:$0xc0] }
 0x58e   :  { %2235 = vpow2.f32 %v2110_v26  ;;  %1878 = vmatpush.msrb.mxu2 %v1869_v47  ;;  %v1865_v26 = vld [vmem:[#allocation12 + $0x48] sm:$0xff] }
 0x58f   :  { %v2234_v49 = vpop.eup %2233  ;;  %2237 = vpow2.f32 %v2111_v15 }
 0x590   :  { %v3543_v34 = vadd.f32 1.0, %v2234_v49  ;;  %1879 = vmatpush.msrb.mxu2 %v1868_v7 }
 0x592   :  { %2239 = vrcp.f32 %v3543_v34  ;;  %v1658_v52 = vand.u32 2147483648, %v3543_v34  ;;  %vm1652_vm15 = vweird.f32 %v3543_v34  ;;  %v1656_v4 = vand.u32 2147483647, %v3543_v34  ;;  %1880 = vmatpush.msrb.mxu2 %v1867_v38 }
 0x594   :  { %v2236_v30 = vpop.eup %2235  ;;  %v1659_v44 = vor.u32 1.1754944e-38, %v1658_v52  ;;  %vm1657_vm1 = vcmp.eq.f32.partialorder %v1656_v4, 8.507059e+37  ;;  %1881 = vmatpush.msrb.mxu2 %v1866_v60 }
 0x595   :  { %v2238_v18 = vpop.eup %2237  ;;  %v1607_v57 = vadd.f32 1.0, %v2236_v30  ;;  %v1864_v30 = vld [vmem:[#allocation12 + $0x40] sm:$0xff] }
 0x596   :  { %v1626_v40 = vadd.f32 1.0, %v2238_v18  ;;  %1882 = vmatpush.msrb.mxu2 %v1865_v26 }
 0x597   :  { %2241 = vrcp.f32 %v1607_v57  ;;  %v1619_v37 = vand.u32 2147483648, %v1607_v57  ;;  %v1617_v27 = vand.u32 2147483647, %v1607_v57  ;;  %vm1613_vm8 = vweird.f32 %v1607_v57 }
 0x598   :  { %2243 = vrcp.f32 %v1626_v40  ;;  %v2240_v50 = vpop.eup %2239  ;;  %v1638_v29 = vand.u32 2147483648, %v1626_v40  ;;  %v1636_v55 = vand.u32 2147483647, %v1626_v40  ;;  %vm1632_vm10 = vweird.f32 %v1626_v40  ;;  %1883 = vmatpush.msrb.mxu2 %v1864_v30 }
 0x599   :  { %v1648_v16 = vmul.f32 %v2240_v50, %v3543_v34  ;;  %2245 = vtanh.f32 %v1602_v36  ;;  %v1620_v56 = vor.u32 1.1754944e-38, %v1619_v37  ;;  %vm1618_vm11 = vcmp.eq.f32.partialorder %v1617_v27, 8.507059e+37  ;;  %v1858_v37 = vld [vmem:[#allocation12 + $0x10] sm:$0xff] }
 0x59a   :  { %v1639_v14 = vor.u32 1.1754944e-38, %v1638_v29  ;;  %vm1637_vm13 = vcmp.eq.f32.partialorder %v1636_v55, 8.507059e+37  ;;  %vm1653_vm14 = vweird.f32 %v2240_v50  ;;  %1884 = vmatpush.msrb.mxu2 %v1863_v39  ;;  %v1857_v29 = vld [vmem:[#allocation12 + $0x8] sm:$0xff]  ;;  %v2136_v39 = vld [vmem:[%s3660_s13] ss:$0 sm:$0xff] }
 0x59b   :  { %v1649_v28 = vsub.f32 1.0, %v1648_v16  ;;  %vm1654_vm0 = vmor %vm1652_vm15, %vm1653_vm14  ;;  %v1859_v16 = vld [vmem:[#allocation12 + $0x18] sm:$0xff] }
 0x59c   :  { %1885 = vmatpush.msrb.mxu2 %v1862_v32  ;;  %v3580_v32 = vld [vmem:[%s3651_s4] sm:$0xff] }
 0x59d   :  { %v2242_v31 = vpop.eup %2241  ;;  %v1650_v62 = vmul.f32 %v2240_v50, %v1649_v28  ;;  %v1856_v28 = vld [vmem:[#allocation12] sm:$0xff] }
 0x59e   :  { %v2244_v35 = vpop.eup %2243  ;;  %v1609_v24 = vmul.f32 %v2242_v31, %v1607_v57  ;;  %vm1614_vm6 = vweird.f32 %v2242_v31 }
 0x59f   :  { %v1628_v23 = vmul.f32 %v2244_v35, %v1626_v40  ;;  %vm1633_vm7 = vweird.f32 %v2244_v35  ;;  %vm1615_vm9 = vmor %vm1613_vm8, %vm1614_vm6  ;;  %v2246_v9 = vpop.eup %2245  ;;  %v1651_v43 = vadd.f32 %v2240_v50, %v1650_v62  ;;  %v1681_v40 = vld [vmem:[#allocation2 + $0x20] sm:$0xc0] }
 0x5a0   :  { %v1610_v19 = vsub.f32 1.0, %v1609_v24  ;;  %vm1634_vm12 = vmor %vm1632_vm10, %vm1633_vm7 }
 0x5a1   :  { %v1629_v59 = vsub.f32 1.0, %v1628_v23  ;;  %v1655_v22 = vsel %vm1654_vm0, %v2240_v50, %v1651_v43  ;;  %v1860_v23 = vld [vmem:[#allocation12 + $0x20] sm:$0xff]  ;;  %vm1901_vm0 = vcmask 1041408  }
 0x5a2   :  { %v1611_v48 = vmul.f32 %v2242_v31, %v1610_v19  ;;  %v1660_v2 = vsel %vm1657_vm1, %v1659_v44, %v1655_v22  ;;  %vm1897_vm1 = vcmask 15360  }
 0x5a3   :  { %v1630_v53 = vmul.f32 %v2244_v35, %v1629_v59 }
 0x5a4   :  { %v1612_v6 = vadd.f32 %v2242_v31, %v1611_v48 }
 0x5a5   :  { %v1631_v10 = vadd.f32 %v2244_v35, %v1630_v53 }
 0x5a6   :  { %v1616_v0 = vsel %vm1615_vm9, %v2242_v31, %v1612_v6 }
 0x5a7   :  { %v1621_v17 = vsel %vm1618_vm11, %v1620_v56, %v1616_v0  ;;  %v1635_v13 = vsel %vm1634_vm12, %v2244_v35, %v1631_v10  ;;  %v1861_v35 = vld [vmem:[#allocation12 + $0x28] sm:$0xff]  ;;  %v1682_v10 = vld [vmem:[#allocation2 + $0x28] sm:$0xc0] }
 0x5a8   :  { %v1666_v3 = vmul.f32 %v2246_v9, %v1621_v17  ;;  %v1640_v11 = vsel %vm1637_vm13, %v1639_v14, %v1635_v13  ;;  %1886 = vmatpush.msrb.mxu2 %v1861_v35  ;;  %v3909_v35 = vld [vmem:[#allocation45_spill] sm:$0xff] }
 0x5a9   :  { %v1665_v51 = vmul.f32 %v1663_v58, %v1640_v11 }
 0x5aa   :  { %1887 = vmatpush.msrb.mxu2 %v1860_v23  ;;  %v3910_v23 = vld [vmem:[#allocation46_spill] sm:$0xff] }
 0x5ab   :  { %v3556_v63 = vadd.f32 %v1666_v3, %v1665_v51 }
 0x5ac   :  { %1888 = vmatpush.msrb.mxu2 %v1859_v16 }
 0x5ad   :  { %2247 = vtanh.f32 %v3556_v63  ;;  %v1839_v7 = vrot.slane %v3556_v63, 6 }
 0x5ae   :  { %1889 = vmatpush.msrb.mxu2 %v1858_v37 }
 0x5b0   :  { %1890 = vmatpush.msrb.mxu2 %v1857_v29 }
 0x5b2   :  { %1891 = vmatpush.msrb.mxu2 %v1856_v28  ;;  %v1972_v28 = vld [vmem:[%s3650_s3 + $0x8] sm:$0xff] }
 0x5b3   :  { %v2248_v20 = vpop.eup %2247 }
 0x5b4   :  { %v1669_v8 = vmul.f32 %v2248_v20, %v1660_v2 }
 0x5b6   :  { %v1677_v12 = vrot.slane %v1669_v8, 4 }
 0x5b8   :  { %v3563_v46 = vsel %vm1675_vm2, %v1677_v12, %v3541_v42  ;;  %1700 = vmatmul.f32.vlgmr.msra.gmra.mxu2 %v1677_v12  ;;  %1720 = vmatmul.f32.vlgmr.msra.gmra.mxu3 %v1677_v12 }
 0x5b9   :  { %1740 = vmatmul.f32.vlgmr.msrb.gmra.mxu0 %v1677_v12  ;;  %1760 = vmatmul.f32.vlgmr.msrb.gmra.mxu1 %v1677_v12 }
 0x636   :  { %v1761_v5 = vpop.f32.mrf.mxu1  ;;  %v1741_v53 = vpop.f32.mrf.mxu0 }
 0x637   :  { %v1771_v45 = vrot.slane %v1761_v5, 2  ;;  %v1770_v6 = vrot.slane %v1741_v53, 2 }
 0x639   :  { %v1779_v42 = vadd.f32 %v1771_v45, %v1683_v1  ;;  %v1778_v14 = vadd.f32 %v1770_v6, %v1682_v10  ;;  %v1947_v6 = vpop.permute.xlu0 %1946 }
 0x63b   :  { %v2115_v15 = vmul.f32 -1.442695, %v1779_v42  ;;  %v1701_v49 = vpop.f32.mrf.mxu2  ;;  %v1721_v34 = vpop.f32.mrf.mxu3 }
 0x63c   :  { %v1768_v18 = vrot.slane %v1701_v49, 2  ;;  %v1769_v57 = vrot.slane %v1721_v34, 2 }
 0x63d   :  { %2249 = vpow2.f32 %v2115_v15 }
 0x63e   :  { %v1776_v33 = vadd.f32 %v1768_v18, %v1680_v21  ;;  %v1777_v50 = vadd.f32 %v1769_v57, %v1681_v40  ;;  %v1850_v18 = vpop.permute.xlu1 %1849 }
 0x63f   :  { %vm1851_vm15 = vcmp.eq.s32.totalorder %v1850_v18, 1 }
 0x640   :  { %v2113_v31 = vmul.f32 -1.442695, %v1776_v33  ;;  %v2114_v36 = vmul.f32 -1.442695, %v1777_v50 }
 0x642   :  { %2251 = vpow2.f32 %v2113_v31  ;;  %v3908_v31 = vld [vmem:[#allocation44_spill] sm:$0xff] }
 0x643   :  { %v2250_v24 = vpop.eup %2249  ;;  %2253 = vpow2.f32 %v2114_v36 }
 0x644   :  { %v3565_v19 = vadd.f32 1.0, %v2250_v24 }
 0x646   :  { %2255 = vrcp.f32 %v3565_v19  ;;  %v1834_v26 = vand.u32 2147483648, %v3565_v19  ;;  %vm1828_vm12 = vweird.f32 %v3565_v19  ;;  %v1832_v15 = vand.u32 2147483647, %v3565_v19 }
 0x648   :  { %v2252_v59 = vpop.eup %2251  ;;  %v1835_v34 = vor.u32 1.1754944e-38, %v1834_v26  ;;  %vm1833_vm14 = vcmp.eq.f32.partialorder %v1832_v15, 8.507059e+37 }
 0x649   :  { %v2254_v48 = vpop.eup %2253  ;;  %v1783_v27 = vadd.f32 1.0, %v2252_v59 }
 0x64a   :  { %v1802_v55 = vadd.f32 1.0, %v2254_v48 }
 0x64b   :  { %2257 = vrcp.f32 %v1783_v27  ;;  %v1795_v3 = vand.u32 2147483648, %v1783_v27  ;;  %v1793_v43 = vand.u32 2147483647, %v1783_v27  ;;  %vm1789_vm5 = vweird.f32 %v1783_v27 }
 0x64c   :  { %2259 = vrcp.f32 %v1802_v55  ;;  %v2256_v56 = vpop.eup %2255  ;;  %v1814_v52 = vand.u32 2147483648, %v1802_v55  ;;  %v1812_v22 = vand.u32 2147483647, %v1802_v55  ;;  %vm1808_vm7 = vweird.f32 %v1802_v55 }
 0x64d   :  { %v1824_v58 = vmul.f32 %v2256_v56, %v3565_v19  ;;  %2261 = vtanh.f32 %v1778_v14  ;;  %v1796_v20 = vor.u32 1.1754944e-38, %v1795_v3  ;;  %vm1794_vm8 = vcmp.eq.f32.partialorder %v1793_v43, 8.507059e+37 }
 0x64e   :  { %v1815_v8 = vor.u32 1.1754944e-38, %v1814_v52  ;;  %vm1813_vm10 = vcmp.eq.f32.partialorder %v1812_v22, 8.507059e+37  ;;  %vm1829_vm11 = vweird.f32 %v2256_v56 }
 0x64f   :  { %v1825_v44 = vsub.f32 1.0, %v1824_v58  ;;  %vm1830_vm13 = vmor %vm1828_vm12, %vm1829_vm11 }
 0x651   :  { %v2258_v0 = vpop.eup %2257  ;;  %v1826_v5 = vmul.f32 %v2256_v56, %v1825_v44 }
 0x652   :  { %v2260_v9 = vpop.eup %2259  ;;  %v1785_v17 = vmul.f32 %v2258_v0, %v1783_v27  ;;  %vm1790_vm3 = vweird.f32 %v2258_v0 }
 0x653   :  { %v1804_v13 = vmul.f32 %v2260_v9, %v1802_v55  ;;  %vm1809_vm4 = vweird.f32 %v2260_v9  ;;  %vm1791_vm6 = vmor %vm1789_vm5, %vm1790_vm3  ;;  %v2262_v54 = vpop.eup %2261  ;;  %v1827_v42 = vadd.f32 %v2256_v56, %v1826_v5  ;;  %v2019_v55 = vld [vmem:[%s3650_s3 + $0x10] sm:$0xff]  ;;  %s2526_s3 = smov [#allocation14]  }
 0x654   :  { %v1786_v62 = vsub.f32 1.0, %v1785_v17  ;;  %vm1810_vm9 = vmor %vm1808_vm7, %vm1809_vm4  ;;  %s2077_s27 = sshll.u32 %s2526_s3, 4  ;;  %s2078_s27 = int_to_ptr.vmem [resolvable:$true] %s2077_s27 }
 0x655   :  { %v1805_v11 = vsub.f32 1.0, %v1804_v13  ;;  %v1831_v49 = vsel %vm1830_vm13, %v2256_v56, %v1827_v42 }
 0x656   :  { %v1787_v51 = vmul.f32 %v2258_v0, %v1786_v62  ;;  %v1836_v63 = vsel %vm1833_vm14, %v1835_v34, %v1831_v49  ;;  %v1949_v62 = vmul.f32 %v1947_v6, %v3580_v32  ;;  %vm2066_vm14 = vcmask 1040384  }
 0x657   :  { %v1806_v4 = vmul.f32 %v2260_v9, %v1805_v11 }
 0x658   :  { %v1788_v41 = vadd.f32 %v2258_v0, %v1787_v51  ;;  %v1950_v51 = vsel %vm1897_vm1, %v1949_v62, 0.0 }
 0x659   :  { %v1807_v2 = vadd.f32 %v2260_v9, %v1806_v4 }
 0x65a   :  { %v1792_v12 = vsel %vm1791_vm6, %v2258_v0, %v1788_v41 }
 0x65b   :  { %v1797_v25 = vsel %vm1794_vm8, %v1796_v20, %v1792_v12  ;;  %v1811_v47 = vsel %vm1810_vm9, %v2260_v9, %v1807_v2 }
 0x65c   :  { %v1816_v38 = vsel %vm1813_vm10, %v1815_v8, %v1811_v47  ;;  %v1842_v45 = vmul.f32 %v2262_v54, %v1797_v25 }
 0x65d   :  { %v1841_v60 = vmul.f32 %v1839_v7, %v1816_v38 }
 0x65f   :  { %v1843_v1 = vadd.f32 %v1842_v45, %v1841_v60 }
 0x661   :  { %2263 = vtanh.f32 %v1843_v1 }
 0x667   :  { %v2264_v30 = vpop.eup %2263 }
 0x668   :  { %v1845_v57 = vmul.f32 %v2264_v30, %v1836_v63 }
 0x66a   :  { %v1853_v21 = vrot.slane %v1845_v57, 6 }
 0x66c   :  { %v1855_v40 = vsel %vm1851_vm15, %v1853_v21, %v3563_v46  ;;  %v2135_v46 = vld [vmem:[%s3655_s8] ss:$0 sm:$0xff]  ;;  %vm2070_vm15 = vcmask 10240  }
 0x66d   :  { %1892 = vmatmul.f32.vlgmr.msrb.gmra.mxu2 %v1855_v40  ;;  %v232_v36 = vadd.f32 %v2135_v46, %v3908_v31  ;;  %v235_v24 = vadd.f32 %v2135_v46, %v3909_v35  ;;  %v238_v16 = vadd.f32 %v2135_v46, %v3910_v23 }
 0x6f0   :  { %v1893_v33 = vpop.f32.mrf.mxu2 }
 0x6f1   :  { %v1894_v50 = vadd.f32 %v2136_v39, %v1893_v33 }
 0x6f3   :  { %2116 = vmatpush.msk.msrb.mxu3 %vm1901_vm0, %v1894_v50 }
 0x6f4   :  { %2117 = vmatmul.msk.f32.vlgmr.msrb.gmra.mxu3 %vm1897_vm1, %v3580_v32 }
 0x777   :  { %v1922_v19 = vpop.f32.mrf.mxu3 }
 0x778   :  { %v1926_v37 = vsub.f32 %v232_v36, %v1922_v19  ;;  %v1973_v59 = vsub.f32 %v235_v24, %v1922_v19  ;;  %v2020_v48 = vsub.f32 %v238_v16, %v1922_v19 }
 0x77a   :  { %v2021_v27 = vmul.f32 %v2020_v48, %v2020_v48  ;;  %v1974_v29 = vmul.f32 %v1973_v59, %v1973_v59  ;;  %v1927_v53 = vmul.f32 %v1926_v37, %v1926_v37 }
 0x77c   :  { %2022 = vadd.xlane.f32.xlu1 %v2021_v27  ;;  %1975 = vadd.xlane.f32.xlu0 %v1974_v29 }
 0x77d   :  { %1928 = vadd.xlane.f32.xlu2 %v1927_v53 }
 0x795   :  { %2040 = vperm.xlu2 %2133, %v2019_v55   ;;  %1993 = vperm.xlu1 %2132, %v1972_v28  }
 0x7ef   :  { %v1976_v56 = vpop.xlane.xlu0 %1975  ;;  %v2023_v9 = vpop.xlane.xlu1 %2022 }
 0x7f0   :  { %v1977_v10 = vmul.f32 %v1976_v56, %v1972_v28  ;;  %v1929_v0 = vpop.xlane.xlu2 %1928  ;;  %v2024_v17 = vmul.f32 %v2023_v9, %v2019_v55 }
 0x7f1   :  { %v1930_v14 = vmul.f32 %v1929_v0, %v3549_v61  ;;  %v1951_v61 = vrot.slane %v1950_v51, 4 }
 0x7f2   :  { %1980 = vperm.xlu0 %2131, %v1977_v10  }
 0x7f3   :  { %1933 = vperm.xlu2 %2133, %v1930_v14   ;;  %v1952_v44 = vadd.f32 %v1951_v61, %v1950_v51 }
 0x7f5   :  { %v1953_v2 = vrot.slane %v1952_v44, 2 }
 0x7f7   :  { %v1954_v54 = vadd.f32 %v1953_v2, %v1952_v44 }
 0x7f8   :  { %v2041_v58 = vpop.permute.xlu2 %2040 }
 0x7f9   :  { %v2043_v11 = vmul.f32 %v2041_v58, %v3580_v32  ;;  %v1955_v38 = vrot.slane %v1954_v54, 1 }
 0x7fb   :  { %2027 = vperm.xlu2 %2133, %v2024_v17   ;;  %v2044_v52 = vsel %vm1897_vm1, %v2043_v11, 0.0  ;;  %v1956_v60 = vadd.f32 %v1955_v38, %v1954_v54 }
 0x7fc   :  { %v2045_v22 = vrot.slane %v2044_v52, 4 }
 0x7fd   :  { %2265 = vrcp.f32 %v1956_v60  ;;  %vm1962_vm2 = vweird.f32 %v1956_v60  ;;  %v1966_v10 = vand.u32 2147483647, %v1956_v60  ;;  %v1968_v0 = vand.u32 2147483648, %v1956_v60 }
 0x7fe   :  { %v2046_v20 = vadd.f32 %v2045_v22, %v2044_v52 }
 0x7ff   :  { %v1969_v52 = vor.u32 1.1754944e-38, %v1968_v0  ;;  %vm1967_vm10 = vcmp.eq.f32.partialorder %v1966_v10, 8.507059e+37 }
 0x800   :  { %v2047_v12 = vrot.slane %v2046_v20, 2 }
 0x802   :  { %v2048_v47 = vadd.f32 %v2047_v12, %v2046_v20 }
 0x803   :  { %v2266_v63 = vpop.eup %2265 }
 0x804   :  { %v2049_v45 = vrot.slane %v2048_v47, 1  ;;  %v1958_v39 = vmul.f32 %v2266_v63, %v1956_v60  ;;  %vm1963_vm3 = vweird.f32 %v2266_v63 }
 0x805   :  { %vm3622_vm4 = vmor %vm1962_vm2, %vm1963_vm3 }
 0x806   :  { %v3606_v42 = vadd.f32 %v2049_v45, %v2048_v47  ;;  %v1959_v36 = vsub.f32 1.0, %v1958_v39 }
 0x807   :  { %v1994_v13 = vpop.permute.xlu1 %1993 }
 0x808   :  { %v1996_v3 = vmul.f32 %v1994_v13, %v3580_v32  ;;  %v1960_v59 = vmul.f32 %v2266_v63, %v1959_v36  ;;  %vm2056_vm8 = vweird.f32 %v3606_v42  ;;  %v2060_v61 = vand.u32 2147483647, %v3606_v42 }
 0x80a   :  { %v1997_v43 = vsel %vm1897_vm1, %v1996_v3, 0.0  ;;  %v1961_v56 = vadd.f32 %v2266_v63, %v1960_v59  ;;  %v2062_v3 = vand.u32 2147483648, %v3606_v42  ;;  %vm2061_vm13 = vcmp.eq.f32.partialorder %v2060_v61, 8.507059e+37 }
 0x80b   :  { %v1998_v4 = vrot.slane %v1997_v43, 4 }
 0x80c   :  { %v2063_v12 = vor.u32 1.1754944e-38, %v2062_v3 }
 0x80d   :  { %v1999_v41 = vadd.f32 %v1998_v4, %v1997_v43  ;;  %v1965_v43 = vsel %vm3622_vm4, %v2266_v63, %v1961_v56 }
 0x80f   :  { %v2000_v8 = vrot.slane %v1999_v41, 2 }
 0x811   :  { %v2001_v25 = vadd.f32 %v2000_v8, %v1999_v41 }
 0x813   :  { %v2002_v5 = vrot.slane %v2001_v25, 1 }
 0x815   :  { %v3604_v1 = vadd.f32 %v2002_v5, %v2001_v25  ;;  %v1970_v25 = vsel %vm1967_vm10, %v1969_v52, %v1965_v43 }
 0x817   :  { %2267 = vrcp.f32 %v3604_v1  ;;  %v2015_v62 = vand.u32 2147483648, %v3604_v1  ;;  %vm2009_vm7 = vweird.f32 %v3604_v1  ;;  %v2013_v11 = vand.u32 2147483647, %v3604_v1 }
 0x818   :  { %2269 = vrcp.f32 %v3606_v42 }
 0x819   :  { %v2016_v8 = vor.u32 1.1754944e-38, %v2015_v62  ;;  %vm2014_vm12 = vcmp.eq.f32.partialorder %v2013_v11, 8.507059e+37 }
 0x81d   :  { %v2268_v57 = vpop.eup %2267 }
 0x81e   :  { %v3614_v40 = vpop.eup %2269  ;;  %v2005_v33 = vmul.f32 %v2268_v57, %v3604_v1  ;;  %vm2010_vm5 = vweird.f32 %v2268_v57 }
 0x81f   :  { %v2052_v46 = vmul.f32 %v3614_v40, %v3606_v42  ;;  %vm2057_vm6 = vweird.f32 %v3614_v40  ;;  %vm2011_vm9 = vmor %vm2009_vm7, %vm2010_vm5 }
 0x820   :  { %v2006_v35 = vsub.f32 1.0, %v2005_v33  ;;  %vm3636_vm11 = vmor %vm2056_vm8, %vm2057_vm6 }
 0x821   :  { %v2053_v16 = vsub.f32 1.0, %v2052_v46 }
 0x822   :  { %v2007_v29 = vmul.f32 %v2268_v57, %v2006_v35 }
 0x823   :  { %v2054_v55 = vmul.f32 %v3614_v40, %v2053_v16 }
 0x824   :  { %v2008_v9 = vadd.f32 %v2268_v57, %v2007_v29 }
 0x825   :  { %v2055_v13 = vadd.f32 %v3614_v40, %v2054_v55 }
 0x826   :  { %v2012_v44 = vsel %vm2011_vm9, %v2268_v57, %v2008_v9 }
 0x827   :  { %v2059_v20 = vsel %vm3636_vm11, %v3614_v40, %v2055_v13  ;;  %v2017_v47 = vsel %vm2014_vm12, %v2016_v8, %v2012_v44 }
 0x828   :  { %v2064_v38 = vsel %vm2061_vm13, %v2063_v12, %v2059_v20 }
 0x84d   :  { %v1934_v7 = vpop.permute.xlu2 %1933 }
 0x84e   :  { %v1936_v26 = vmul.f32 %v1934_v7, %v3580_v32 }
 0x850   :  { %v1937_v34 = vsel %vm1897_vm1, %v1936_v26, 0.0 }
 0x851   :  { %v1938_v18 = vrot.slane %v1937_v34, 4 }
 0x853   :  { %v1939_v50 = vadd.f32 %v1938_v18, %v1937_v34 }
 0x855   :  { %v2028_v15 = vpop.permute.xlu2 %2027  ;;  %v1940_v24 = vrot.slane %v1939_v50, 2 }
 0x856   :  { %v2030_v49 = vmul.f32 %v2028_v15, %v3580_v32 }
 0x857   :  { %v1941_v27 = vadd.f32 %v1940_v24, %v1939_v50 }
 0x858   :  { %v2031_v30 = vsel %vm1897_vm1, %v2030_v49, 0.0 }
 0x859   :  { %v2032_v21 = vrot.slane %v2031_v30, 4 }
 0x85b   :  { %v2033_v31 = vadd.f32 %v2032_v21, %v2031_v30 }
 0x85d   :  { %v2034_v19 = vrot.slane %v2033_v31, 2 }
 0x85f   :  { %v2035_v28 = vadd.f32 %v2034_v19, %v2033_v31 }
 0x861   :  { %v2036_v58 = vrot.slane %v2035_v28, 1 }
 0x863   :  { %v2037_v2 = vadd.f32 %v2036_v58, %v2035_v28 }
 0x864   :  { %v1981_v23 = vpop.permute.xlu0 %1980 }
 0x865   :  { %v1983_v37 = vmul.f32 %v1981_v23, %v3580_v32  ;;  %v1942_v32 = vrot.slane %v1941_v27, 1  ;;  %v2065_v45 = vmul.f32 %v2064_v38, %v2037_v2 }
 0x867   :  { %v1984_v48 = vsel %vm1897_vm1, %v1983_v37, 0.0  ;;  %v1943_v4 = vadd.f32 %v1942_v32, %v1941_v27 }
 0x868   :  { %v1985_v53 = vrot.slane %v1984_v48, 4 }
 0x869   :  { %v1971_v7 = vmul.f32 %v1970_v25, %v1943_v4 }
 0x86a   :  { %v1986_v6 = vadd.f32 %v1985_v53, %v1984_v48 }
 0x86c   :  { %v1987_v17 = vrot.slane %v1986_v6, 2 }
 0x86e   :  { %v1988_v51 = vadd.f32 %v1987_v17, %v1986_v6 }
 0x870   :  { %v1989_v41 = vrot.slane %v1988_v51, 1 }
 0x872   :  { %v1990_v54 = vadd.f32 %v1989_v41, %v1988_v51 }
 0x874   :  { %v2018_v5 = vmul.f32 %v2017_v47, %v1990_v54 }
 0x876   :  { %v2067_v60 = vsel %vm2066_vm14, %v1971_v7, %v2018_v5 }
 0x877   :  { %v2068_v1 = vsel %vm1901_vm0, %v2067_v60, %v2065_v45 }
 0x878   :  { %2071 = vst.msk [vmem:[#allocation14] sm:$0x7] %vm2070_vm15, %v2068_v1 }
 0x879   :  { %2082 = dma.vmem_to_hbm [thread:$0]  %s2078_s27, 128, %s2080_s10, [#allocation5]  }
 0x87a   :  { %2512 = dma.done.wait [#allocation5], 128  }
 0x87b   :  { %2513 = vsyncadd [#allocation5], 4294967168 }
 0x87c   :  { %2087 = vsyncpa [#allocation4], 1 }
 0x87d   :  { %2088 = vsyncpa [#allocation7], 1 }
 0x87e   :  { %2089 = vsyncpa [#allocation10], 1 }
 0x87f   :  { %2090 = vsyncpa [#allocation13], 1 }
 0x880   :  { %2091 = vsyncpa [#allocation5], 1 }

</bundles_post_ra>
